<compile_context>
chip_gen: v5e
topology: v5e:2x2
jax: 0.10.0
libtpu: 0.0.40
codegen_flags: <defaults>
</compile_context>

<pallas_src>
import functools
import numpy as np

import jax
import jax.numpy as jnp
from jax.experimental import pallas as pl
from jax.experimental.pallas import tpu as pltpu

# ----------------------------- small-model config ----------------------------
IMG_SIZE = (16, 16)
PATCH_SIZE = (4, 4)
IN_CHANS = 3
EMBED_DIM = 32
DEPTH = 2
NUM_HEADS = 4
DEC_EMBED_DIM = 32
DEC_DEPTH = 1
DEC_NUM_HEADS = 4
MLP_RATIO = 4.0
MASK_RATIO = 0.75
LN_EPS = 1e-5  # torch.nn.LayerNorm default

GRID = (IMG_SIZE[0] // PATCH_SIZE[0], IMG_SIZE[1] // PATCH_SIZE[1])
NUM_PATCHES = GRID[0] * GRID[1]
PATCH_DIM = PATCH_SIZE[0] * PATCH_SIZE[1] * IN_CHANS

# Order of the stacked per-block weight arrays passed to the fused stack kernel.
BLOCK_PARAM_NAMES = (
    "n1_g", "n1_b", "q_w", "q_b", "k_w", "k_b", "v_w", "v_b",
    "proj_w", "proj_b", "n2_g", "n2_b", "fc1_w", "fc1_b", "fc2_w", "fc2_b",
)


def _round_up(x, m):
    return ((x + m - 1) // m) * m


# ----------------------------- sincos pos embed (numpy, deterministic) -------
def get_1d_sincos_pos_embed_from_grid(embed_dim, pos):
    assert embed_dim % 2 == 0
    omega = np.arange(embed_dim // 2, dtype=np.float64)
    omega /= embed_dim / 2.0
    omega = 1.0 / 10000 ** omega
    pos = pos.reshape(-1)
    out = np.einsum("m,d->md", pos, omega)
    return np.concatenate([np.sin(out), np.cos(out)], axis=1)


def get_2d_sincos_pos_embed_from_grid(embed_dim, grid):
    assert embed_dim % 2 == 0
    emb_h = get_1d_sincos_pos_embed_from_grid(embed_dim // 2, grid[0])
    emb_w = get_1d_sincos_pos_embed_from_grid(embed_dim // 2, grid[1])
    return np.concatenate([emb_h, emb_w], axis=1)


def get_2d_sincos_pos_embed(embed_dim, grid_size, cls_token=False):
    gH, gW = grid_size
    grid_h = np.arange(gH, dtype=np.float32)
    grid_w = np.arange(gW, dtype=np.float32)
    grid = np.meshgrid(grid_w, grid_h)
    grid = np.stack(grid, axis=0).reshape([2, 1, gH, gW])
    pos_embed = get_2d_sincos_pos_embed_from_grid(embed_dim, grid)
    if cls_token:
        pos_embed = np.concatenate([np.zeros([1, embed_dim]), pos_embed], axis=0)
    return pos_embed


# ----------------------------- in-kernel math helpers -------------------------
def _erf_poly(x):
    # Abramowitz & Stegun 7.1.26 (max abs error ~1.5e-7 vs exact erf); uses only
    # exp/mul/div/select so it is guaranteed to lower inside Mosaic.
    # TODO(synk): switch to lax.erf once exact-erf lowering is guaranteed in Mosaic.
    p = 0.3275911
    a1, a2, a3, a4, a5 = 0.254829592, -0.284496736, 1.421413741, -1.453152027, 1.061405429
    sgn = jnp.where(x >= 0.0, 1.0, -1.0)
    ax = jnp.abs(x)
    t = 1.0 / (1.0 + p * ax)
    poly = ((((a5 * t + a4) * t + a3) * t + a2) * t + a1) * t
    return sgn * (1.0 - poly * jnp.exp(-ax * ax))


def _gelu_exact(x):
    # matches torch.nn.GELU() (erf form) to ~1e-7
    return 0.5 * x * (1.0 + _erf_poly(x * np.float32(1.0 / np.sqrt(2.0))))


def _layernorm(x, g, b, eps=LN_EPS):
    mean = jnp.mean(x, axis=-1, keepdims=True)
    cen = x - mean
    var = jnp.mean(cen * cen, axis=-1, keepdims=True)  # biased var (torch LN)
    return cen * jax.lax.rsqrt(var + eps) * g + b


def _attention(q, k, v, head_masks, key_bias, scale):
    """Multi-head attention on a single sample's (S_pad, D) tiles, fully in VMEM.

    Heads are split/merged with (hoisted) lane masks — no reshape/transpose —
    and padded key columns are masked out of the softmax via key_bias.
    """
    out = jnp.zeros(q.shape, jnp.float32)
    for hm in head_masks:
        # contract last axes directly (trans_b form): MXU handles the transposition
        scores = jax.lax.dot_general(
            q * hm, k, (((1,), (1,)), ((), ())),
            preferred_element_type=jnp.float32) * scale + key_bias
        scores = scores - jnp.max(scores, axis=-1, keepdims=True)
        p = jnp.exp(scores)
        p = p * pl.reciprocal(jnp.sum(p, axis=-1, keepdims=True), approx=True)
        out = out + jnp.dot(p, v * hm, preferred_element_type=jnp.float32)
    return out


def _block(x, w, head_masks, key_bias, scale):
    """timm-style Block: x + Attn(LN(x)); x + MLP(LN(x)) — activations stay in VMEM."""
    h = _layernorm(x, w["n1_g"], w["n1_b"])
    q = jnp.dot(h, w["q_w"], preferred_element_type=jnp.float32) + w["q_b"]
    k = jnp.dot(h, w["k_w"], preferred_element_type=jnp.float32) + w["k_b"]
    v = jnp.dot(h, w["v_w"], preferred_element_type=jnp.float32) + w["v_b"]
    a = _attention(q, k, v, head_masks, key_bias, scale)
    a = jnp.dot(a, w["proj_w"], preferred_element_type=jnp.float32) + w["proj_b"]
    x = x + a
    h = _layernorm(x, w["n2_g"], w["n2_b"])
    h = jnp.dot(h, w["fc1_w"], preferred_element_type=jnp.float32) + w["fc1_b"]
    h = _gelu_exact(h)                       # GELU fused after fc1 (no HBM round-trip)
    h = jnp.dot(h, w["fc2_w"], preferred_element_type=jnp.float32) + w["fc2_b"]
    return x + h


# ----------------------------- fused Pallas kernels ---------------------------
def _vit_stack_kernel(*refs, depth, num_heads, s_true, has_pos):
    """(optional pos add) + `depth` blocks + final LN + head linear, one sample per grid step."""
    if has_pos:
        x_ref, pos_ref = refs[0], refs[1]
        wrefs = refs[2:-1]
    else:
        x_ref, pos_ref = refs[0], None
        wrefs = refs[1:-1]
    o_ref = refs[-1]

    nblk = len(BLOCK_PARAM_NAMES)
    blk_refs = wrefs[:nblk]
    ng_ref, nbias_ref, hw_ref, hb_ref = wrefs[nblk:nblk + 4]

    x = x_ref[0]                                               # (S_pad, D)
    if has_pos:
        x = x + pos_ref[0]
    S, D = x.shape
    hd = D // num_heads
    scale = float(hd) ** -0.5

    # Hoisted once per grid step: key-padding bias + per-head lane masks.
    col = jax.lax.broadcasted_iota(jnp.int32, (S, S), 1)
    key_bias = jnp.where(col < s_true, 0.0, -1e30).astype(jnp.float32)
    lane = jax.lax.broadcasted_iota(jnp.int32, (S, D), 1)
    head_masks = [
        jnp.where((lane >= h * hd) & (lane < (h + 1) * hd), 1.0, 0.0).astype(jnp.float32)
        for h in range(num_heads)
    ]

    for d in range(depth):                                     # static unroll, all in VMEM
        w = {name: blk_refs[i][d] for i, name in enumerate(BLOCK_PARAM_NAMES)}
        x = _block(x, w, head_masks, key_bias, scale)
    h = _layernorm(x, ng_ref[...], nbias_ref[...])
    o_ref[0] = jnp.dot(h, hw_ref[...], preferred_element_type=jnp.float32) + hb_ref[...]


def _full_block_spec(a):
    n = a.ndim
    return pl.BlockSpec(a.shape, lambda b: (0,) * n)


def pallas_vit_stack(x, pos, blocks, norm_g, norm_b, head_w, head_b,
                     *, num_heads, s_true):
    """One pallas_call for an entire block stack + tail LN + tail linear.

    x: (B, S_pad, D) zero-padded sequence; pos: None or (1, S_pad, D) added in-kernel.
    """
    B, S_pad, D = x.shape
    out_dim = head_w.shape[1]
    depth = blocks[BLOCK_PARAM_NAMES[0]].shape[0]
    blk_arrays = [blocks[name] for name in BLOCK_PARAM_NAMES]
    weights = blk_arrays + [norm_g, norm_b, head_w, head_b]

    has_pos = pos is not None
    in_specs = [pl.BlockSpec((1, S_pad, D), lambda b: (b, 0, 0))]
    inputs = [x]
    if has_pos:
        in_specs.append(_full_block_spec(pos))
        inputs.append(pos)
    in_specs += [_full_block_spec(a) for a in weights]
    inputs += weights

    return pl.pallas_call(
        functools.partial(_vit_stack_kernel, depth=depth, num_heads=num_heads,
                          s_true=s_true, has_pos=has_pos),
        out_shape=jax.ShapeDtypeStruct((B, S_pad, out_dim), jnp.float32),
        grid=(B,),
        in_specs=in_specs,
        out_specs=pl.BlockSpec((1, S_pad, out_dim), lambda b: (b, 0, 0)),
        compiler_params=pltpu.CompilerParams(
            dimension_semantics=("parallel",)),   # batch across v7x's 2 TCs; no-op on v5e/v6e
    )(*inputs)


def _patch_embed_kernel(x_ref, w_ref, b_ref, pos_ref, o_ref):
    o_ref[...] = (jnp.dot(x_ref[...], w_ref[...], preferred_element_type=jnp.float32)
                  + b_ref[...] + pos_ref[...])


def pallas_patch_embed(patches, w, b, pos_rows):
    """(N*L, patch_dim) @ (patch_dim, D) + bias + pos, fused in one kernel."""
    M, K = patches.shape
    N = w.shape[1]
    return pl.pallas_call(
        _patch_embed_kernel,
        out_shape=jax.ShapeDtypeStruct((M, N), jnp.float32),
        grid=(1,),
        in_specs=[pl.BlockSpec((M, K), lambda i: (0, 0)),
                  pl.BlockSpec((K, N), lambda i: (0, 0)),
                  pl.BlockSpec((1, N), lambda i: (0, 0)),
                  pl.BlockSpec((M, N), lambda i: (0, 0))],
        out_specs=pl.BlockSpec((M, N), lambda i: (0, 0)),
    )(patches, w, b.reshape(1, N), pos_rows)


def _masked_mse_kernel(pred_ref, tgt_ref, mask_ref, o_ref):
    d = pred_ref[...] - tgt_ref[...]
    per_tok = jnp.mean(d * d, axis=-1, keepdims=True)          # (M, 1)
    m = mask_ref[...]
    o_ref[...] = jnp.reshape(jnp.sum(per_tok * m) / jnp.sum(m), (1, 1))


def pallas_masked_mse(pred2, target2, mask2):
    M, P = pred2.shape
    out = pl.pallas_call(
        _masked_mse_kernel,
        out_shape=jax.ShapeDtypeStruct((1, 1), jnp.float32),
        grid=(1,),
        in_specs=[pl.BlockSpec((M, P), lambda i: (0, 0)),
                  pl.BlockSpec((M, P), lambda i: (0, 0)),
                  pl.BlockSpec((M, 1), lambda i: (0, 0))],
        out_specs=pl.BlockSpec((1, 1), lambda i: (0, 0)),
    )(pred2, target2, mask2)
    return out[0, 0]


# ----------------------------- model glue -------------------------------------
def conv_patches(imgs):
    """Patch flattening in the Conv2d weight order (c, ph, pw)."""
    N = imgs.shape[0]
    gh, gw = GRID
    ph, pw = PATCH_SIZE
    x = imgs.reshape(N, IN_CHANS, gh, ph, gw, pw)
    x = jnp.transpose(x, (0, 2, 4, 1, 3, 5))                   # n h w c p q
    return x.reshape(N, gh * gw, PATCH_DIM)


def patchify(imgs):
    """Exactly MaskedAutoencoderViT.patchify: 'nchpwq->nhwpqc'."""
    N = imgs.shape[0]
    gh, gw = GRID
    ph, pw = PATCH_SIZE
    x = imgs.reshape(N, IN_CHANS, gh, ph, gw, pw)
    x = jnp.transpose(x, (0, 2, 4, 3, 5, 1))                   # n h w p q c
    return x.reshape(N, gh * gw, PATCH_DIM)


# ----------------------------- parameter init ---------------------------------
def _xavier_uniform(key, fan_in, fan_out):
    limit = float(np.sqrt(6.0 / (fan_in + fan_out)))
    return jax.random.uniform(key, (fan_in, fan_out), jnp.float32, -limit, limit)


def init_block_params(key, dim, mlp_ratio):
    hidden = int(dim * mlp_ratio)
    ks = jax.random.split(key, 4)
    qkv_w = _xavier_uniform(ks[0], dim, 3 * dim)   # same fan-in/out as torch Linear(dim, 3*dim)
    q_w, k_w, v_w = jnp.split(qkv_w, 3, axis=1)    # split once at init (no in-kernel lane slicing)
    zero_d = jnp.zeros((1, dim), jnp.float32)
    one_d = jnp.ones((1, dim), jnp.float32)
    return {
        "n1_g": one_d, "n1_b": zero_d,
        "q_w": q_w, "q_b": zero_d, "k_w": k_w, "k_b": zero_d, "v_w": v_w, "v_b": zero_d,
        "proj_w": _xavier_uniform(ks[1], dim, dim), "proj_b": zero_d,
        "n2_g": one_d, "n2_b": zero_d,
        "fc1_w": _xavier_uniform(ks[2], dim, hidden),
        "fc1_b": jnp.zeros((1, hidden), jnp.float32),
        "fc2_w": _xavier_uniform(ks[3], hidden, dim), "fc2_b": zero_d,
    }


def stack_blocks(blocks):
    return {name: jnp.stack([blk[name] for blk in blocks], axis=0)
            for name in BLOCK_PARAM_NAMES}


def init_params(key):
    keys = jax.random.split(key, 8 + DEPTH + DEC_DEPTH)
    ki = iter(keys)
    p = {}
    p["patch_w"] = _xavier_uniform(next(ki), PATCH_DIM, EMBED_DIM)
    p["patch_b"] = jnp.zeros((1, EMBED_DIM), jnp.float32)
    p["cls_token"] = 0.02 * jax.random.normal(next(ki), (1, 1, EMBED_DIM), jnp.float32)
    p["mask_token"] = 0.02 * jax.random.normal(next(ki), (1, 1, DEC_EMBED_DIM), jnp.float32)
    p["pos_embed"] = jnp.asarray(
        get_2d_sincos_pos_embed(EMBED_DIM, GRID, cls_token=True), jnp.float32)[None]
    p["decoder_pos_embed"] = jnp.asarray(
        get_2d_sincos_pos_embed(DEC_EMBED_DIM, GRID, cls_token=True), jnp.float32)[None]
    p["enc_blocks"] = stack_blocks(
        [init_block_params(next(ki), EMBED_DIM, MLP_RATIO) for _ in range(DEPTH)])
    p["norm_g"] = jnp.ones((1, EMBED_DIM), jnp.float32)
    p["norm_b"] = jnp.zeros((1, EMBED_DIM), jnp.float32)
    p["dec_embed_w"] = _xavier_uniform(next(ki), EMBED_DIM, DEC_EMBED_DIM)
    p["dec_embed_b"] = jnp.zeros((1, DEC_EMBED_DIM), jnp.float32)
    p["dec_blocks"] = stack_blocks(
        [init_block_params(next(ki), DEC_EMBED_DIM, MLP_RATIO) for _ in range(DEC_DEPTH)])
    p["dec_norm_g"] = jnp.ones((1, DEC_EMBED_DIM), jnp.float32)
    p["dec_norm_b"] = jnp.zeros((1, DEC_EMBED_DIM), jnp.float32)
    p["dec_pred_w"] = _xavier_uniform(next(ki), DEC_EMBED_DIM, PATCH_DIM)
    p["dec_pred_b"] = jnp.zeros((1, PATCH_DIM), jnp.float32)
    return p


# ----------------------------- full forward -----------------------------------
def mae_forward(params, imgs, noise, mask_ratio=MASK_RATIO):
    N = imgs.shape[0]
    L = NUM_PATCHES
    D = EMBED_DIM
    DD = DEC_EMBED_DIM

    # ---------- patch embed + pos add (Pallas kernel A) ----------
    patches = conv_patches(imgs).reshape(N * L, PATCH_DIM)
    pos_rows = jnp.broadcast_to(params["pos_embed"][:, 1:, :], (N, L, D)).reshape(N * L, D)
    x = pallas_patch_embed(patches, params["patch_w"], params["patch_b"], pos_rows)
    x = x.reshape(N, L, D)

    # ---------- random masking (random_unstructured_mask) ----------
    # TODO(synk): per-sample argsort + gather kept in XLA (data-dependent); could
    # be moved into Pallas with PrefetchScalarGridSpec row-index prefetch later.
    len_keep = int(L * (1 - mask_ratio))
    ids_shuffle = jnp.argsort(noise, axis=1)
    ids_restore = jnp.argsort(ids_shuffle, axis=1)
    ids_keep = ids_shuffle[:, :len_keep]
    x_masked = jnp.take_along_axis(
        x, jnp.broadcast_to(ids_keep[:, :, None], (N, len_keep, D)), axis=1)
    mask = jnp.ones((N, L), jnp.float32).at[:, :len_keep].set(0.0)
    mask = jnp.take_along_axis(mask, ids_restore, axis=1)

    # cls token prepend + pad sequence to a sublane multiple of 8
    cls = params["cls_token"] + params["pos_embed"][:, :1, :]
    x_enc = jnp.concatenate([jnp.broadcast_to(cls, (N, 1, D)), x_masked], axis=1)
    s_enc = 1 + len_keep
    s_enc_pad = _round_up(s_enc, 8)
    x_enc = jnp.pad(x_enc, ((0, 0), (0, s_enc_pad - s_enc), (0, 0)))

    # ---------- fused encoder stack + final norm + decoder_embed (kernel B) ----------
    dec_in = pallas_vit_stack(
        x_enc, None, params["enc_blocks"],                     # pos already added in kernel A
        params["norm_g"], params["norm_b"],
        params["dec_embed_w"], params["dec_embed_b"],
        num_heads=NUM_HEADS, s_true=s_enc)
    dec_in = dec_in[:, :s_enc, :]                              # (N, 1+len_keep, DD)

    # ---------- restore full token sequence (XLA glue) ----------
    n_mask_tok = L + 1 - s_enc
    mask_tokens = jnp.broadcast_to(params["mask_token"], (N, n_mask_tok, DD))
    x_ = jnp.concatenate([dec_in[:, 1:, :], mask_tokens], axis=1)
    x_ = jnp.take_along_axis(
        x_, jnp.broadcast_to(ids_restore[:, :, None], (N, L, DD)), axis=1)
    x_dec = jnp.concatenate([dec_in[:, :1, :], x_], axis=1)    # (N, L+1, DD)
    s_dec = L + 1
    s_dec_pad = _round_up(s_dec, 8)
    x_dec = jnp.pad(x_dec, ((0, 0), (0, s_dec_pad - s_dec), (0, 0)))
    pos_dec = jnp.pad(params["decoder_pos_embed"],
                      ((0, 0), (0, s_dec_pad - s_dec), (0, 0)))

    # ---------- fused decoder stack (pos add + blocks + norm + pred) (kernel C) ----------
    pred_full = pallas_vit_stack(
        x_dec, pos_dec, params["dec_blocks"],
        params["dec_norm_g"], params["dec_norm_b"],
        params["dec_pred_w"], params["dec_pred_b"],
        num_heads=DEC_NUM_HEADS, s_true=s_dec)
    pred = pred_full[:, 1:s_dec, :]                            # (N, L, patch_dim)

    # ---------- masked MSE loss (kernel D; norm_pix_loss=False) ----------
    target = patchify(imgs)
    loss = pallas_masked_mse(pred.reshape(N * L, PATCH_DIM),
                             target.reshape(N * L, PATCH_DIM),
                             mask.reshape(N * L, 1))
    return loss, pred, mask


# ----------------------------- main --------------------------------------------
if __name__ == "__main__":
    key = jax.random.PRNGKey(0)
    k_param, k_img, k_noise = jax.random.split(key, 3)
    params = init_params(k_param)
    imgs = jax.random.normal(k_img, (2, IN_CHANS, IMG_SIZE[0], IMG_SIZE[1]), jnp.float32)
    noise = jax.random.uniform(k_noise, (2, NUM_PATCHES), jnp.float32)

    fwd = jax.jit(mae_forward)
    loss, pred, mask = fwd(params, imgs, noise)
    jax.block_until_ready((loss, pred, mask))

    assert pred.shape == (2, NUM_PATCHES, PATCH_DIM)
    assert mask.shape == (2, NUM_PATCHES)
    assert loss.shape == ()
    assert bool(jnp.isfinite(loss))
    print("KERNEL_OK")
</pallas_src>

<mosaic_0001>
module attributes {stable_mosaic.version = 11 : i64} {
  func.func @_patch_embed_kernel(%arg0: i32, %arg1: memref<32x48xf32, #tpu.memory_space<vmem>>, %arg2: memref<48x32xf32, #tpu.memory_space<vmem>>, %arg3: memref<1x32xf32, #tpu.memory_space<vmem>>, %arg4: memref<32x32xf32, #tpu.memory_space<vmem>>, %arg5: memref<32x32xf32, #tpu.memory_space<vmem>>) attributes {dimension_semantics = [#tpu.dimension_semantics<arbitrary>], iteration_bounds = array<i64: 1>, scalar_prefetch = 0 : i64, scratch_operands = 0 : i64, tpu.core_type = #tpu.core_type<tc>, window_params = [{pipeline_mode = #tpu.pipeline_mode<synchronous>, transform_indices = @transform_0, window_bounds = array<i64: 32, 48>}, {pipeline_mode = #tpu.pipeline_mode<synchronous>, transform_indices = @transform_1, window_bounds = array<i64: 48, 32>}, {pipeline_mode = #tpu.pipeline_mode<synchronous>, transform_indices = @transform_2, window_bounds = array<i64: 1, 32>}, {pipeline_mode = #tpu.pipeline_mode<synchronous>, transform_indices = @transform_3, window_bounds = array<i64: 32, 32>}, {pipeline_mode = #tpu.pipeline_mode<synchronous>, transform_indices = @transform_4, window_bounds = array<i64: 32, 32>}]} {
    %c0 = arith.constant 0 : index
    %c0_0 = arith.constant 0 : index
    %0 = vector.load %arg1[%c0, %c0_0] : memref<32x48xf32, #tpu.memory_space<vmem>>, vector<32x48xf32>
    %c0_1 = arith.constant 0 : index
    %c0_2 = arith.constant 0 : index
    %1 = vector.load %arg2[%c0_1, %c0_2] : memref<48x32xf32, #tpu.memory_space<vmem>>, vector<48x32xf32>
    %cst = arith.constant dense<0.000000e+00> : vector<32x32xf32>
    %2 = tpu.matmul %0, %1, %cst {dimension_numbers = #tpu.dot_dimension_numbers<[1], [0], [0], [1], [0, 0, 1, 1], [], []>} : vector<32x48xf32>, vector<48x32xf32>, vector<32x32xf32> -> vector<32x32xf32>
    %c0_3 = arith.constant 0 : index
    %c0_4 = arith.constant 0 : index
    %3 = vector.load %arg3[%c0_3, %c0_4] : memref<1x32xf32, #tpu.memory_space<vmem>>, vector<1x32xf32>
    %4 = vector.broadcast %3 : vector<1x32xf32> to vector<32x32xf32>
    %5 = arith.addf %2, %4 : vector<32x32xf32>
    %c0_5 = arith.constant 0 : index
    %c0_6 = arith.constant 0 : index
    %6 = vector.load %arg4[%c0_5, %c0_6] : memref<32x32xf32, #tpu.memory_space<vmem>>, vector<32x32xf32>
    %7 = arith.addf %5, %6 : vector<32x32xf32>
    %c0_7 = arith.constant 0 : index
    %c0_8 = arith.constant 0 : index
    %8 = vector.load %arg5[%c0_7, %c0_8] : memref<32x32xf32, #tpu.memory_space<vmem>>, vector<32x32xf32>
    tpu.vector_store %arg5[%c0_7, %c0_8], %7 {strides = array<i32>} : memref<32x32xf32, #tpu.memory_space<vmem>>, vector<32x32xf32>,
    return
  }
  func.func @transform_0(%arg0: i32) -> (i32, i32) {
    %c0_i32 = arith.constant 0 : i32
    %c0_i32_0 = arith.constant 0 : i32
    %c0_i32_1 = arith.constant 0 : i32
    return %c0_i32, %c0_i32_0 : i32, i32
  }
  func.func @transform_1(%arg0: i32) -> (i32, i32) {
    %c0_i32 = arith.constant 0 : i32
    %c0_i32_0 = arith.constant 0 : i32
    %c0_i32_1 = arith.constant 0 : i32
    return %c0_i32, %c0_i32_0 : i32, i32
  }
  func.func @transform_2(%arg0: i32) -> (i32, i32) {
    %c0_i32 = arith.constant 0 : i32
    %c0_i32_0 = arith.constant 0 : i32
    %c0_i32_1 = arith.constant 0 : i32
    return %c0_i32, %c0_i32_0 : i32, i32
  }
  func.func @transform_3(%arg0: i32) -> (i32, i32) {
    %c0_i32 = arith.constant 0 : i32
    %c0_i32_0 = arith.constant 0 : i32
    %c0_i32_1 = arith.constant 0 : i32
    return %c0_i32, %c0_i32_0 : i32, i32
  }
  func.func @transform_4(%arg0: i32) -> (i32, i32) {
    %c0_i32 = arith.constant 0 : i32
    %c0_i32_0 = arith.constant 0 : i32
    %c0_i32_1 = arith.constant 0 : i32
    return %c0_i32, %c0_i32_0 : i32, i32
  }
}

module attributes {stable_mosaic.version = 11 : i64} {
  func.func @_vit_stack_kernel(%arg0: i32, %arg1: memref<1x8x32xf32, #tpu.memory_space<vmem>>, %arg2: memref<2x1x32xf32, #tpu.memory_space<vmem>>, %arg3: memref<2x1x32xf32, #tpu.memory_space<vmem>>, %arg4: memref<2x32x32xf32, #tpu.memory_space<vmem>>, %arg5: memref<2x1x32xf32, #tpu.memory_space<vmem>>, %arg6: memref<2x32x32xf32, #tpu.memory_space<vmem>>, %arg7: memref<2x1x32xf32, #tpu.memory_space<vmem>>, %arg8: memref<2x32x32xf32, #tpu.memory_space<vmem>>, %arg9: memref<2x1x32xf32, #tpu.memory_space<vmem>>, %arg10: memref<2x32x32xf32, #tpu.memory_space<vmem>>, %arg11: memref<2x1x32xf32, #tpu.memory_space<vmem>>, %arg12: memref<2x1x32xf32, #tpu.memory_space<vmem>>, %arg13: memref<2x1x32xf32, #tpu.memory_space<vmem>>, %arg14: memref<2x32x128xf32, #tpu.memory_space<vmem>>, %arg15: memref<2x1x128xf32, #tpu.memory_space<vmem>>, %arg16: memref<2x128x32xf32, #tpu.memory_space<vmem>>, %arg17: memref<2x1x32xf32, #tpu.memory_space<vmem>>, %arg18: memref<1x32xf32, #tpu.memory_space<vmem>>, %arg19: memref<1x32xf32, #tpu.memory_space<vmem>>, %arg20: memref<32x32xf32, #tpu.memory_space<vmem>>, %arg21: memref<1x32xf32, #tpu.memory_space<vmem>>, %arg22: memref<1x8x32xf32, #tpu.memory_space<vmem>>) attributes {dimension_semantics = [#tpu.dimension_semantics<parallel>], iteration_bounds = array<i64: 2>, scalar_prefetch = 0 : i64, scratch_operands = 0 : i64, tpu.core_type = #tpu.core_type<tc>, window_params = [{transform_indices = @transform_0, window_bounds = array<i64: 1, 8, 32>}, {pipeline_mode = #tpu.pipeline_mode<synchronous>, transform_indices = @transform_1, window_bounds = array<i64: 2, 1, 32>}, {pipeline_mode = #tpu.pipeline_mode<synchronous>, transform_indices = @transform_2, window_bounds = array<i64: 2, 1, 32>}, {pipeline_mode = #tpu.pipeline_mode<synchronous>, transform_indices = @transform_3, window_bounds = array<i64: 2, 32, 32>}, {pipeline_mode = #tpu.pipeline_mode<synchronous>, transform_indices = @transform_4, window_bounds = array<i64: 2, 1, 32>}, {pipeline_mode = #tpu.pipeline_mode<synchronous>, transform_indices = @transform_5, window_bounds = array<i64: 2, 32, 32>}, {pipeline_mode = #tpu.pipeline_mode<synchronous>, transform_indices = @transform_6, window_bounds = array<i64: 2, 1, 32>}, {pipeline_mode = #tpu.pipeline_mode<synchronous>, transform_indices = @transform_7, window_bounds = array<i64: 2, 32, 32>}, {pipeline_mode = #tpu.pipeline_mode<synchronous>, transform_indices = @transform_8, window_bounds = array<i64: 2, 1, 32>}, {pipeline_mode = #tpu.pipeline_mode<synchronous>, transform_indices = @transform_9, window_bounds = array<i64: 2, 32, 32>}, {pipeline_mode = #tpu.pipeline_mode<synchronous>, transform_indices = @transform_10, window_bounds = array<i64: 2, 1, 32>}, {pipeline_mode = #tpu.pipeline_mode<synchronous>, transform_indices = @transform_11, window_bounds = array<i64: 2, 1, 32>}, {pipeline_mode = #tpu.pipeline_mode<synchronous>, transform_indices = @transform_12, window_bounds = array<i64: 2, 1, 32>}, {pipeline_mode = #tpu.pipeline_mode<synchronous>, transform_indices = @transform_13, window_bounds = array<i64: 2, 32, 128>}, {pipeline_mode = #tpu.pipeline_mode<synchronous>, transform_indices = @transform_14, window_bounds = array<i64: 2, 1, 128>}, {pipeline_mode = #tpu.pipeline_mode<synchronous>, transform_indices = @transform_15, window_bounds = array<i64: 2, 128, 32>}, {pipeline_mode = #tpu.pipeline_mode<synchronous>, transform_indices = @transform_16, window_bounds = array<i64: 2, 1, 32>}, {pipeline_mode = #tpu.pipeline_mode<synchronous>, transform_indices = @transform_17, window_bounds = array<i64: 1, 32>}, {pipeline_mode = #tpu.pipeline_mode<synchronous>, transform_indices = @transform_18, window_bounds = array<i64: 1, 32>}, {pipeline_mode = #tpu.pipeline_mode<synchronous>, transform_indices = @transform_19, window_bounds = array<i64: 32, 32>}, {pipeline_mode = #tpu.pipeline_mode<synchronous>, transform_indices = @transform_20, window_bounds = array<i64: 1, 32>}, {transform_indices = @transform_21, window_bounds = array<i64: 1, 8, 32>}]} {
    %c0 = arith.constant 0 : index
    %c0_0 = arith.constant 0 : index
    %c0_1 = arith.constant 0 : index
    %0 = vector.load %arg1[%c0, %c0_0, %c0_1] : memref<1x8x32xf32, #tpu.memory_space<vmem>>, vector<1x8x32xf32>
    %1 = vector.shape_cast %0 : vector<1x8x32xf32> to vector<8x32xf32>
    %2 = tpu.iota {dimensions = array<i32: 1>} : vector<8x8xi32>
    %c5_i32 = arith.constant 5 : i32
    %3 = vector.broadcast %c5_i32 : i32 to vector<8x8xi32>
    %4 = arith.cmpi slt, %2, %3 : vector<8x8xi32>
    %cst = arith.constant 0.000000e+00 : f32
    %cst_2 = arith.constant -1.000000e+30 : f32
    %5 = vector.broadcast %cst : f32 to vector<8x8xf32>
    %6 = vector.broadcast %cst_2 : f32 to vector<8x8xf32>
    %7 = arith.select %4, %5, %6 : vector<8x8xi1>, vector<8x8xf32>
    %8 = tpu.iota {dimensions = array<i32: 1>} : vector<8x32xi32>
    %c0_i32 = arith.constant 0 : i32
    %9 = vector.broadcast %c0_i32 : i32 to vector<8x32xi32>
    %10 = arith.cmpi sge, %8, %9 : vector<8x32xi32>
    %c8_i32 = arith.constant 8 : i32
    %11 = vector.broadcast %c8_i32 : i32 to vector<8x32xi32>
    %12 = arith.cmpi slt, %8, %11 : vector<8x32xi32>
    %13 = arith.andi %10, %12 : vector<8x32xi1>
    %cst_3 = arith.constant 1.000000e+00 : f32
    %cst_4 = arith.constant 0.000000e+00 : f32
    %14 = vector.broadcast %cst_3 : f32 to vector<8x32xf32>
    %15 = vector.broadcast %cst_4 : f32 to vector<8x32xf32>
    %16 = arith.select %13, %14, %15 : vector<8x32xi1>, vector<8x32xf32>
    %c8_i32_5 = arith.constant 8 : i32
    %17 = vector.broadcast %c8_i32_5 : i32 to vector<8x32xi32>
    %18 = arith.cmpi sge, %8, %17 : vector<8x32xi32>
    %c16_i32 = arith.constant 16 : i32
    %19 = vector.broadcast %c16_i32 : i32 to vector<8x32xi32>
    %20 = arith.cmpi slt, %8, %19 : vector<8x32xi32>
    %21 = arith.andi %18, %20 : vector<8x32xi1>
    %cst_6 = arith.constant 1.000000e+00 : f32
    %cst_7 = arith.constant 0.000000e+00 : f32
    %22 = vector.broadcast %cst_6 : f32 to vector<8x32xf32>
    %23 = vector.broadcast %cst_7 : f32 to vector<8x32xf32>
    %24 = arith.select %21, %22, %23 : vector<8x32xi1>, vector<8x32xf32>
    %c16_i32_8 = arith.constant 16 : i32
    %25 = vector.broadcast %c16_i32_8 : i32 to vector<8x32xi32>
    %26 = arith.cmpi sge, %8, %25 : vector<8x32xi32>
    %c24_i32 = arith.constant 24 : i32
    %27 = vector.broadcast %c24_i32 : i32 to vector<8x32xi32>
    %28 = arith.cmpi slt, %8, %27 : vector<8x32xi32>
    %29 = arith.andi %26, %28 : vector<8x32xi1>
    %cst_9 = arith.constant 1.000000e+00 : f32
    %cst_10 = arith.constant 0.000000e+00 : f32
    %30 = vector.broadcast %cst_9 : f32 to vector<8x32xf32>
    %31 = vector.broadcast %cst_10 : f32 to vector<8x32xf32>
    %32 = arith.select %29, %30, %31 : vector<8x32xi1>, vector<8x32xf32>
    %c24_i32_11 = arith.constant 24 : i32
    %33 = vector.broadcast %c24_i32_11 : i32 to vector<8x32xi32>
    %34 = arith.cmpi sge, %8, %33 : vector<8x32xi32>
    %c32_i32 = arith.constant 32 : i32
    %35 = vector.broadcast %c32_i32 : i32 to vector<8x32xi32>
    %36 = arith.cmpi slt, %8, %35 : vector<8x32xi32>
    %37 = arith.andi %34, %36 : vector<8x32xi1>
    %cst_12 = arith.constant 1.000000e+00 : f32
    %cst_13 = arith.constant 0.000000e+00 : f32
    %38 = vector.broadcast %cst_12 : f32 to vector<8x32xf32>
    %39 = vector.broadcast %cst_13 : f32 to vector<8x32xf32>
    %40 = arith.select %37, %38, %39 : vector<8x32xi1>, vector<8x32xf32>
    %c0_14 = arith.constant 0 : index
    %c0_15 = arith.constant 0 : index
    %c0_16 = arith.constant 0 : index
    %41 = vector.load %arg2[%c0_14, %c0_15, %c0_16] : memref<2x1x32xf32, #tpu.memory_space<vmem>>, vector<1x1x32xf32>
    %42 = vector.shape_cast %41 : vector<1x1x32xf32> to vector<1x32xf32>
    %c0_17 = arith.constant 0 : index
    %c0_18 = arith.constant 0 : index
    %c0_19 = arith.constant 0 : index
    %43 = vector.load %arg3[%c0_17, %c0_18, %c0_19] : memref<2x1x32xf32, #tpu.memory_space<vmem>>, vector<1x1x32xf32>
    %44 = vector.shape_cast %43 : vector<1x1x32xf32> to vector<1x32xf32>
    %c0_20 = arith.constant 0 : index
    %c0_21 = arith.constant 0 : index
    %c0_22 = arith.constant 0 : index
    %45 = vector.load %arg4[%c0_20, %c0_21, %c0_22] : memref<2x32x32xf32, #tpu.memory_space<vmem>>, vector<1x32x32xf32>
    %46 = vector.shape_cast %45 : vector<1x32x32xf32> to vector<32x32xf32>
    %c0_23 = arith.constant 0 : index
    %c0_24 = arith.constant 0 : index
    %c0_25 = arith.constant 0 : index
    %47 = vector.load %arg5[%c0_23, %c0_24, %c0_25] : memref<2x1x32xf32, #tpu.memory_space<vmem>>, vector<1x1x32xf32>
    %48 = vector.shape_cast %47 : vector<1x1x32xf32> to vector<1x32xf32>
    %c0_26 = arith.constant 0 : index
    %c0_27 = arith.constant 0 : index
    %c0_28 = arith.constant 0 : index
    %49 = vector.load %arg6[%c0_26, %c0_27, %c0_28] : memref<2x32x32xf32, #tpu.memory_space<vmem>>, vector<1x32x32xf32>
    %50 = vector.shape_cast %49 : vector<1x32x32xf32> to vector<32x32xf32>
    %c0_29 = arith.constant 0 : index
    %c0_30 = arith.constant 0 : index
    %c0_31 = arith.constant 0 : index
    %51 = vector.load %arg7[%c0_29, %c0_30, %c0_31] : memref<2x1x32xf32, #tpu.memory_space<vmem>>, vector<1x1x32xf32>
    %52 = vector.shape_cast %51 : vector<1x1x32xf32> to vector<1x32xf32>
    %c0_32 = arith.constant 0 : index
    %c0_33 = arith.constant 0 : index
    %c0_34 = arith.constant 0 : index
    %53 = vector.load %arg8[%c0_32, %c0_33, %c0_34] : memref<2x32x32xf32, #tpu.memory_space<vmem>>, vector<1x32x32xf32>
    %54 = vector.shape_cast %53 : vector<1x32x32xf32> to vector<32x32xf32>
    %c0_35 = arith.constant 0 : index
    %c0_36 = arith.constant 0 : index
    %c0_37 = arith.constant 0 : index
    %55 = vector.load %arg9[%c0_35, %c0_36, %c0_37] : memref<2x1x32xf32, #tpu.memory_space<vmem>>, vector<1x1x32xf32>
    %56 = vector.shape_cast %55 : vector<1x1x32xf32> to vector<1x32xf32>
    %c0_38 = arith.constant 0 : index
    %c0_39 = arith.constant 0 : index
    %c0_40 = arith.constant 0 : index
    %57 = vector.load %arg10[%c0_38, %c0_39, %c0_40] : memref<2x32x32xf32, #tpu.memory_space<vmem>>, vector<1x32x32xf32>
    %58 = vector.shape_cast %57 : vector<1x32x32xf32> to vector<32x32xf32>
    %c0_41 = arith.constant 0 : index
    %c0_42 = arith.constant 0 : index
    %c0_43 = arith.constant 0 : index
    %59 = vector.load %arg11[%c0_41, %c0_42, %c0_43] : memref<2x1x32xf32, #tpu.memory_space<vmem>>, vector<1x1x32xf32>
    %60 = vector.shape_cast %59 : vector<1x1x32xf32> to vector<1x32xf32>
    %c0_44 = arith.constant 0 : index
    %c0_45 = arith.constant 0 : index
    %c0_46 = arith.constant 0 : index
    %61 = vector.load %arg12[%c0_44, %c0_45, %c0_46] : memref<2x1x32xf32, #tpu.memory_space<vmem>>, vector<1x1x32xf32>
    %62 = vector.shape_cast %61 : vector<1x1x32xf32> to vector<1x32xf32>
    %c0_47 = arith.constant 0 : index
    %c0_48 = arith.constant 0 : index
    %c0_49 = arith.constant 0 : index
    %63 = vector.load %arg13[%c0_47, %c0_48, %c0_49] : memref<2x1x32xf32, #tpu.memory_space<vmem>>, vector<1x1x32xf32>
    %64 = vector.shape_cast %63 : vector<1x1x32xf32> to vector<1x32xf32>
    %c0_50 = arith.constant 0 : index
    %c0_51 = arith.constant 0 : index
    %c0_52 = arith.constant 0 : index
    %65 = vector.load %arg14[%c0_50, %c0_51, %c0_52] : memref<2x32x128xf32, #tpu.memory_space<vmem>>, vector<1x32x128xf32>
    %66 = vector.shape_cast %65 : vector<1x32x128xf32> to vector<32x128xf32>
    %c0_53 = arith.constant 0 : index
    %c0_54 = arith.constant 0 : index
    %c0_55 = arith.constant 0 : index
    %67 = vector.load %arg15[%c0_53, %c0_54, %c0_55] : memref<2x1x128xf32, #tpu.memory_space<vmem>>, vector<1x1x128xf32>
    %68 = vector.shape_cast %67 : vector<1x1x128xf32> to vector<1x128xf32>
    %c0_56 = arith.constant 0 : index
    %c0_57 = arith.constant 0 : index
    %c0_58 = arith.constant 0 : index
    %69 = vector.load %arg16[%c0_56, %c0_57, %c0_58] : memref<2x128x32xf32, #tpu.memory_space<vmem>>, vector<1x128x32xf32>
    %70 = vector.shape_cast %69 : vector<1x128x32xf32> to vector<128x32xf32>
    %c0_59 = arith.constant 0 : index
    %c0_60 = arith.constant 0 : index
    %c0_61 = arith.constant 0 : index
    %71 = vector.load %arg17[%c0_59, %c0_60, %c0_61] : memref<2x1x32xf32, #tpu.memory_space<vmem>>, vector<1x1x32xf32>
    %72 = vector.shape_cast %71 : vector<1x1x32xf32> to vector<1x32xf32>
    %cst_62 = arith.constant dense<0.000000e+00> : vector<8xf32>
    %73 = vector.multi_reduction <add>, %1, %cst_62 [1] : vector<8x32xf32> to vector<8xf32>
    %74 = vector.shape_cast %73 : vector<8xf32> to vector<8x1xf32>
    %cst_63 = arith.constant 3.200000e+01 : f32
    %75 = vector.broadcast %cst_63 : f32 to vector<8x1xf32>
    %76 = arith.divf %74, %75 : vector<8x1xf32>
    %77 = vector.broadcast %76 : vector<8x1xf32> to vector<8x32xf32>
    %78 = arith.subf %1, %77 : vector<8x32xf32>
    %79 = arith.mulf %78, %78 : vector<8x32xf32>
    %cst_64 = arith.constant dense<0.000000e+00> : vector<8xf32>
    %80 = vector.multi_reduction <add>, %79, %cst_64 [1] : vector<8x32xf32> to vector<8xf32>
    %81 = vector.shape_cast %80 : vector<8xf32> to vector<8x1xf32>
    %cst_65 = arith.constant 3.200000e+01 : f32
    %82 = vector.broadcast %cst_65 : f32 to vector<8x1xf32>
    %83 = arith.divf %81, %82 : vector<8x1xf32>
    %cst_66 = arith.constant 9.99999974E-6 : f32
    %84 = vector.broadcast %cst_66 : f32 to vector<8x1xf32>
    %85 = arith.addf %83, %84 : vector<8x1xf32>
    %86 = math.rsqrt %85 : vector<8x1xf32>
    %87 = vector.broadcast %86 : vector<8x1xf32> to vector<8x32xf32>
    %88 = arith.mulf %78, %87 : vector<8x32xf32>
    %89 = vector.broadcast %42 : vector<1x32xf32> to vector<8x32xf32>
    %90 = arith.mulf %88, %89 : vector<8x32xf32>
    %91 = vector.broadcast %44 : vector<1x32xf32> to vector<8x32xf32>
    %92 = arith.addf %90, %91 : vector<8x32xf32>
    %cst_67 = arith.constant dense<0.000000e+00> : vector<8x32xf32>
    %93 = tpu.matmul %92, %46, %cst_67 {dimension_numbers = #tpu.dot_dimension_numbers<[1], [0], [0], [1], [0, 0, 1, 1], [], []>} : vector<8x32xf32>, vector<32x32xf32>, vector<8x32xf32> -> vector<8x32xf32>
    %94 = vector.broadcast %48 : vector<1x32xf32> to vector<8x32xf32>
    %95 = arith.addf %93, %94 : vector<8x32xf32>
    %cst_68 = arith.constant dense<0.000000e+00> : vector<8x32xf32>
    %96 = tpu.matmul %92, %50, %cst_68 {dimension_numbers = #tpu.dot_dimension_numbers<[1], [0], [0], [1], [0, 0, 1, 1], [], []>} : vector<8x32xf32>, vector<32x32xf32>, vector<8x32xf32> -> vector<8x32xf32>
    %97 = vector.broadcast %52 : vector<1x32xf32> to vector<8x32xf32>
    %98 = arith.addf %96, %97 : vector<8x32xf32>
    %cst_69 = arith.constant dense<0.000000e+00> : vector<8x32xf32>
    %99 = tpu.matmul %92, %54, %cst_69 {dimension_numbers = #tpu.dot_dimension_numbers<[1], [0], [0], [1], [0, 0, 1, 1], [], []>} : vector<8x32xf32>, vector<32x32xf32>, vector<8x32xf32> -> vector<8x32xf32>
    %100 = vector.broadcast %56 : vector<1x32xf32> to vector<8x32xf32>
    %101 = arith.addf %99, %100 : vector<8x32xf32>
    %cst_70 = arith.constant 0.000000e+00 : f32
    %102 = vector.broadcast %cst_70 : f32 to vector<8x32xf32>
    %103 = arith.mulf %95, %16 : vector<8x32xf32>
    %cst_71 = arith.constant dense<0.000000e+00> : vector<8x8xf32>
    %104 = tpu.matmul %103, %98, %cst_71 {dimension_numbers = #tpu.dot_dimension_numbers<[1], [1], [0], [0], [0, 0, 1, 0], [], []>} : vector<8x32xf32>, vector<8x32xf32>, vector<8x8xf32> -> vector<8x8xf32>
    %cst_72 = arith.constant 0.353553385 : f32
    %105 = vector.broadcast %cst_72 : f32 to vector<8x8xf32>
    %106 = arith.mulf %104, %105 : vector<8x8xf32>
    %107 = arith.addf %106, %7 : vector<8x8xf32>
    %cst_73 = arith.constant dense<0xFF800000> : vector<8xf32>
    %108 = vector.multi_reduction <maximumf>, %107, %cst_73 [1] : vector<8x8xf32> to vector<8xf32>
    %109 = vector.shape_cast %108 : vector<8xf32> to vector<8x1xf32>
    %110 = vector.broadcast %109 : vector<8x1xf32> to vector<8x8xf32>
    %111 = arith.subf %107, %110 : vector<8x8xf32>
    %112 = math.exp %111 : vector<8x8xf32>
    %cst_74 = arith.constant dense<0.000000e+00> : vector<8xf32>
    %113 = vector.multi_reduction <add>, %112, %cst_74 [1] : vector<8x8xf32> to vector<8xf32>
    %114 = vector.shape_cast %113 : vector<8xf32> to vector<8x1xf32>
    %115 = tpu.reciprocal %114 {approx = true} : vector<8x1xf32> -> vector<8x1xf32>
    %116 = vector.broadcast %115 : vector<8x1xf32> to vector<8x8xf32>
    %117 = arith.mulf %112, %116 : vector<8x8xf32>
    %118 = arith.mulf %101, %16 : vector<8x32xf32>
    %cst_75 = arith.constant dense<0.000000e+00> : vector<8x32xf32>
    %119 = tpu.matmul %117, %118, %cst_75 {dimension_numbers = #tpu.dot_dimension_numbers<[1], [0], [0], [1], [0, 0, 1, 1], [], []>} : vector<8x8xf32>, vector<8x32xf32>, vector<8x32xf32> -> vector<8x32xf32>
    %120 = arith.addf %102, %119 : vector<8x32xf32>
    %121 = arith.mulf %95, %24 : vector<8x32xf32>
    %cst_76 = arith.constant dense<0.000000e+00> : vector<8x8xf32>
    %122 = tpu.matmul %121, %98, %cst_76 {dimension_numbers = #tpu.dot_dimension_numbers<[1], [1], [0], [0], [0, 0, 1, 0], [], []>} : vector<8x32xf32>, vector<8x32xf32>, vector<8x8xf32> -> vector<8x8xf32>
    %cst_77 = arith.constant 0.353553385 : f32
    %123 = vector.broadcast %cst_77 : f32 to vector<8x8xf32>
    %124 = arith.mulf %122, %123 : vector<8x8xf32>
    %125 = arith.addf %124, %7 : vector<8x8xf32>
    %cst_78 = arith.constant dense<0xFF800000> : vector<8xf32>
    %126 = vector.multi_reduction <maximumf>, %125, %cst_78 [1] : vector<8x8xf32> to vector<8xf32>
    %127 = vector.shape_cast %126 : vector<8xf32> to vector<8x1xf32>
    %128 = vector.broadcast %127 : vector<8x1xf32> to vector<8x8xf32>
    %129 = arith.subf %125, %128 : vector<8x8xf32>
    %130 = math.exp %129 : vector<8x8xf32>
    %cst_79 = arith.constant dense<0.000000e+00> : vector<8xf32>
    %131 = vector.multi_reduction <add>, %130, %cst_79 [1] : vector<8x8xf32> to vector<8xf32>
    %132 = vector.shape_cast %131 : vector<8xf32> to vector<8x1xf32>
    %133 = tpu.reciprocal %132 {approx = true} : vector<8x1xf32> -> vector<8x1xf32>
    %134 = vector.broadcast %133 : vector<8x1xf32> to vector<8x8xf32>
    %135 = arith.mulf %130, %134 : vector<8x8xf32>
    %136 = arith.mulf %101, %24 : vector<8x32xf32>
    %cst_80 = arith.constant dense<0.000000e+00> : vector<8x32xf32>
    %137 = tpu.matmul %135, %136, %cst_80 {dimension_numbers = #tpu.dot_dimension_numbers<[1], [0], [0], [1], [0, 0, 1, 1], [], []>} : vector<8x8xf32>, vector<8x32xf32>, vector<8x32xf32> -> vector<8x32xf32>
    %138 = arith.addf %120, %137 : vector<8x32xf32>
    %139 = arith.mulf %95, %32 : vector<8x32xf32>
    %cst_81 = arith.constant dense<0.000000e+00> : vector<8x8xf32>
    %140 = tpu.matmul %139, %98, %cst_81 {dimension_numbers = #tpu.dot_dimension_numbers<[1], [1], [0], [0], [0, 0, 1, 0], [], []>} : vector<8x32xf32>, vector<8x32xf32>, vector<8x8xf32> -> vector<8x8xf32>
    %cst_82 = arith.constant 0.353553385 : f32
    %141 = vector.broadcast %cst_82 : f32 to vector<8x8xf32>
    %142 = arith.mulf %140, %141 : vector<8x8xf32>
    %143 = arith.addf %142, %7 : vector<8x8xf32>
    %cst_83 = arith.constant dense<0xFF800000> : vector<8xf32>
    %144 = vector.multi_reduction <maximumf>, %143, %cst_83 [1] : vector<8x8xf32> to vector<8xf32>
    %145 = vector.shape_cast %144 : vector<8xf32> to vector<8x1xf32>
    %146 = vector.broadcast %145 : vector<8x1xf32> to vector<8x8xf32>
    %147 = arith.subf %143, %146 : vector<8x8xf32>
    %148 = math.exp %147 : vector<8x8xf32>
    %cst_84 = arith.constant dense<0.000000e+00> : vector<8xf32>
    %149 = vector.multi_reduction <add>, %148, %cst_84 [1] : vector<8x8xf32> to vector<8xf32>
    %150 = vector.shape_cast %149 : vector<8xf32> to vector<8x1xf32>
    %151 = tpu.reciprocal %150 {approx = true} : vector<8x1xf32> -> vector<8x1xf32>
    %152 = vector.broadcast %151 : vector<8x1xf32> to vector<8x8xf32>
    %153 = arith.mulf %148, %152 : vector<8x8xf32>
    %154 = arith.mulf %101, %32 : vector<8x32xf32>
    %cst_85 = arith.constant dense<0.000000e+00> : vector<8x32xf32>
    %155 = tpu.matmul %153, %154, %cst_85 {dimension_numbers = #tpu.dot_dimension_numbers<[1], [0], [0], [1], [0, 0, 1, 1], [], []>} : vector<8x8xf32>, vector<8x32xf32>, vector<8x32xf32> -> vector<8x32xf32>
    %156 = arith.addf %138, %155 : vector<8x32xf32>
    %157 = arith.mulf %95, %40 : vector<8x32xf32>
    %cst_86 = arith.constant dense<0.000000e+00> : vector<8x8xf32>
    %158 = tpu.matmul %157, %98, %cst_86 {dimension_numbers = #tpu.dot_dimension_numbers<[1], [1], [0], [0], [0, 0, 1, 0], [], []>} : vector<8x32xf32>, vector<8x32xf32>, vector<8x8xf32> -> vector<8x8xf32>
    %cst_87 = arith.constant 0.353553385 : f32
    %159 = vector.broadcast %cst_87 : f32 to vector<8x8xf32>
    %160 = arith.mulf %158, %159 : vector<8x8xf32>
    %161 = arith.addf %160, %7 : vector<8x8xf32>
    %cst_88 = arith.constant dense<0xFF800000> : vector<8xf32>
    %162 = vector.multi_reduction <maximumf>, %161, %cst_88 [1] : vector<8x8xf32> to vector<8xf32>
    %163 = vector.shape_cast %162 : vector<8xf32> to vector<8x1xf32>
    %164 = vector.broadcast %163 : vector<8x1xf32> to vector<8x8xf32>
    %165 = arith.subf %161, %164 : vector<8x8xf32>
    %166 = math.exp %165 : vector<8x8xf32>
    %cst_89 = arith.constant dense<0.000000e+00> : vector<8xf32>
    %167 = vector.multi_reduction <add>, %166, %cst_89 [1] : vector<8x8xf32> to vector<8xf32>
    %168 = vector.shape_cast %167 : vector<8xf32> to vector<8x1xf32>
    %169 = tpu.reciprocal %168 {approx = true} : vector<8x1xf32> -> vector<8x1xf32>
    %170 = vector.broadcast %169 : vector<8x1xf32> to vector<8x8xf32>
    %171 = arith.mulf %166, %170 : vector<8x8xf32>
    %172 = arith.mulf %101, %40 : vector<8x32xf32>
    %cst_90 = arith.constant dense<0.000000e+00> : vector<8x32xf32>
    %173 = tpu.matmul %171, %172, %cst_90 {dimension_numbers = #tpu.dot_dimension_numbers<[1], [0], [0], [1], [0, 0, 1, 1], [], []>} : vector<8x8xf32>, vector<8x32xf32>, vector<8x32xf32> -> vector<8x32xf32>
    %174 = arith.addf %156, %173 : vector<8x32xf32>
    %cst_91 = arith.constant dense<0.000000e+00> : vector<8x32xf32>
    %175 = tpu.matmul %174, %58, %cst_91 {dimension_numbers = #tpu.dot_dimension_numbers<[1], [0], [0], [1], [0, 0, 1, 1], [], []>} : vector<8x32xf32>, vector<32x32xf32>, vector<8x32xf32> -> vector<8x32xf32>
    %176 = vector.broadcast %60 : vector<1x32xf32> to vector<8x32xf32>
    %177 = arith.addf %175, %176 : vector<8x32xf32>
    %178 = arith.addf %1, %177 : vector<8x32xf32>
    %cst_92 = arith.constant dense<0.000000e+00> : vector<8xf32>
    %179 = vector.multi_reduction <add>, %178, %cst_92 [1] : vector<8x32xf32> to vector<8xf32>
    %180 = vector.shape_cast %179 : vector<8xf32> to vector<8x1xf32>
    %cst_93 = arith.constant 3.200000e+01 : f32
    %181 = vector.broadcast %cst_93 : f32 to vector<8x1xf32>
    %182 = arith.divf %180, %181 : vector<8x1xf32>
    %183 = vector.broadcast %182 : vector<8x1xf32> to vector<8x32xf32>
    %184 = arith.subf %178, %183 : vector<8x32xf32>
    %185 = arith.mulf %184, %184 : vector<8x32xf32>
    %cst_94 = arith.constant dense<0.000000e+00> : vector<8xf32>
    %186 = vector.multi_reduction <add>, %185, %cst_94 [1] : vector<8x32xf32> to vector<8xf32>
    %187 = vector.shape_cast %186 : vector<8xf32> to vector<8x1xf32>
    %cst_95 = arith.constant 3.200000e+01 : f32
    %188 = vector.broadcast %cst_95 : f32 to vector<8x1xf32>
    %189 = arith.divf %187, %188 : vector<8x1xf32>
    %cst_96 = arith.constant 9.99999974E-6 : f32
    %190 = vector.broadcast %cst_96 : f32 to vector<8x1xf32>
    %191 = arith.addf %189, %190 : vector<8x1xf32>
    %192 = math.rsqrt %191 : vector<8x1xf32>
    %193 = vector.broadcast %192 : vector<8x1xf32> to vector<8x32xf32>
    %194 = arith.mulf %184, %193 : vector<8x32xf32>
    %195 = vector.broadcast %62 : vector<1x32xf32> to vector<8x32xf32>
    %196 = arith.mulf %194, %195 : vector<8x32xf32>
    %197 = vector.broadcast %64 : vector<1x32xf32> to vector<8x32xf32>
    %198 = arith.addf %196, %197 : vector<8x32xf32>
    %cst_97 = arith.constant dense<0.000000e+00> : vector<8x128xf32>
    %199 = tpu.matmul %198, %66, %cst_97 {dimension_numbers = #tpu.dot_dimension_numbers<[1], [0], [0], [1], [0, 0, 1, 1], [], []>} : vector<8x32xf32>, vector<32x128xf32>, vector<8x128xf32> -> vector<8x128xf32>
    %200 = vector.broadcast %68 : vector<1x128xf32> to vector<8x128xf32>
    %201 = arith.addf %199, %200 : vector<8x128xf32>
    %cst_98 = arith.constant 5.000000e-01 : f32
    %202 = vector.broadcast %cst_98 : f32 to vector<8x128xf32>
    %203 = arith.mulf %202, %201 : vector<8x128xf32>
    %cst_99 = arith.constant 0.707106769 : f32
    %204 = vector.broadcast %cst_99 : f32 to vector<8x128xf32>
    %205 = arith.mulf %201, %204 : vector<8x128xf32>
    %cst_100 = arith.constant 0.000000e+00 : f32
    %206 = vector.broadcast %cst_100 : f32 to vector<8x128xf32>
    %207 = arith.cmpf oge, %205, %206 : vector<8x128xf32>
    %cst_101 = arith.constant 1.000000e+00 : f32
    %cst_102 = arith.constant -1.000000e+00 : f32
    %208 = vector.broadcast %cst_101 : f32 to vector<8x128xf32>
    %209 = vector.broadcast %cst_102 : f32 to vector<8x128xf32>
    %210 = arith.select %207, %208, %209 : vector<8x128xi1>, vector<8x128xf32>
    %211 = math.absf %205 : vector<8x128xf32>
    %cst_103 = arith.constant 0.327591091 : f32
    %212 = vector.broadcast %cst_103 : f32 to vector<8x128xf32>
    %213 = arith.mulf %212, %211 : vector<8x128xf32>
    %cst_104 = arith.constant 1.000000e+00 : f32
    %214 = vector.broadcast %cst_104 : f32 to vector<8x128xf32>
    %215 = arith.addf %214, %213 : vector<8x128xf32>
    %cst_105 = arith.constant 1.000000e+00 : f32
    %216 = vector.broadcast %cst_105 : f32 to vector<8x128xf32>
    %217 = arith.divf %216, %215 : vector<8x128xf32>
    %cst_106 = arith.constant 1.06140542 : f32
    %218 = vector.broadcast %cst_106 : f32 to vector<8x128xf32>
    %219 = arith.mulf %218, %217 : vector<8x128xf32>
    %cst_107 = arith.constant -1.45315206 : f32
    %220 = vector.broadcast %cst_107 : f32 to vector<8x128xf32>
    %221 = arith.addf %219, %220 : vector<8x128xf32>
    %222 = arith.mulf %221, %217 : vector<8x128xf32>
    %cst_108 = arith.constant 1.42141378 : f32
    %223 = vector.broadcast %cst_108 : f32 to vector<8x128xf32>
    %224 = arith.addf %222, %223 : vector<8x128xf32>
    %225 = arith.mulf %224, %217 : vector<8x128xf32>
    %cst_109 = arith.constant -0.284496725 : f32
    %226 = vector.broadcast %cst_109 : f32 to vector<8x128xf32>
    %227 = arith.addf %225, %226 : vector<8x128xf32>
    %228 = arith.mulf %227, %217 : vector<8x128xf32>
    %cst_110 = arith.constant 0.254829586 : f32
    %229 = vector.broadcast %cst_110 : f32 to vector<8x128xf32>
    %230 = arith.addf %228, %229 : vector<8x128xf32>
    %231 = arith.mulf %230, %217 : vector<8x128xf32>
    %cst_111 = arith.constant 0.000000e+00 : f32
    %232 = vector.broadcast %cst_111 : f32 to vector<8x128xf32>
    %233 = arith.subf %232, %211 : vector<8x128xf32>
    %234 = arith.mulf %233, %211 : vector<8x128xf32>
    %235 = math.exp %234 : vector<8x128xf32>
    %236 = arith.mulf %231, %235 : vector<8x128xf32>
    %cst_112 = arith.constant 1.000000e+00 : f32
    %237 = vector.broadcast %cst_112 : f32 to vector<8x128xf32>
    %238 = arith.subf %237, %236 : vector<8x128xf32>
    %239 = arith.mulf %210, %238 : vector<8x128xf32>
    %cst_113 = arith.constant 1.000000e+00 : f32
    %240 = vector.broadcast %cst_113 : f32 to vector<8x128xf32>
    %241 = arith.addf %240, %239 : vector<8x128xf32>
    %242 = arith.mulf %203, %241 : vector<8x128xf32>
    %cst_114 = arith.constant dense<0.000000e+00> : vector<8x32xf32>
    %243 = tpu.matmul %242, %70, %cst_114 {dimension_numbers = #tpu.dot_dimension_numbers<[1], [0], [0], [1], [0, 0, 1, 1], [], []>} : vector<8x128xf32>, vector<128x32xf32>, vector<8x32xf32> -> vector<8x32xf32>
    %244 = vector.broadcast %72 : vector<1x32xf32> to vector<8x32xf32>
    %245 = arith.addf %243, %244 : vector<8x32xf32>
    %246 = arith.addf %178, %245 : vector<8x32xf32>
    %c1 = arith.constant 1 : index
    %c0_115 = arith.constant 0 : index
    %c0_116 = arith.constant 0 : index
    %247 = vector.load %arg2[%c1, %c0_115, %c0_116] : memref<2x1x32xf32, #tpu.memory_space<vmem>>, vector<1x1x32xf32>
    %248 = vector.shape_cast %247 : vector<1x1x32xf32> to vector<1x32xf32>
    %c1_117 = arith.constant 1 : index
    %c0_118 = arith.constant 0 : index
    %c0_119 = arith.constant 0 : index
    %249 = vector.load %arg3[%c1_117, %c0_118, %c0_119] : memref<2x1x32xf32, #tpu.memory_space<vmem>>, vector<1x1x32xf32>
    %250 = vector.shape_cast %249 : vector<1x1x32xf32> to vector<1x32xf32>
    %c1_120 = arith.constant 1 : index
    %c0_121 = arith.constant 0 : index
    %c0_122 = arith.constant 0 : index
    %251 = vector.load %arg4[%c1_120, %c0_121, %c0_122] : memref<2x32x32xf32, #tpu.memory_space<vmem>>, vector<1x32x32xf32>
    %252 = vector.shape_cast %251 : vector<1x32x32xf32> to vector<32x32xf32>
    %c1_123 = arith.constant 1 : index
    %c0_124 = arith.constant 0 : index
    %c0_125 = arith.constant 0 : index
    %253 = vector.load %arg5[%c1_123, %c0_124, %c0_125] : memref<2x1x32xf32, #tpu.memory_space<vmem>>, vector<1x1x32xf32>
    %254 = vector.shape_cast %253 : vector<1x1x32xf32> to vector<1x32xf32>
    %c1_126 = arith.constant 1 : index
    %c0_127 = arith.constant 0 : index
    %c0_128 = arith.constant 0 : index
    %255 = vector.load %arg6[%c1_126, %c0_127, %c0_128] : memref<2x32x32xf32, #tpu.memory_space<vmem>>, vector<1x32x32xf32>
    %256 = vector.shape_cast %255 : vector<1x32x32xf32> to vector<32x32xf32>
    %c1_129 = arith.constant 1 : index
    %c0_130 = arith.constant 0 : index
    %c0_131 = arith.constant 0 : index
    %257 = vector.load %arg7[%c1_129, %c0_130, %c0_131] : memref<2x1x32xf32, #tpu.memory_space<vmem>>, vector<1x1x32xf32>
    %258 = vector.shape_cast %257 : vector<1x1x32xf32> to vector<1x32xf32>
    %c1_132 = arith.constant 1 : index
    %c0_133 = arith.constant 0 : index
    %c0_134 = arith.constant 0 : index
    %259 = vector.load %arg8[%c1_132, %c0_133, %c0_134] : memref<2x32x32xf32, #tpu.memory_space<vmem>>, vector<1x32x32xf32>
    %260 = vector.shape_cast %259 : vector<1x32x32xf32> to vector<32x32xf32>
    %c1_135 = arith.constant 1 : index
    %c0_136 = arith.constant 0 : index
    %c0_137 = arith.constant 0 : index
    %261 = vector.load %arg9[%c1_135, %c0_136, %c0_137] : memref<2x1x32xf32, #tpu.memory_space<vmem>>, vector<1x1x32xf32>
    %262 = vector.shape_cast %261 : vector<1x1x32xf32> to vector<1x32xf32>
    %c1_138 = arith.constant 1 : index
    %c0_139 = arith.constant 0 : index
    %c0_140 = arith.constant 0 : index
    %263 = vector.load %arg10[%c1_138, %c0_139, %c0_140] : memref<2x32x32xf32, #tpu.memory_space<vmem>>, vector<1x32x32xf32>
    %264 = vector.shape_cast %263 : vector<1x32x32xf32> to vector<32x32xf32>
    %c1_141 = arith.constant 1 : index
    %c0_142 = arith.constant 0 : index
    %c0_143 = arith.constant 0 : index
    %265 = vector.load %arg11[%c1_141, %c0_142, %c0_143] : memref<2x1x32xf32, #tpu.memory_space<vmem>>, vector<1x1x32xf32>
    %266 = vector.shape_cast %265 : vector<1x1x32xf32> to vector<1x32xf32>
    %c1_144 = arith.constant 1 : index
    %c0_145 = arith.constant 0 : index
    %c0_146 = arith.constant 0 : index
    %267 = vector.load %arg12[%c1_144, %c0_145, %c0_146] : memref<2x1x32xf32, #tpu.memory_space<vmem>>, vector<1x1x32xf32>
    %268 = vector.shape_cast %267 : vector<1x1x32xf32> to vector<1x32xf32>
    %c1_147 = arith.constant 1 : index
    %c0_148 = arith.constant 0 : index
    %c0_149 = arith.constant 0 : index
    %269 = vector.load %arg13[%c1_147, %c0_148, %c0_149] : memref<2x1x32xf32, #tpu.memory_space<vmem>>, vector<1x1x32xf32>
    %270 = vector.shape_cast %269 : vector<1x1x32xf32> to vector<1x32xf32>
    %c1_150 = arith.constant 1 : index
    %c0_151 = arith.constant 0 : index
    %c0_152 = arith.constant 0 : index
    %271 = vector.load %arg14[%c1_150, %c0_151, %c0_152] : memref<2x32x128xf32, #tpu.memory_space<vmem>>, vector<1x32x128xf32>
    %272 = vector.shape_cast %271 : vector<1x32x128xf32> to vector<32x128xf32>
    %c1_153 = arith.constant 1 : index
    %c0_154 = arith.constant 0 : index
    %c0_155 = arith.constant 0 : index
    %273 = vector.load %arg15[%c1_153, %c0_154, %c0_155] : memref<2x1x128xf32, #tpu.memory_space<vmem>>, vector<1x1x128xf32>
    %274 = vector.shape_cast %273 : vector<1x1x128xf32> to vector<1x128xf32>
    %c1_156 = arith.constant 1 : index
    %c0_157 = arith.constant 0 : index
    %c0_158 = arith.constant 0 : index
    %275 = vector.load %arg16[%c1_156, %c0_157, %c0_158] : memref<2x128x32xf32, #tpu.memory_space<vmem>>, vector<1x128x32xf32>
    %276 = vector.shape_cast %275 : vector<1x128x32xf32> to vector<128x32xf32>
    %c1_159 = arith.constant 1 : index
    %c0_160 = arith.constant 0 : index
    %c0_161 = arith.constant 0 : index
    %277 = vector.load %arg17[%c1_159, %c0_160, %c0_161] : memref<2x1x32xf32, #tpu.memory_space<vmem>>, vector<1x1x32xf32>
    %278 = vector.shape_cast %277 : vector<1x1x32xf32> to vector<1x32xf32>
    %cst_162 = arith.constant dense<0.000000e+00> : vector<8xf32>
    %279 = vector.multi_reduction <add>, %246, %cst_162 [1] : vector<8x32xf32> to vector<8xf32>
    %280 = vector.shape_cast %279 : vector<8xf32> to vector<8x1xf32>
    %cst_163 = arith.constant 3.200000e+01 : f32
    %281 = vector.broadcast %cst_163 : f32 to vector<8x1xf32>
    %282 = arith.divf %280, %281 : vector<8x1xf32>
    %283 = vector.broadcast %282 : vector<8x1xf32> to vector<8x32xf32>
    %284 = arith.subf %246, %283 : vector<8x32xf32>
    %285 = arith.mulf %284, %284 : vector<8x32xf32>
    %cst_164 = arith.constant dense<0.000000e+00> : vector<8xf32>
    %286 = vector.multi_reduction <add>, %285, %cst_164 [1] : vector<8x32xf32> to vector<8xf32>
    %287 = vector.shape_cast %286 : vector<8xf32> to vector<8x1xf32>
    %cst_165 = arith.constant 3.200000e+01 : f32
    %288 = vector.broadcast %cst_165 : f32 to vector<8x1xf32>
    %289 = arith.divf %287, %288 : vector<8x1xf32>
    %cst_166 = arith.constant 9.99999974E-6 : f32
    %290 = vector.broadcast %cst_166 : f32 to vector<8x1xf32>
    %291 = arith.addf %289, %290 : vector<8x1xf32>
    %292 = math.rsqrt %291 : vector<8x1xf32>
    %293 = vector.broadcast %292 : vector<8x1xf32> to vector<8x32xf32>
    %294 = arith.mulf %284, %293 : vector<8x32xf32>
    %295 = vector.broadcast %248 : vector<1x32xf32> to vector<8x32xf32>
    %296 = arith.mulf %294, %295 : vector<8x32xf32>
    %297 = vector.broadcast %250 : vector<1x32xf32> to vector<8x32xf32>
    %298 = arith.addf %296, %297 : vector<8x32xf32>
    %cst_167 = arith.constant dense<0.000000e+00> : vector<8x32xf32>
    %299 = tpu.matmul %298, %252, %cst_167 {dimension_numbers = #tpu.dot_dimension_numbers<[1], [0], [0], [1], [0, 0, 1, 1], [], []>} : vector<8x32xf32>, vector<32x32xf32>, vector<8x32xf32> -> vector<8x32xf32>
    %300 = vector.broadcast %254 : vector<1x32xf32> to vector<8x32xf32>
    %301 = arith.addf %299, %300 : vector<8x32xf32>
    %cst_168 = arith.constant dense<0.000000e+00> : vector<8x32xf32>
    %302 = tpu.matmul %298, %256, %cst_168 {dimension_numbers = #tpu.dot_dimension_numbers<[1], [0], [0], [1], [0, 0, 1, 1], [], []>} : vector<8x32xf32>, vector<32x32xf32>, vector<8x32xf32> -> vector<8x32xf32>
    %303 = vector.broadcast %258 : vector<1x32xf32> to vector<8x32xf32>
    %304 = arith.addf %302, %303 : vector<8x32xf32>
    %cst_169 = arith.constant dense<0.000000e+00> : vector<8x32xf32>
    %305 = tpu.matmul %298, %260, %cst_169 {dimension_numbers = #tpu.dot_dimension_numbers<[1], [0], [0], [1], [0, 0, 1, 1], [], []>} : vector<8x32xf32>, vector<32x32xf32>, vector<8x32xf32> -> vector<8x32xf32>
    %306 = vector.broadcast %262 : vector<1x32xf32> to vector<8x32xf32>
    %307 = arith.addf %305, %306 : vector<8x32xf32>
    %cst_170 = arith.constant 0.000000e+00 : f32
    %308 = vector.broadcast %cst_170 : f32 to vector<8x32xf32>
    %309 = arith.mulf %301, %16 : vector<8x32xf32>
    %cst_171 = arith.constant dense<0.000000e+00> : vector<8x8xf32>
    %310 = tpu.matmul %309, %304, %cst_171 {dimension_numbers = #tpu.dot_dimension_numbers<[1], [1], [0], [0], [0, 0, 1, 0], [], []>} : vector<8x32xf32>, vector<8x32xf32>, vector<8x8xf32> -> vector<8x8xf32>
    %cst_172 = arith.constant 0.353553385 : f32
    %311 = vector.broadcast %cst_172 : f32 to vector<8x8xf32>
    %312 = arith.mulf %310, %311 : vector<8x8xf32>
    %313 = arith.addf %312, %7 : vector<8x8xf32>
    %cst_173 = arith.constant dense<0xFF800000> : vector<8xf32>
    %314 = vector.multi_reduction <maximumf>, %313, %cst_173 [1] : vector<8x8xf32> to vector<8xf32>
    %315 = vector.shape_cast %314 : vector<8xf32> to vector<8x1xf32>
    %316 = vector.broadcast %315 : vector<8x1xf32> to vector<8x8xf32>
    %317 = arith.subf %313, %316 : vector<8x8xf32>
    %318 = math.exp %317 : vector<8x8xf32>
    %cst_174 = arith.constant dense<0.000000e+00> : vector<8xf32>
    %319 = vector.multi_reduction <add>, %318, %cst_174 [1] : vector<8x8xf32> to vector<8xf32>
    %320 = vector.shape_cast %319 : vector<8xf32> to vector<8x1xf32>
    %321 = tpu.reciprocal %320 {approx = true} : vector<8x1xf32> -> vector<8x1xf32>
    %322 = vector.broadcast %321 : vector<8x1xf32> to vector<8x8xf32>
    %323 = arith.mulf %318, %322 : vector<8x8xf32>
    %324 = arith.mulf %307, %16 : vector<8x32xf32>
    %cst_175 = arith.constant dense<0.000000e+00> : vector<8x32xf32>
    %325 = tpu.matmul %323, %324, %cst_175 {dimension_numbers = #tpu.dot_dimension_numbers<[1], [0], [0], [1], [0, 0, 1, 1], [], []>} : vector<8x8xf32>, vector<8x32xf32>, vector<8x32xf32> -> vector<8x32xf32>
    %326 = arith.addf %308, %325 : vector<8x32xf32>
    %327 = arith.mulf %301, %24 : vector<8x32xf32>
    %cst_176 = arith.constant dense<0.000000e+00> : vector<8x8xf32>
    %328 = tpu.matmul %327, %304, %cst_176 {dimension_numbers = #tpu.dot_dimension_numbers<[1], [1], [0], [0], [0, 0, 1, 0], [], []>} : vector<8x32xf32>, vector<8x32xf32>, vector<8x8xf32> -> vector<8x8xf32>
    %cst_177 = arith.constant 0.353553385 : f32
    %329 = vector.broadcast %cst_177 : f32 to vector<8x8xf32>
    %330 = arith.mulf %328, %329 : vector<8x8xf32>
    %331 = arith.addf %330, %7 : vector<8x8xf32>
    %cst_178 = arith.constant dense<0xFF800000> : vector<8xf32>
    %332 = vector.multi_reduction <maximumf>, %331, %cst_178 [1] : vector<8x8xf32> to vector<8xf32>
    %333 = vector.shape_cast %332 : vector<8xf32> to vector<8x1xf32>
    %334 = vector.broadcast %333 : vector<8x1xf32> to vector<8x8xf32>
    %335 = arith.subf %331, %334 : vector<8x8xf32>
    %336 = math.exp %335 : vector<8x8xf32>
    %cst_179 = arith.constant dense<0.000000e+00> : vector<8xf32>
    %337 = vector.multi_reduction <add>, %336, %cst_179 [1] : vector<8x8xf32> to vector<8xf32>
    %338 = vector.shape_cast %337 : vector<8xf32> to vector<8x1xf32>
    %339 = tpu.reciprocal %338 {approx = true} : vector<8x1xf32> -> vector<8x1xf32>
    %340 = vector.broadcast %339 : vector<8x1xf32> to vector<8x8xf32>
    %341 = arith.mulf %336, %340 : vector<8x8xf32>
    %342 = arith.mulf %307, %24 : vector<8x32xf32>
    %cst_180 = arith.constant dense<0.000000e+00> : vector<8x32xf32>
    %343 = tpu.matmul %341, %342, %cst_180 {dimension_numbers = #tpu.dot_dimension_numbers<[1], [0], [0], [1], [0, 0, 1, 1], [], []>} : vector<8x8xf32>, vector<8x32xf32>, vector<8x32xf32> -> vector<8x32xf32>
    %344 = arith.addf %326, %343 : vector<8x32xf32>
    %345 = arith.mulf %301, %32 : vector<8x32xf32>
    %cst_181 = arith.constant dense<0.000000e+00> : vector<8x8xf32>
    %346 = tpu.matmul %345, %304, %cst_181 {dimension_numbers = #tpu.dot_dimension_numbers<[1], [1], [0], [0], [0, 0, 1, 0], [], []>} : vector<8x32xf32>, vector<8x32xf32>, vector<8x8xf32> -> vector<8x8xf32>
    %cst_182 = arith.constant 0.353553385 : f32
    %347 = vector.broadcast %cst_182 : f32 to vector<8x8xf32>
    %348 = arith.mulf %346, %347 : vector<8x8xf32>
    %349 = arith.addf %348, %7 : vector<8x8xf32>
    %cst_183 = arith.constant dense<0xFF800000> : vector<8xf32>
    %350 = vector.multi_reduction <maximumf>, %349, %cst_183 [1] : vector<8x8xf32> to vector<8xf32>
    %351 = vector.shape_cast %350 : vector<8xf32> to vector<8x1xf32>
    %352 = vector.broadcast %351 : vector<8x1xf32> to vector<8x8xf32>
    %353 = arith.subf %349, %352 : vector<8x8xf32>
    %354 = math.exp %353 : vector<8x8xf32>
    %cst_184 = arith.constant dense<0.000000e+00> : vector<8xf32>
    %355 = vector.multi_reduction <add>, %354, %cst_184 [1] : vector<8x8xf32> to vector<8xf32>
    %356 = vector.shape_cast %355 : vector<8xf32> to vector<8x1xf32>
    %357 = tpu.reciprocal %356 {approx = true} : vector<8x1xf32> -> vector<8x1xf32>
    %358 = vector.broadcast %357 : vector<8x1xf32> to vector<8x8xf32>
    %359 = arith.mulf %354, %358 : vector<8x8xf32>
    %360 = arith.mulf %307, %32 : vector<8x32xf32>
    %cst_185 = arith.constant dense<0.000000e+00> : vector<8x32xf32>
    %361 = tpu.matmul %359, %360, %cst_185 {dimension_numbers = #tpu.dot_dimension_numbers<[1], [0], [0], [1], [0, 0, 1, 1], [], []>} : vector<8x8xf32>, vector<8x32xf32>, vector<8x32xf32> -> vector<8x32xf32>
    %362 = arith.addf %344, %361 : vector<8x32xf32>
    %363 = arith.mulf %301, %40 : vector<8x32xf32>
    %cst_186 = arith.constant dense<0.000000e+00> : vector<8x8xf32>
    %364 = tpu.matmul %363, %304, %cst_186 {dimension_numbers = #tpu.dot_dimension_numbers<[1], [1], [0], [0], [0, 0, 1, 0], [], []>} : vector<8x32xf32>, vector<8x32xf32>, vector<8x8xf32> -> vector<8x8xf32>
    %cst_187 = arith.constant 0.353553385 : f32
    %365 = vector.broadcast %cst_187 : f32 to vector<8x8xf32>
    %366 = arith.mulf %364, %365 : vector<8x8xf32>
    %367 = arith.addf %366, %7 : vector<8x8xf32>
    %cst_188 = arith.constant dense<0xFF800000> : vector<8xf32>
    %368 = vector.multi_reduction <maximumf>, %367, %cst_188 [1] : vector<8x8xf32> to vector<8xf32>
    %369 = vector.shape_cast %368 : vector<8xf32> to vector<8x1xf32>
    %370 = vector.broadcast %369 : vector<8x1xf32> to vector<8x8xf32>
    %371 = arith.subf %367, %370 : vector<8x8xf32>
    %372 = math.exp %371 : vector<8x8xf32>
    %cst_189 = arith.constant dense<0.000000e+00> : vector<8xf32>
    %373 = vector.multi_reduction <add>, %372, %cst_189 [1] : vector<8x8xf32> to vector<8xf32>
    %374 = vector.shape_cast %373 : vector<8xf32> to vector<8x1xf32>
    %375 = tpu.reciprocal %374 {approx = true} : vector<8x1xf32> -> vector<8x1xf32>
    %376 = vector.broadcast %375 : vector<8x1xf32> to vector<8x8xf32>
    %377 = arith.mulf %372, %376 : vector<8x8xf32>
    %378 = arith.mulf %307, %40 : vector<8x32xf32>
    %cst_190 = arith.constant dense<0.000000e+00> : vector<8x32xf32>
    %379 = tpu.matmul %377, %378, %cst_190 {dimension_numbers = #tpu.dot_dimension_numbers<[1], [0], [0], [1], [0, 0, 1, 1], [], []>} : vector<8x8xf32>, vector<8x32xf32>, vector<8x32xf32> -> vector<8x32xf32>
    %380 = arith.addf %362, %379 : vector<8x32xf32>
    %cst_191 = arith.constant dense<0.000000e+00> : vector<8x32xf32>
    %381 = tpu.matmul %380, %264, %cst_191 {dimension_numbers = #tpu.dot_dimension_numbers<[1], [0], [0], [1], [0, 0, 1, 1], [], []>} : vector<8x32xf32>, vector<32x32xf32>, vector<8x32xf32> -> vector<8x32xf32>
    %382 = vector.broadcast %266 : vector<1x32xf32> to vector<8x32xf32>
    %383 = arith.addf %381, %382 : vector<8x32xf32>
    %384 = arith.addf %246, %383 : vector<8x32xf32>
    %cst_192 = arith.constant dense<0.000000e+00> : vector<8xf32>
    %385 = vector.multi_reduction <add>, %384, %cst_192 [1] : vector<8x32xf32> to vector<8xf32>
    %386 = vector.shape_cast %385 : vector<8xf32> to vector<8x1xf32>
    %cst_193 = arith.constant 3.200000e+01 : f32
    %387 = vector.broadcast %cst_193 : f32 to vector<8x1xf32>
    %388 = arith.divf %386, %387 : vector<8x1xf32>
    %389 = vector.broadcast %388 : vector<8x1xf32> to vector<8x32xf32>
    %390 = arith.subf %384, %389 : vector<8x32xf32>
    %391 = arith.mulf %390, %390 : vector<8x32xf32>
    %cst_194 = arith.constant dense<0.000000e+00> : vector<8xf32>
    %392 = vector.multi_reduction <add>, %391, %cst_194 [1] : vector<8x32xf32> to vector<8xf32>
    %393 = vector.shape_cast %392 : vector<8xf32> to vector<8x1xf32>
    %cst_195 = arith.constant 3.200000e+01 : f32
    %394 = vector.broadcast %cst_195 : f32 to vector<8x1xf32>
    %395 = arith.divf %393, %394 : vector<8x1xf32>
    %cst_196 = arith.constant 9.99999974E-6 : f32
    %396 = vector.broadcast %cst_196 : f32 to vector<8x1xf32>
    %397 = arith.addf %395, %396 : vector<8x1xf32>
    %398 = math.rsqrt %397 : vector<8x1xf32>
    %399 = vector.broadcast %398 : vector<8x1xf32> to vector<8x32xf32>
    %400 = arith.mulf %390, %399 : vector<8x32xf32>
    %401 = vector.broadcast %268 : vector<1x32xf32> to vector<8x32xf32>
    %402 = arith.mulf %400, %401 : vector<8x32xf32>
    %403 = vector.broadcast %270 : vector<1x32xf32> to vector<8x32xf32>
    %404 = arith.addf %402, %403 : vector<8x32xf32>
    %cst_197 = arith.constant dense<0.000000e+00> : vector<8x128xf32>
    %405 = tpu.matmul %404, %272, %cst_197 {dimension_numbers = #tpu.dot_dimension_numbers<[1], [0], [0], [1], [0, 0, 1, 1], [], []>} : vector<8x32xf32>, vector<32x128xf32>, vector<8x128xf32> -> vector<8x128xf32>
    %406 = vector.broadcast %274 : vector<1x128xf32> to vector<8x128xf32>
    %407 = arith.addf %405, %406 : vector<8x128xf32>
    %cst_198 = arith.constant 5.000000e-01 : f32
    %408 = vector.broadcast %cst_198 : f32 to vector<8x128xf32>
    %409 = arith.mulf %408, %407 : vector<8x128xf32>
    %cst_199 = arith.constant 0.707106769 : f32
    %410 = vector.broadcast %cst_199 : f32 to vector<8x128xf32>
    %411 = arith.mulf %407, %410 : vector<8x128xf32>
    %cst_200 = arith.constant 0.000000e+00 : f32
    %412 = vector.broadcast %cst_200 : f32 to vector<8x128xf32>
    %413 = arith.cmpf oge, %411, %412 : vector<8x128xf32>
    %cst_201 = arith.constant 1.000000e+00 : f32
    %cst_202 = arith.constant -1.000000e+00 : f32
    %414 = vector.broadcast %cst_201 : f32 to vector<8x128xf32>
    %415 = vector.broadcast %cst_202 : f32 to vector<8x128xf32>
    %416 = arith.select %413, %414, %415 : vector<8x128xi1>, vector<8x128xf32>
    %417 = math.absf %411 : vector<8x128xf32>
    %cst_203 = arith.constant 0.327591091 : f32
    %418 = vector.broadcast %cst_203 : f32 to vector<8x128xf32>
    %419 = arith.mulf %418, %417 : vector<8x128xf32>
    %cst_204 = arith.constant 1.000000e+00 : f32
    %420 = vector.broadcast %cst_204 : f32 to vector<8x128xf32>
    %421 = arith.addf %420, %419 : vector<8x128xf32>
    %cst_205 = arith.constant 1.000000e+00 : f32
    %422 = vector.broadcast %cst_205 : f32 to vector<8x128xf32>
    %423 = arith.divf %422, %421 : vector<8x128xf32>
    %cst_206 = arith.constant 1.06140542 : f32
    %424 = vector.broadcast %cst_206 : f32 to vector<8x128xf32>
    %425 = arith.mulf %424, %423 : vector<8x128xf32>
    %cst_207 = arith.constant -1.45315206 : f32
    %426 = vector.broadcast %cst_207 : f32 to vector<8x128xf32>
    %427 = arith.addf %425, %426 : vector<8x128xf32>
    %428 = arith.mulf %427, %423 : vector<8x128xf32>
    %cst_208 = arith.constant 1.42141378 : f32
    %429 = vector.broadcast %cst_208 : f32 to vector<8x128xf32>
    %430 = arith.addf %428, %429 : vector<8x128xf32>
    %431 = arith.mulf %430, %423 : vector<8x128xf32>
    %cst_209 = arith.constant -0.284496725 : f32
    %432 = vector.broadcast %cst_209 : f32 to vector<8x128xf32>
    %433 = arith.addf %431, %432 : vector<8x128xf32>
    %434 = arith.mulf %433, %423 : vector<8x128xf32>
    %cst_210 = arith.constant 0.254829586 : f32
    %435 = vector.broadcast %cst_210 : f32 to vector<8x128xf32>
    %436 = arith.addf %434, %435 : vector<8x128xf32>
    %437 = arith.mulf %436, %423 : vector<8x128xf32>
    %cst_211 = arith.constant 0.000000e+00 : f32
    %438 = vector.broadcast %cst_211 : f32 to vector<8x128xf32>
    %439 = arith.subf %438, %417 : vector<8x128xf32>
    %440 = arith.mulf %439, %417 : vector<8x128xf32>
    %441 = math.exp %440 : vector<8x128xf32>
    %442 = arith.mulf %437, %441 : vector<8x128xf32>
    %cst_212 = arith.constant 1.000000e+00 : f32
    %443 = vector.broadcast %cst_212 : f32 to vector<8x128xf32>
    %444 = arith.subf %443, %442 : vector<8x128xf32>
    %445 = arith.mulf %416, %444 : vector<8x128xf32>
    %cst_213 = arith.constant 1.000000e+00 : f32
    %446 = vector.broadcast %cst_213 : f32 to vector<8x128xf32>
    %447 = arith.addf %446, %445 : vector<8x128xf32>
    %448 = arith.mulf %409, %447 : vector<8x128xf32>
    %cst_214 = arith.constant dense<0.000000e+00> : vector<8x32xf32>
    %449 = tpu.matmul %448, %276, %cst_214 {dimension_numbers = #tpu.dot_dimension_numbers<[1], [0], [0], [1], [0, 0, 1, 1], [], []>} : vector<8x128xf32>, vector<128x32xf32>, vector<8x32xf32> -> vector<8x32xf32>
    %450 = vector.broadcast %278 : vector<1x32xf32> to vector<8x32xf32>
    %451 = arith.addf %449, %450 : vector<8x32xf32>
    %452 = arith.addf %384, %451 : vector<8x32xf32>
    %c0_215 = arith.constant 0 : index
    %c0_216 = arith.constant 0 : index
    %453 = vector.load %arg18[%c0_215, %c0_216] : memref<1x32xf32, #tpu.memory_space<vmem>>, vector<1x32xf32>
    %c0_217 = arith.constant 0 : index
    %c0_218 = arith.constant 0 : index
    %454 = vector.load %arg19[%c0_217, %c0_218] : memref<1x32xf32, #tpu.memory_space<vmem>>, vector<1x32xf32>
    %cst_219 = arith.constant dense<0.000000e+00> : vector<8xf32>
    %455 = vector.multi_reduction <add>, %452, %cst_219 [1] : vector<8x32xf32> to vector<8xf32>
    %456 = vector.shape_cast %455 : vector<8xf32> to vector<8x1xf32>
    %cst_220 = arith.constant 3.200000e+01 : f32
    %457 = vector.broadcast %cst_220 : f32 to vector<8x1xf32>
    %458 = arith.divf %456, %457 : vector<8x1xf32>
    %459 = vector.broadcast %458 : vector<8x1xf32> to vector<8x32xf32>
    %460 = arith.subf %452, %459 : vector<8x32xf32>
    %461 = arith.mulf %460, %460 : vector<8x32xf32>
    %cst_221 = arith.constant dense<0.000000e+00> : vector<8xf32>
    %462 = vector.multi_reduction <add>, %461, %cst_221 [1] : vector<8x32xf32> to vector<8xf32>
    %463 = vector.shape_cast %462 : vector<8xf32> to vector<8x1xf32>
    %cst_222 = arith.constant 3.200000e+01 : f32
    %464 = vector.broadcast %cst_222 : f32 to vector<8x1xf32>
    %465 = arith.divf %463, %464 : vector<8x1xf32>
    %cst_223 = arith.constant 9.99999974E-6 : f32
    %466 = vector.broadcast %cst_223 : f32 to vector<8x1xf32>
    %467 = arith.addf %465, %466 : vector<8x1xf32>
    %468 = math.rsqrt %467 : vector<8x1xf32>
    %469 = vector.broadcast %468 : vector<8x1xf32> to vector<8x32xf32>
    %470 = arith.mulf %460, %469 : vector<8x32xf32>
    %471 = vector.broadcast %453 : vector<1x32xf32> to vector<8x32xf32>
    %472 = arith.mulf %470, %471 : vector<8x32xf32>
    %473 = vector.broadcast %454 : vector<1x32xf32> to vector<8x32xf32>
    %474 = arith.addf %472, %473 : vector<8x32xf32>
    %c0_224 = arith.constant 0 : index
    %c0_225 = arith.constant 0 : index
    %475 = vector.load %arg20[%c0_224, %c0_225] : memref<32x32xf32, #tpu.memory_space<vmem>>, vector<32x32xf32>
    %cst_226 = arith.constant dense<0.000000e+00> : vector<8x32xf32>
    %476 = tpu.matmul %474, %475, %cst_226 {dimension_numbers = #tpu.dot_dimension_numbers<[1], [0], [0], [1], [0, 0, 1, 1], [], []>} : vector<8x32xf32>, vector<32x32xf32>, vector<8x32xf32> -> vector<8x32xf32>
    %c0_227 = arith.constant 0 : index
    %c0_228 = arith.constant 0 : index
    %477 = vector.load %arg21[%c0_227, %c0_228] : memref<1x32xf32, #tpu.memory_space<vmem>>, vector<1x32xf32>
    %478 = vector.broadcast %477 : vector<1x32xf32> to vector<8x32xf32>
    %479 = arith.addf %476, %478 : vector<8x32xf32>
    %c0_229 = arith.constant 0 : index
    %c0_230 = arith.constant 0 : index
    %c0_231 = arith.constant 0 : index
    %480 = vector.load %arg22[%c0_229, %c0_230, %c0_231] : memref<1x8x32xf32, #tpu.memory_space<vmem>>, vector<1x8x32xf32>
    %481 = vector.shape_cast %480 : vector<1x8x32xf32> to vector<8x32xf32>
    %482 = vector.shape_cast %479 : vector<8x32xf32> to vector<1x8x32xf32>
    tpu.vector_store %arg22[%c0_229, %c0_230, %c0_231], %482 {strides = array<i32>} : memref<1x8x32xf32, #tpu.memory_space<vmem>>, vector<1x8x32xf32>,
    return
  }
  func.func @transform_0(%arg0: i32) -> (i32, i32, i32) {
    %c0_i32 = arith.constant 0 : i32
    %c0_i32_0 = arith.constant 0 : i32
    %c0_i32_1 = arith.constant 0 : i32
    return %arg0, %c0_i32, %c0_i32_0 : i32, i32, i32
  }
  func.func @transform_1(%arg0: i32) -> (i32, i32, i32) {
    %c0_i32 = arith.constant 0 : i32
    %c0_i32_0 = arith.constant 0 : i32
    %c0_i32_1 = arith.constant 0 : i32
    %c0_i32_2 = arith.constant 0 : i32
    return %c0_i32, %c0_i32_0, %c0_i32_1 : i32, i32, i32
  }
  func.func @transform_2(%arg0: i32) -> (i32, i32, i32) {
    %c0_i32 = arith.constant 0 : i32
    %c0_i32_0 = arith.constant 0 : i32
    %c0_i32_1 = arith.constant 0 : i32
    %c0_i32_2 = arith.constant 0 : i32
    return %c0_i32, %c0_i32_0, %c0_i32_1 : i32, i32, i32
  }
  func.func @transform_3(%arg0: i32) -> (i32, i32, i32) {
    %c0_i32 = arith.constant 0 : i32
    %c0_i32_0 = arith.constant 0 : i32
    %c0_i32_1 = arith.constant 0 : i32
    %c0_i32_2 = arith.constant 0 : i32
    return %c0_i32, %c0_i32_0, %c0_i32_1 : i32, i32, i32
  }
  func.func @transform_4(%arg0: i32) -> (i32, i32, i32) {
    %c0_i32 = arith.constant 0 : i32
    %c0_i32_0 = arith.constant 0 : i32
    %c0_i32_1 = arith.constant 0 : i32
    %c0_i32_2 = arith.constant 0 : i32
    return %c0_i32, %c0_i32_0, %c0_i32_1 : i32, i32, i32
  }
  func.func @transform_5(%arg0: i32) -> (i32, i32, i32) {
    %c0_i32 = arith.constant 0 : i32
    %c0_i32_0 = arith.constant 0 : i32
    %c0_i32_1 = arith.constant 0 : i32
    %c0_i32_2 = arith.constant 0 : i32
    return %c0_i32, %c0_i32_0, %c0_i32_1 : i32, i32, i32
  }
  func.func @transform_6(%arg0: i32) -> (i32, i32, i32) {
    %c0_i32 = arith.constant 0 : i32
    %c0_i32_0 = arith.constant 0 : i32
    %c0_i32_1 = arith.constant 0 : i32
    %c0_i32_2 = arith.constant 0 : i32
    return %c0_i32, %c0_i32_0, %c0_i32_1 : i32, i32, i32
  }
  func.func @transform_7(%arg0: i32) -> (i32, i32, i32) {
    %c0_i32 = arith.constant 0 : i32
    %c0_i32_0 = arith.constant 0 : i32
    %c0_i32_1 = arith.constant 0 : i32
    %c0_i32_2 = arith.constant 0 : i32
    return %c0_i32, %c0_i32_0, %c0_i32_1 : i32, i32, i32
  }
  func.func @transform_8(%arg0: i32) -> (i32, i32, i32) {
    %c0_i32 = arith.constant 0 : i32
    %c0_i32_0 = arith.constant 0 : i32
    %c0_i32_1 = arith.constant 0 : i32
    %c0_i32_2 = arith.constant 0 : i32
    return %c0_i32, %c0_i32_0, %c0_i32_1 : i32, i32, i32
  }
  func.func @transform_9(%arg0: i32) -> (i32, i32, i32) {
    %c0_i32 = arith.constant 0 : i32
    %c0_i32_0 = arith.constant 0 : i32
    %c0_i32_1 = arith.constant 0 : i32
    %c0_i32_2 = arith.constant 0 : i32
    return %c0_i32, %c0_i32_0, %c0_i32_1 : i32, i32, i32
  }
  func.func @transform_10(%arg0: i32) -> (i32, i32, i32) {
    %c0_i32 = arith.constant 0 : i32
    %c0_i32_0 = arith.constant 0 : i32
    %c0_i32_1 = arith.constant 0 : i32
    %c0_i32_2 = arith.constant 0 : i32
    return %c0_i32, %c0_i32_0, %c0_i32_1 : i32, i32, i32
  }
  func.func @transform_11(%arg0: i32) -> (i32, i32, i32) {
    %c0_i32 = arith.constant 0 : i32
    %c0_i32_0 = arith.constant 0 : i32
    %c0_i32_1 = arith.constant 0 : i32
    %c0_i32_2 = arith.constant 0 : i32
    return %c0_i32, %c0_i32_0, %c0_i32_1 : i32, i32, i32
  }
  func.func @transform_12(%arg0: i32) -> (i32, i32, i32) {
    %c0_i32 = arith.constant 0 : i32
    %c0_i32_0 = arith.constant 0 : i32
    %c0_i32_1 = arith.constant 0 : i32
    %c0_i32_2 = arith.constant 0 : i32
    return %c0_i32, %c0_i32_0, %c0_i32_1 : i32, i32, i32
  }
  func.func @transform_13(%arg0: i32) -> (i32, i32, i32) {
    %c0_i32 = arith.constant 0 : i32
    %c0_i32_0 = arith.constant 0 : i32
    %c0_i32_1 = arith.constant 0 : i32
    %c0_i32_2 = arith.constant 0 : i32
    return %c0_i32, %c0_i32_0, %c0_i32_1 : i32, i32, i32
  }
  func.func @transform_14(%arg0: i32) -> (i32, i32, i32) {
    %c0_i32 = arith.constant 0 : i32
    %c0_i32_0 = arith.constant 0 : i32
    %c0_i32_1 = arith.constant 0 : i32
    %c0_i32_2 = arith.constant 0 : i32
    return %c0_i32, %c0_i32_0, %c0_i32_1 : i32, i32, i32
  }
  func.func @transform_15(%arg0: i32) -> (i32, i32, i32) {
    %c0_i32 = arith.constant 0 : i32
    %c0_i32_0 = arith.constant 0 : i32
    %c0_i32_1 = arith.constant 0 : i32
    %c0_i32_2 = arith.constant 0 : i32
    return %c0_i32, %c0_i32_0, %c0_i32_1 : i32, i32, i32
  }
  func.func @transform_16(%arg0: i32) -> (i32, i32, i32) {
    %c0_i32 = arith.constant 0 : i32
    %c0_i32_0 = arith.constant 0 : i32
    %c0_i32_1 = arith.constant 0 : i32
    %c0_i32_2 = arith.constant 0 : i32
    return %c0_i32, %c0_i32_0, %c0_i32_1 : i32, i32, i32
  }
  func.func @transform_17(%arg0: i32) -> (i32, i32) {
    %c0_i32 = arith.constant 0 : i32
    %c0_i32_0 = arith.constant 0 : i32
    %c0_i32_1 = arith.constant 0 : i32
    return %c0_i32, %c0_i32_0 : i32, i32
  }
  func.func @transform_18(%arg0: i32) -> (i32, i32) {
    %c0_i32 = arith.constant 0 : i32
    %c0_i32_0 = arith.constant 0 : i32
    %c0_i32_1 = arith.constant 0 : i32
    return %c0_i32, %c0_i32_0 : i32, i32
  }
  func.func @transform_19(%arg0: i32) -> (i32, i32) {
    %c0_i32 = arith.constant 0 : i32
    %c0_i32_0 = arith.constant 0 : i32
    %c0_i32_1 = arith.constant 0 : i32
    return %c0_i32, %c0_i32_0 : i32, i32
  }
  func.func @transform_20(%arg0: i32) -> (i32, i32) {
    %c0_i32 = arith.constant 0 : i32
    %c0_i32_0 = arith.constant 0 : i32
    %c0_i32_1 = arith.constant 0 : i32
    return %c0_i32, %c0_i32_0 : i32, i32
  }
  func.func @transform_21(%arg0: i32) -> (i32, i32, i32) {
    %c0_i32 = arith.constant 0 : i32
    %c0_i32_0 = arith.constant 0 : i32
    %c0_i32_1 = arith.constant 0 : i32
    return %arg0, %c0_i32, %c0_i32_0 : i32, i32, i32
  }
}

module attributes {stable_mosaic.version = 11 : i64} {
  func.func @_vit_stack_kernel(%arg0: i32, %arg1: memref<1x24x32xf32, #tpu.memory_space<vmem>>, %arg2: memref<1x24x32xf32, #tpu.memory_space<vmem>>, %arg3: memref<1x1x32xf32, #tpu.memory_space<vmem>>, %arg4: memref<1x1x32xf32, #tpu.memory_space<vmem>>, %arg5: memref<1x32x32xf32, #tpu.memory_space<vmem>>, %arg6: memref<1x1x32xf32, #tpu.memory_space<vmem>>, %arg7: memref<1x32x32xf32, #tpu.memory_space<vmem>>, %arg8: memref<1x1x32xf32, #tpu.memory_space<vmem>>, %arg9: memref<1x32x32xf32, #tpu.memory_space<vmem>>, %arg10: memref<1x1x32xf32, #tpu.memory_space<vmem>>, %arg11: memref<1x32x32xf32, #tpu.memory_space<vmem>>, %arg12: memref<1x1x32xf32, #tpu.memory_space<vmem>>, %arg13: memref<1x1x32xf32, #tpu.memory_space<vmem>>, %arg14: memref<1x1x32xf32, #tpu.memory_space<vmem>>, %arg15: memref<1x32x128xf32, #tpu.memory_space<vmem>>, %arg16: memref<1x1x128xf32, #tpu.memory_space<vmem>>, %arg17: memref<1x128x32xf32, #tpu.memory_space<vmem>>, %arg18: memref<1x1x32xf32, #tpu.memory_space<vmem>>, %arg19: memref<1x32xf32, #tpu.memory_space<vmem>>, %arg20: memref<1x32xf32, #tpu.memory_space<vmem>>, %arg21: memref<32x48xf32, #tpu.memory_space<vmem>>, %arg22: memref<1x48xf32, #tpu.memory_space<vmem>>, %arg23: memref<1x24x48xf32, #tpu.memory_space<vmem>>) attributes {dimension_semantics = [#tpu.dimension_semantics<parallel>], iteration_bounds = array<i64: 2>, scalar_prefetch = 0 : i64, scratch_operands = 0 : i64, tpu.core_type = #tpu.core_type<tc>, window_params = [{transform_indices = @transform_0, window_bounds = array<i64: 1, 24, 32>}, {pipeline_mode = #tpu.pipeline_mode<synchronous>, transform_indices = @transform_1, window_bounds = array<i64: 1, 24, 32>}, {pipeline_mode = #tpu.pipeline_mode<synchronous>, transform_indices = @transform_2, window_bounds = array<i64: 1, 1, 32>}, {pipeline_mode = #tpu.pipeline_mode<synchronous>, transform_indices = @transform_3, window_bounds = array<i64: 1, 1, 32>}, {pipeline_mode = #tpu.pipeline_mode<synchronous>, transform_indices = @transform_4, window_bounds = array<i64: 1, 32, 32>}, {pipeline_mode = #tpu.pipeline_mode<synchronous>, transform_indices = @transform_5, window_bounds = array<i64: 1, 1, 32>}, {pipeline_mode = #tpu.pipeline_mode<synchronous>, transform_indices = @transform_6, window_bounds = array<i64: 1, 32, 32>}, {pipeline_mode = #tpu.pipeline_mode<synchronous>, transform_indices = @transform_7, window_bounds = array<i64: 1, 1, 32>}, {pipeline_mode = #tpu.pipeline_mode<synchronous>, transform_indices = @transform_8, window_bounds = array<i64: 1, 32, 32>}, {pipeline_mode = #tpu.pipeline_mode<synchronous>, transform_indices = @transform_9, window_bounds = array<i64: 1, 1, 32>}, {pipeline_mode = #tpu.pipeline_mode<synchronous>, transform_indices = @transform_10, window_bounds = array<i64: 1, 32, 32>}, {pipeline_mode = #tpu.pipeline_mode<synchronous>, transform_indices = @transform_11, window_bounds = array<i64: 1, 1, 32>}, {pipeline_mode = #tpu.pipeline_mode<synchronous>, transform_indices = @transform_12, window_bounds = array<i64: 1, 1, 32>}, {pipeline_mode = #tpu.pipeline_mode<synchronous>, transform_indices = @transform_13, window_bounds = array<i64: 1, 1, 32>}, {pipeline_mode = #tpu.pipeline_mode<synchronous>, transform_indices = @transform_14, window_bounds = array<i64: 1, 32, 128>}, {pipeline_mode = #tpu.pipeline_mode<synchronous>, transform_indices = @transform_15, window_bounds = array<i64: 1, 1, 128>}, {pipeline_mode = #tpu.pipeline_mode<synchronous>, transform_indices = @transform_16, window_bounds = array<i64: 1, 128, 32>}, {pipeline_mode = #tpu.pipeline_mode<synchronous>, transform_indices = @transform_17, window_bounds = array<i64: 1, 1, 32>}, {pipeline_mode = #tpu.pipeline_mode<synchronous>, transform_indices = @transform_18, window_bounds = array<i64: 1, 32>}, {pipeline_mode = #tpu.pipeline_mode<synchronous>, transform_indices = @transform_19, window_bounds = array<i64: 1, 32>}, {pipeline_mode = #tpu.pipeline_mode<synchronous>, transform_indices = @transform_20, window_bounds = array<i64: 32, 48>}, {pipeline_mode = #tpu.pipeline_mode<synchronous>, transform_indices = @transform_21, window_bounds = array<i64: 1, 48>}, {transform_indices = @transform_22, window_bounds = array<i64: 1, 24, 48>}]} {
    %c0 = arith.constant 0 : index
    %c0_0 = arith.constant 0 : index
    %c0_1 = arith.constant 0 : index
    %0 = vector.load %arg1[%c0, %c0_0, %c0_1] : memref<1x24x32xf32, #tpu.memory_space<vmem>>, vector<1x24x32xf32>
    %1 = vector.shape_cast %0 : vector<1x24x32xf32> to vector<24x32xf32>
    %c0_2 = arith.constant 0 : index
    %c0_3 = arith.constant 0 : index
    %c0_4 = arith.constant 0 : index
    %2 = vector.load %arg2[%c0_2, %c0_3, %c0_4] : memref<1x24x32xf32, #tpu.memory_space<vmem>>, vector<1x24x32xf32>
    %3 = vector.shape_cast %2 : vector<1x24x32xf32> to vector<24x32xf32>
    %4 = arith.addf %1, %3 : vector<24x32xf32>
    %5 = tpu.iota {dimensions = array<i32: 1>} : vector<24x24xi32>
    %c17_i32 = arith.constant 17 : i32
    %6 = vector.broadcast %c17_i32 : i32 to vector<24x24xi32>
    %7 = arith.cmpi slt, %5, %6 : vector<24x24xi32>
    %cst = arith.constant 0.000000e+00 : f32
    %cst_5 = arith.constant -1.000000e+30 : f32
    %8 = vector.broadcast %cst : f32 to vector<24x24xf32>
    %9 = vector.broadcast %cst_5 : f32 to vector<24x24xf32>
    %10 = arith.select %7, %8, %9 : vector<24x24xi1>, vector<24x24xf32>
    %11 = tpu.iota {dimensions = array<i32: 1>} : vector<24x32xi32>
    %c0_i32 = arith.constant 0 : i32
    %12 = vector.broadcast %c0_i32 : i32 to vector<24x32xi32>
    %13 = arith.cmpi sge, %11, %12 : vector<24x32xi32>
    %c8_i32 = arith.constant 8 : i32
    %14 = vector.broadcast %c8_i32 : i32 to vector<24x32xi32>
    %15 = arith.cmpi slt, %11, %14 : vector<24x32xi32>
    %16 = arith.andi %13, %15 : vector<24x32xi1>
    %cst_6 = arith.constant 1.000000e+00 : f32
    %cst_7 = arith.constant 0.000000e+00 : f32
    %17 = vector.broadcast %cst_6 : f32 to vector<24x32xf32>
    %18 = vector.broadcast %cst_7 : f32 to vector<24x32xf32>
    %19 = arith.select %16, %17, %18 : vector<24x32xi1>, vector<24x32xf32>
    %c8_i32_8 = arith.constant 8 : i32
    %20 = vector.broadcast %c8_i32_8 : i32 to vector<24x32xi32>
    %21 = arith.cmpi sge, %11, %20 : vector<24x32xi32>
    %c16_i32 = arith.constant 16 : i32
    %22 = vector.broadcast %c16_i32 : i32 to vector<24x32xi32>
    %23 = arith.cmpi slt, %11, %22 : vector<24x32xi32>
    %24 = arith.andi %21, %23 : vector<24x32xi1>
    %cst_9 = arith.constant 1.000000e+00 : f32
    %cst_10 = arith.constant 0.000000e+00 : f32
    %25 = vector.broadcast %cst_9 : f32 to vector<24x32xf32>
    %26 = vector.broadcast %cst_10 : f32 to vector<24x32xf32>
    %27 = arith.select %24, %25, %26 : vector<24x32xi1>, vector<24x32xf32>
    %c16_i32_11 = arith.constant 16 : i32
    %28 = vector.broadcast %c16_i32_11 : i32 to vector<24x32xi32>
    %29 = arith.cmpi sge, %11, %28 : vector<24x32xi32>
    %c24_i32 = arith.constant 24 : i32
    %30 = vector.broadcast %c24_i32 : i32 to vector<24x32xi32>
    %31 = arith.cmpi slt, %11, %30 : vector<24x32xi32>
    %32 = arith.andi %29, %31 : vector<24x32xi1>
    %cst_12 = arith.constant 1.000000e+00 : f32
    %cst_13 = arith.constant 0.000000e+00 : f32
    %33 = vector.broadcast %cst_12 : f32 to vector<24x32xf32>
    %34 = vector.broadcast %cst_13 : f32 to vector<24x32xf32>
    %35 = arith.select %32, %33, %34 : vector<24x32xi1>, vector<24x32xf32>
    %c24_i32_14 = arith.constant 24 : i32
    %36 = vector.broadcast %c24_i32_14 : i32 to vector<24x32xi32>
    %37 = arith.cmpi sge, %11, %36 : vector<24x32xi32>
    %c32_i32 = arith.constant 32 : i32
    %38 = vector.broadcast %c32_i32 : i32 to vector<24x32xi32>
    %39 = arith.cmpi slt, %11, %38 : vector<24x32xi32>
    %40 = arith.andi %37, %39 : vector<24x32xi1>
    %cst_15 = arith.constant 1.000000e+00 : f32
    %cst_16 = arith.constant 0.000000e+00 : f32
    %41 = vector.broadcast %cst_15 : f32 to vector<24x32xf32>
    %42 = vector.broadcast %cst_16 : f32 to vector<24x32xf32>
    %43 = arith.select %40, %41, %42 : vector<24x32xi1>, vector<24x32xf32>
    %c0_17 = arith.constant 0 : index
    %c0_18 = arith.constant 0 : index
    %c0_19 = arith.constant 0 : index
    %44 = vector.load %arg3[%c0_17, %c0_18, %c0_19] : memref<1x1x32xf32, #tpu.memory_space<vmem>>, vector<1x1x32xf32>
    %45 = vector.shape_cast %44 : vector<1x1x32xf32> to vector<1x32xf32>
    %c0_20 = arith.constant 0 : index
    %c0_21 = arith.constant 0 : index
    %c0_22 = arith.constant 0 : index
    %46 = vector.load %arg4[%c0_20, %c0_21, %c0_22] : memref<1x1x32xf32, #tpu.memory_space<vmem>>, vector<1x1x32xf32>
    %47 = vector.shape_cast %46 : vector<1x1x32xf32> to vector<1x32xf32>
    %c0_23 = arith.constant 0 : index
    %c0_24 = arith.constant 0 : index
    %c0_25 = arith.constant 0 : index
    %48 = vector.load %arg5[%c0_23, %c0_24, %c0_25] : memref<1x32x32xf32, #tpu.memory_space<vmem>>, vector<1x32x32xf32>
    %49 = vector.shape_cast %48 : vector<1x32x32xf32> to vector<32x32xf32>
    %c0_26 = arith.constant 0 : index
    %c0_27 = arith.constant 0 : index
    %c0_28 = arith.constant 0 : index
    %50 = vector.load %arg6[%c0_26, %c0_27, %c0_28] : memref<1x1x32xf32, #tpu.memory_space<vmem>>, vector<1x1x32xf32>
    %51 = vector.shape_cast %50 : vector<1x1x32xf32> to vector<1x32xf32>
    %c0_29 = arith.constant 0 : index
    %c0_30 = arith.constant 0 : index
    %c0_31 = arith.constant 0 : index
    %52 = vector.load %arg7[%c0_29, %c0_30, %c0_31] : memref<1x32x32xf32, #tpu.memory_space<vmem>>, vector<1x32x32xf32>
    %53 = vector.shape_cast %52 : vector<1x32x32xf32> to vector<32x32xf32>
    %c0_32 = arith.constant 0 : index
    %c0_33 = arith.constant 0 : index
    %c0_34 = arith.constant 0 : index
    %54 = vector.load %arg8[%c0_32, %c0_33, %c0_34] : memref<1x1x32xf32, #tpu.memory_space<vmem>>, vector<1x1x32xf32>
    %55 = vector.shape_cast %54 : vector<1x1x32xf32> to vector<1x32xf32>
    %c0_35 = arith.constant 0 : index
    %c0_36 = arith.constant 0 : index
    %c0_37 = arith.constant 0 : index
    %56 = vector.load %arg9[%c0_35, %c0_36, %c0_37] : memref<1x32x32xf32, #tpu.memory_space<vmem>>, vector<1x32x32xf32>
    %57 = vector.shape_cast %56 : vector<1x32x32xf32> to vector<32x32xf32>
    %c0_38 = arith.constant 0 : index
    %c0_39 = arith.constant 0 : index
    %c0_40 = arith.constant 0 : index
    %58 = vector.load %arg10[%c0_38, %c0_39, %c0_40] : memref<1x1x32xf32, #tpu.memory_space<vmem>>, vector<1x1x32xf32>
    %59 = vector.shape_cast %58 : vector<1x1x32xf32> to vector<1x32xf32>
    %c0_41 = arith.constant 0 : index
    %c0_42 = arith.constant 0 : index
    %c0_43 = arith.constant 0 : index
    %60 = vector.load %arg11[%c0_41, %c0_42, %c0_43] : memref<1x32x32xf32, #tpu.memory_space<vmem>>, vector<1x32x32xf32>
    %61 = vector.shape_cast %60 : vector<1x32x32xf32> to vector<32x32xf32>
    %c0_44 = arith.constant 0 : index
    %c0_45 = arith.constant 0 : index
    %c0_46 = arith.constant 0 : index
    %62 = vector.load %arg12[%c0_44, %c0_45, %c0_46] : memref<1x1x32xf32, #tpu.memory_space<vmem>>, vector<1x1x32xf32>
    %63 = vector.shape_cast %62 : vector<1x1x32xf32> to vector<1x32xf32>
    %c0_47 = arith.constant 0 : index
    %c0_48 = arith.constant 0 : index
    %c0_49 = arith.constant 0 : index
    %64 = vector.load %arg13[%c0_47, %c0_48, %c0_49] : memref<1x1x32xf32, #tpu.memory_space<vmem>>, vector<1x1x32xf32>
    %65 = vector.shape_cast %64 : vector<1x1x32xf32> to vector<1x32xf32>
    %c0_50 = arith.constant 0 : index
    %c0_51 = arith.constant 0 : index
    %c0_52 = arith.constant 0 : index
    %66 = vector.load %arg14[%c0_50, %c0_51, %c0_52] : memref<1x1x32xf32, #tpu.memory_space<vmem>>, vector<1x1x32xf32>
    %67 = vector.shape_cast %66 : vector<1x1x32xf32> to vector<1x32xf32>
    %c0_53 = arith.constant 0 : index
    %c0_54 = arith.constant 0 : index
    %c0_55 = arith.constant 0 : index
    %68 = vector.load %arg15[%c0_53, %c0_54, %c0_55] : memref<1x32x128xf32, #tpu.memory_space<vmem>>, vector<1x32x128xf32>
    %69 = vector.shape_cast %68 : vector<1x32x128xf32> to vector<32x128xf32>
    %c0_56 = arith.constant 0 : index
    %c0_57 = arith.constant 0 : index
    %c0_58 = arith.constant 0 : index
    %70 = vector.load %arg16[%c0_56, %c0_57, %c0_58] : memref<1x1x128xf32, #tpu.memory_space<vmem>>, vector<1x1x128xf32>
    %71 = vector.shape_cast %70 : vector<1x1x128xf32> to vector<1x128xf32>
    %c0_59 = arith.constant 0 : index
    %c0_60 = arith.constant 0 : index
    %c0_61 = arith.constant 0 : index
    %72 = vector.load %arg17[%c0_59, %c0_60, %c0_61] : memref<1x128x32xf32, #tpu.memory_space<vmem>>, vector<1x128x32xf32>
    %73 = vector.shape_cast %72 : vector<1x128x32xf32> to vector<128x32xf32>
    %c0_62 = arith.constant 0 : index
    %c0_63 = arith.constant 0 : index
    %c0_64 = arith.constant 0 : index
    %74 = vector.load %arg18[%c0_62, %c0_63, %c0_64] : memref<1x1x32xf32, #tpu.memory_space<vmem>>, vector<1x1x32xf32>
    %75 = vector.shape_cast %74 : vector<1x1x32xf32> to vector<1x32xf32>
    %cst_65 = arith.constant dense<0.000000e+00> : vector<24xf32>
    %76 = vector.multi_reduction <add>, %4, %cst_65 [1] : vector<24x32xf32> to vector<24xf32>
    %77 = vector.shape_cast %76 : vector<24xf32> to vector<24x1xf32>
    %cst_66 = arith.constant 3.200000e+01 : f32
    %78 = vector.broadcast %cst_66 : f32 to vector<24x1xf32>
    %79 = arith.divf %77, %78 : vector<24x1xf32>
    %80 = vector.broadcast %79 : vector<24x1xf32> to vector<24x32xf32>
    %81 = arith.subf %4, %80 : vector<24x32xf32>
    %82 = arith.mulf %81, %81 : vector<24x32xf32>
    %cst_67 = arith.constant dense<0.000000e+00> : vector<24xf32>
    %83 = vector.multi_reduction <add>, %82, %cst_67 [1] : vector<24x32xf32> to vector<24xf32>
    %84 = vector.shape_cast %83 : vector<24xf32> to vector<24x1xf32>
    %cst_68 = arith.constant 3.200000e+01 : f32
    %85 = vector.broadcast %cst_68 : f32 to vector<24x1xf32>
    %86 = arith.divf %84, %85 : vector<24x1xf32>
    %cst_69 = arith.constant 9.99999974E-6 : f32
    %87 = vector.broadcast %cst_69 : f32 to vector<24x1xf32>
    %88 = arith.addf %86, %87 : vector<24x1xf32>
    %89 = math.rsqrt %88 : vector<24x1xf32>
    %90 = vector.broadcast %89 : vector<24x1xf32> to vector<24x32xf32>
    %91 = arith.mulf %81, %90 : vector<24x32xf32>
    %92 = vector.broadcast %45 : vector<1x32xf32> to vector<24x32xf32>
    %93 = arith.mulf %91, %92 : vector<24x32xf32>
    %94 = vector.broadcast %47 : vector<1x32xf32> to vector<24x32xf32>
    %95 = arith.addf %93, %94 : vector<24x32xf32>
    %cst_70 = arith.constant dense<0.000000e+00> : vector<24x32xf32>
    %96 = tpu.matmul %95, %49, %cst_70 {dimension_numbers = #tpu.dot_dimension_numbers<[1], [0], [0], [1], [0, 0, 1, 1], [], []>} : vector<24x32xf32>, vector<32x32xf32>, vector<24x32xf32> -> vector<24x32xf32>
    %97 = vector.broadcast %51 : vector<1x32xf32> to vector<24x32xf32>
    %98 = arith.addf %96, %97 : vector<24x32xf32>
    %cst_71 = arith.constant dense<0.000000e+00> : vector<24x32xf32>
    %99 = tpu.matmul %95, %53, %cst_71 {dimension_numbers = #tpu.dot_dimension_numbers<[1], [0], [0], [1], [0, 0, 1, 1], [], []>} : vector<24x32xf32>, vector<32x32xf32>, vector<24x32xf32> -> vector<24x32xf32>
    %100 = vector.broadcast %55 : vector<1x32xf32> to vector<24x32xf32>
    %101 = arith.addf %99, %100 : vector<24x32xf32>
    %cst_72 = arith.constant dense<0.000000e+00> : vector<24x32xf32>
    %102 = tpu.matmul %95, %57, %cst_72 {dimension_numbers = #tpu.dot_dimension_numbers<[1], [0], [0], [1], [0, 0, 1, 1], [], []>} : vector<24x32xf32>, vector<32x32xf32>, vector<24x32xf32> -> vector<24x32xf32>
    %103 = vector.broadcast %59 : vector<1x32xf32> to vector<24x32xf32>
    %104 = arith.addf %102, %103 : vector<24x32xf32>
    %cst_73 = arith.constant 0.000000e+00 : f32
    %105 = vector.broadcast %cst_73 : f32 to vector<24x32xf32>
    %106 = arith.mulf %98, %19 : vector<24x32xf32>
    %cst_74 = arith.constant dense<0.000000e+00> : vector<24x24xf32>
    %107 = tpu.matmul %106, %101, %cst_74 {dimension_numbers = #tpu.dot_dimension_numbers<[1], [1], [0], [0], [0, 0, 1, 0], [], []>} : vector<24x32xf32>, vector<24x32xf32>, vector<24x24xf32> -> vector<24x24xf32>
    %cst_75 = arith.constant 0.353553385 : f32
    %108 = vector.broadcast %cst_75 : f32 to vector<24x24xf32>
    %109 = arith.mulf %107, %108 : vector<24x24xf32>
    %110 = arith.addf %109, %10 : vector<24x24xf32>
    %cst_76 = arith.constant dense<0xFF800000> : vector<24xf32>
    %111 = vector.multi_reduction <maximumf>, %110, %cst_76 [1] : vector<24x24xf32> to vector<24xf32>
    %112 = vector.shape_cast %111 : vector<24xf32> to vector<24x1xf32>
    %113 = vector.broadcast %112 : vector<24x1xf32> to vector<24x24xf32>
    %114 = arith.subf %110, %113 : vector<24x24xf32>
    %115 = math.exp %114 : vector<24x24xf32>
    %cst_77 = arith.constant dense<0.000000e+00> : vector<24xf32>
    %116 = vector.multi_reduction <add>, %115, %cst_77 [1] : vector<24x24xf32> to vector<24xf32>
    %117 = vector.shape_cast %116 : vector<24xf32> to vector<24x1xf32>
    %118 = tpu.reciprocal %117 {approx = true} : vector<24x1xf32> -> vector<24x1xf32>
    %119 = vector.broadcast %118 : vector<24x1xf32> to vector<24x24xf32>
    %120 = arith.mulf %115, %119 : vector<24x24xf32>
    %121 = arith.mulf %104, %19 : vector<24x32xf32>
    %cst_78 = arith.constant dense<0.000000e+00> : vector<24x32xf32>
    %122 = tpu.matmul %120, %121, %cst_78 {dimension_numbers = #tpu.dot_dimension_numbers<[1], [0], [0], [1], [0, 0, 1, 1], [], []>} : vector<24x24xf32>, vector<24x32xf32>, vector<24x32xf32> -> vector<24x32xf32>
    %123 = arith.addf %105, %122 : vector<24x32xf32>
    %124 = arith.mulf %98, %27 : vector<24x32xf32>
    %cst_79 = arith.constant dense<0.000000e+00> : vector<24x24xf32>
    %125 = tpu.matmul %124, %101, %cst_79 {dimension_numbers = #tpu.dot_dimension_numbers<[1], [1], [0], [0], [0, 0, 1, 0], [], []>} : vector<24x32xf32>, vector<24x32xf32>, vector<24x24xf32> -> vector<24x24xf32>
    %cst_80 = arith.constant 0.353553385 : f32
    %126 = vector.broadcast %cst_80 : f32 to vector<24x24xf32>
    %127 = arith.mulf %125, %126 : vector<24x24xf32>
    %128 = arith.addf %127, %10 : vector<24x24xf32>
    %cst_81 = arith.constant dense<0xFF800000> : vector<24xf32>
    %129 = vector.multi_reduction <maximumf>, %128, %cst_81 [1] : vector<24x24xf32> to vector<24xf32>
    %130 = vector.shape_cast %129 : vector<24xf32> to vector<24x1xf32>
    %131 = vector.broadcast %130 : vector<24x1xf32> to vector<24x24xf32>
    %132 = arith.subf %128, %131 : vector<24x24xf32>
    %133 = math.exp %132 : vector<24x24xf32>
    %cst_82 = arith.constant dense<0.000000e+00> : vector<24xf32>
    %134 = vector.multi_reduction <add>, %133, %cst_82 [1] : vector<24x24xf32> to vector<24xf32>
    %135 = vector.shape_cast %134 : vector<24xf32> to vector<24x1xf32>
    %136 = tpu.reciprocal %135 {approx = true} : vector<24x1xf32> -> vector<24x1xf32>
    %137 = vector.broadcast %136 : vector<24x1xf32> to vector<24x24xf32>
    %138 = arith.mulf %133, %137 : vector<24x24xf32>
    %139 = arith.mulf %104, %27 : vector<24x32xf32>
    %cst_83 = arith.constant dense<0.000000e+00> : vector<24x32xf32>
    %140 = tpu.matmul %138, %139, %cst_83 {dimension_numbers = #tpu.dot_dimension_numbers<[1], [0], [0], [1], [0, 0, 1, 1], [], []>} : vector<24x24xf32>, vector<24x32xf32>, vector<24x32xf32> -> vector<24x32xf32>
    %141 = arith.addf %123, %140 : vector<24x32xf32>
    %142 = arith.mulf %98, %35 : vector<24x32xf32>
    %cst_84 = arith.constant dense<0.000000e+00> : vector<24x24xf32>
    %143 = tpu.matmul %142, %101, %cst_84 {dimension_numbers = #tpu.dot_dimension_numbers<[1], [1], [0], [0], [0, 0, 1, 0], [], []>} : vector<24x32xf32>, vector<24x32xf32>, vector<24x24xf32> -> vector<24x24xf32>
    %cst_85 = arith.constant 0.353553385 : f32
    %144 = vector.broadcast %cst_85 : f32 to vector<24x24xf32>
    %145 = arith.mulf %143, %144 : vector<24x24xf32>
    %146 = arith.addf %145, %10 : vector<24x24xf32>
    %cst_86 = arith.constant dense<0xFF800000> : vector<24xf32>
    %147 = vector.multi_reduction <maximumf>, %146, %cst_86 [1] : vector<24x24xf32> to vector<24xf32>
    %148 = vector.shape_cast %147 : vector<24xf32> to vector<24x1xf32>
    %149 = vector.broadcast %148 : vector<24x1xf32> to vector<24x24xf32>
    %150 = arith.subf %146, %149 : vector<24x24xf32>
    %151 = math.exp %150 : vector<24x24xf32>
    %cst_87 = arith.constant dense<0.000000e+00> : vector<24xf32>
    %152 = vector.multi_reduction <add>, %151, %cst_87 [1] : vector<24x24xf32> to vector<24xf32>
    %153 = vector.shape_cast %152 : vector<24xf32> to vector<24x1xf32>
    %154 = tpu.reciprocal %153 {approx = true} : vector<24x1xf32> -> vector<24x1xf32>
    %155 = vector.broadcast %154 : vector<24x1xf32> to vector<24x24xf32>
    %156 = arith.mulf %151, %155 : vector<24x24xf32>
    %157 = arith.mulf %104, %35 : vector<24x32xf32>
    %cst_88 = arith.constant dense<0.000000e+00> : vector<24x32xf32>
    %158 = tpu.matmul %156, %157, %cst_88 {dimension_numbers = #tpu.dot_dimension_numbers<[1], [0], [0], [1], [0, 0, 1, 1], [], []>} : vector<24x24xf32>, vector<24x32xf32>, vector<24x32xf32> -> vector<24x32xf32>
    %159 = arith.addf %141, %158 : vector<24x32xf32>
    %160 = arith.mulf %98, %43 : vector<24x32xf32>
    %cst_89 = arith.constant dense<0.000000e+00> : vector<24x24xf32>
    %161 = tpu.matmul %160, %101, %cst_89 {dimension_numbers = #tpu.dot_dimension_numbers<[1], [1], [0], [0], [0, 0, 1, 0], [], []>} : vector<24x32xf32>, vector<24x32xf32>, vector<24x24xf32> -> vector<24x24xf32>
    %cst_90 = arith.constant 0.353553385 : f32
    %162 = vector.broadcast %cst_90 : f32 to vector<24x24xf32>
    %163 = arith.mulf %161, %162 : vector<24x24xf32>
    %164 = arith.addf %163, %10 : vector<24x24xf32>
    %cst_91 = arith.constant dense<0xFF800000> : vector<24xf32>
    %165 = vector.multi_reduction <maximumf>, %164, %cst_91 [1] : vector<24x24xf32> to vector<24xf32>
    %166 = vector.shape_cast %165 : vector<24xf32> to vector<24x1xf32>
    %167 = vector.broadcast %166 : vector<24x1xf32> to vector<24x24xf32>
    %168 = arith.subf %164, %167 : vector<24x24xf32>
    %169 = math.exp %168 : vector<24x24xf32>
    %cst_92 = arith.constant dense<0.000000e+00> : vector<24xf32>
    %170 = vector.multi_reduction <add>, %169, %cst_92 [1] : vector<24x24xf32> to vector<24xf32>
    %171 = vector.shape_cast %170 : vector<24xf32> to vector<24x1xf32>
    %172 = tpu.reciprocal %171 {approx = true} : vector<24x1xf32> -> vector<24x1xf32>
    %173 = vector.broadcast %172 : vector<24x1xf32> to vector<24x24xf32>
    %174 = arith.mulf %169, %173 : vector<24x24xf32>
    %175 = arith.mulf %104, %43 : vector<24x32xf32>
    %cst_93 = arith.constant dense<0.000000e+00> : vector<24x32xf32>
    %176 = tpu.matmul %174, %175, %cst_93 {dimension_numbers = #tpu.dot_dimension_numbers<[1], [0], [0], [1], [0, 0, 1, 1], [], []>} : vector<24x24xf32>, vector<24x32xf32>, vector<24x32xf32> -> vector<24x32xf32>
    %177 = arith.addf %159, %176 : vector<24x32xf32>
    %cst_94 = arith.constant dense<0.000000e+00> : vector<24x32xf32>
    %178 = tpu.matmul %177, %61, %cst_94 {dimension_numbers = #tpu.dot_dimension_numbers<[1], [0], [0], [1], [0, 0, 1, 1], [], []>} : vector<24x32xf32>, vector<32x32xf32>, vector<24x32xf32> -> vector<24x32xf32>
    %179 = vector.broadcast %63 : vector<1x32xf32> to vector<24x32xf32>
    %180 = arith.addf %178, %179 : vector<24x32xf32>
    %181 = arith.addf %4, %180 : vector<24x32xf32>
    %cst_95 = arith.constant dense<0.000000e+00> : vector<24xf32>
    %182 = vector.multi_reduction <add>, %181, %cst_95 [1] : vector<24x32xf32> to vector<24xf32>
    %183 = vector.shape_cast %182 : vector<24xf32> to vector<24x1xf32>
    %cst_96 = arith.constant 3.200000e+01 : f32
    %184 = vector.broadcast %cst_96 : f32 to vector<24x1xf32>
    %185 = arith.divf %183, %184 : vector<24x1xf32>
    %186 = vector.broadcast %185 : vector<24x1xf32> to vector<24x32xf32>
    %187 = arith.subf %181, %186 : vector<24x32xf32>
    %188 = arith.mulf %187, %187 : vector<24x32xf32>
    %cst_97 = arith.constant dense<0.000000e+00> : vector<24xf32>
    %189 = vector.multi_reduction <add>, %188, %cst_97 [1] : vector<24x32xf32> to vector<24xf32>
    %190 = vector.shape_cast %189 : vector<24xf32> to vector<24x1xf32>
    %cst_98 = arith.constant 3.200000e+01 : f32
    %191 = vector.broadcast %cst_98 : f32 to vector<24x1xf32>
    %192 = arith.divf %190, %191 : vector<24x1xf32>
    %cst_99 = arith.constant 9.99999974E-6 : f32
    %193 = vector.broadcast %cst_99 : f32 to vector<24x1xf32>
    %194 = arith.addf %192, %193 : vector<24x1xf32>
    %195 = math.rsqrt %194 : vector<24x1xf32>
    %196 = vector.broadcast %195 : vector<24x1xf32> to vector<24x32xf32>
    %197 = arith.mulf %187, %196 : vector<24x32xf32>
    %198 = vector.broadcast %65 : vector<1x32xf32> to vector<24x32xf32>
    %199 = arith.mulf %197, %198 : vector<24x32xf32>
    %200 = vector.broadcast %67 : vector<1x32xf32> to vector<24x32xf32>
    %201 = arith.addf %199, %200 : vector<24x32xf32>
    %cst_100 = arith.constant dense<0.000000e+00> : vector<24x128xf32>
    %202 = tpu.matmul %201, %69, %cst_100 {dimension_numbers = #tpu.dot_dimension_numbers<[1], [0], [0], [1], [0, 0, 1, 1], [], []>} : vector<24x32xf32>, vector<32x128xf32>, vector<24x128xf32> -> vector<24x128xf32>
    %203 = vector.broadcast %71 : vector<1x128xf32> to vector<24x128xf32>
    %204 = arith.addf %202, %203 : vector<24x128xf32>
    %cst_101 = arith.constant 5.000000e-01 : f32
    %205 = vector.broadcast %cst_101 : f32 to vector<24x128xf32>
    %206 = arith.mulf %205, %204 : vector<24x128xf32>
    %cst_102 = arith.constant 0.707106769 : f32
    %207 = vector.broadcast %cst_102 : f32 to vector<24x128xf32>
    %208 = arith.mulf %204, %207 : vector<24x128xf32>
    %cst_103 = arith.constant 0.000000e+00 : f32
    %209 = vector.broadcast %cst_103 : f32 to vector<24x128xf32>
    %210 = arith.cmpf oge, %208, %209 : vector<24x128xf32>
    %cst_104 = arith.constant 1.000000e+00 : f32
    %cst_105 = arith.constant -1.000000e+00 : f32
    %211 = vector.broadcast %cst_104 : f32 to vector<24x128xf32>
    %212 = vector.broadcast %cst_105 : f32 to vector<24x128xf32>
    %213 = arith.select %210, %211, %212 : vector<24x128xi1>, vector<24x128xf32>
    %214 = math.absf %208 : vector<24x128xf32>
    %cst_106 = arith.constant 0.327591091 : f32
    %215 = vector.broadcast %cst_106 : f32 to vector<24x128xf32>
    %216 = arith.mulf %215, %214 : vector<24x128xf32>
    %cst_107 = arith.constant 1.000000e+00 : f32
    %217 = vector.broadcast %cst_107 : f32 to vector<24x128xf32>
    %218 = arith.addf %217, %216 : vector<24x128xf32>
    %cst_108 = arith.constant 1.000000e+00 : f32
    %219 = vector.broadcast %cst_108 : f32 to vector<24x128xf32>
    %220 = arith.divf %219, %218 : vector<24x128xf32>
    %cst_109 = arith.constant 1.06140542 : f32
    %221 = vector.broadcast %cst_109 : f32 to vector<24x128xf32>
    %222 = arith.mulf %221, %220 : vector<24x128xf32>
    %cst_110 = arith.constant -1.45315206 : f32
    %223 = vector.broadcast %cst_110 : f32 to vector<24x128xf32>
    %224 = arith.addf %222, %223 : vector<24x128xf32>
    %225 = arith.mulf %224, %220 : vector<24x128xf32>
    %cst_111 = arith.constant 1.42141378 : f32
    %226 = vector.broadcast %cst_111 : f32 to vector<24x128xf32>
    %227 = arith.addf %225, %226 : vector<24x128xf32>
    %228 = arith.mulf %227, %220 : vector<24x128xf32>
    %cst_112 = arith.constant -0.284496725 : f32
    %229 = vector.broadcast %cst_112 : f32 to vector<24x128xf32>
    %230 = arith.addf %228, %229 : vector<24x128xf32>
    %231 = arith.mulf %230, %220 : vector<24x128xf32>
    %cst_113 = arith.constant 0.254829586 : f32
    %232 = vector.broadcast %cst_113 : f32 to vector<24x128xf32>
    %233 = arith.addf %231, %232 : vector<24x128xf32>
    %234 = arith.mulf %233, %220 : vector<24x128xf32>
    %cst_114 = arith.constant 0.000000e+00 : f32
    %235 = vector.broadcast %cst_114 : f32 to vector<24x128xf32>
    %236 = arith.subf %235, %214 : vector<24x128xf32>
    %237 = arith.mulf %236, %214 : vector<24x128xf32>
    %238 = math.exp %237 : vector<24x128xf32>
    %239 = arith.mulf %234, %238 : vector<24x128xf32>
    %cst_115 = arith.constant 1.000000e+00 : f32
    %240 = vector.broadcast %cst_115 : f32 to vector<24x128xf32>
    %241 = arith.subf %240, %239 : vector<24x128xf32>
    %242 = arith.mulf %213, %241 : vector<24x128xf32>
    %cst_116 = arith.constant 1.000000e+00 : f32
    %243 = vector.broadcast %cst_116 : f32 to vector<24x128xf32>
    %244 = arith.addf %243, %242 : vector<24x128xf32>
    %245 = arith.mulf %206, %244 : vector<24x128xf32>
    %cst_117 = arith.constant dense<0.000000e+00> : vector<24x32xf32>
    %246 = tpu.matmul %245, %73, %cst_117 {dimension_numbers = #tpu.dot_dimension_numbers<[1], [0], [0], [1], [0, 0, 1, 1], [], []>} : vector<24x128xf32>, vector<128x32xf32>, vector<24x32xf32> -> vector<24x32xf32>
    %247 = vector.broadcast %75 : vector<1x32xf32> to vector<24x32xf32>
    %248 = arith.addf %246, %247 : vector<24x32xf32>
    %249 = arith.addf %181, %248 : vector<24x32xf32>
    %c0_118 = arith.constant 0 : index
    %c0_119 = arith.constant 0 : index
    %250 = vector.load %arg19[%c0_118, %c0_119] : memref<1x32xf32, #tpu.memory_space<vmem>>, vector<1x32xf32>
    %c0_120 = arith.constant 0 : index
    %c0_121 = arith.constant 0 : index
    %251 = vector.load %arg20[%c0_120, %c0_121] : memref<1x32xf32, #tpu.memory_space<vmem>>, vector<1x32xf32>
    %cst_122 = arith.constant dense<0.000000e+00> : vector<24xf32>
    %252 = vector.multi_reduction <add>, %249, %cst_122 [1] : vector<24x32xf32> to vector<24xf32>
    %253 = vector.shape_cast %252 : vector<24xf32> to vector<24x1xf32>
    %cst_123 = arith.constant 3.200000e+01 : f32
    %254 = vector.broadcast %cst_123 : f32 to vector<24x1xf32>
    %255 = arith.divf %253, %254 : vector<24x1xf32>
    %256 = vector.broadcast %255 : vector<24x1xf32> to vector<24x32xf32>
    %257 = arith.subf %249, %256 : vector<24x32xf32>
    %258 = arith.mulf %257, %257 : vector<24x32xf32>
    %cst_124 = arith.constant dense<0.000000e+00> : vector<24xf32>
    %259 = vector.multi_reduction <add>, %258, %cst_124 [1] : vector<24x32xf32> to vector<24xf32>
    %260 = vector.shape_cast %259 : vector<24xf32> to vector<24x1xf32>
    %cst_125 = arith.constant 3.200000e+01 : f32
    %261 = vector.broadcast %cst_125 : f32 to vector<24x1xf32>
    %262 = arith.divf %260, %261 : vector<24x1xf32>
    %cst_126 = arith.constant 9.99999974E-6 : f32
    %263 = vector.broadcast %cst_126 : f32 to vector<24x1xf32>
    %264 = arith.addf %262, %263 : vector<24x1xf32>
    %265 = math.rsqrt %264 : vector<24x1xf32>
    %266 = vector.broadcast %265 : vector<24x1xf32> to vector<24x32xf32>
    %267 = arith.mulf %257, %266 : vector<24x32xf32>
    %268 = vector.broadcast %250 : vector<1x32xf32> to vector<24x32xf32>
    %269 = arith.mulf %267, %268 : vector<24x32xf32>
    %270 = vector.broadcast %251 : vector<1x32xf32> to vector<24x32xf32>
    %271 = arith.addf %269, %270 : vector<24x32xf32>
    %c0_127 = arith.constant 0 : index
    %c0_128 = arith.constant 0 : index
    %272 = vector.load %arg21[%c0_127, %c0_128] : memref<32x48xf32, #tpu.memory_space<vmem>>, vector<32x48xf32>
    %cst_129 = arith.constant dense<0.000000e+00> : vector<24x48xf32>
    %273 = tpu.matmul %271, %272, %cst_129 {dimension_numbers = #tpu.dot_dimension_numbers<[1], [0], [0], [1], [0, 0, 1, 1], [], []>} : vector<24x32xf32>, vector<32x48xf32>, vector<24x48xf32> -> vector<24x48xf32>
    %c0_130 = arith.constant 0 : index
    %c0_131 = arith.constant 0 : index
    %274 = vector.load %arg22[%c0_130, %c0_131] : memref<1x48xf32, #tpu.memory_space<vmem>>, vector<1x48xf32>
    %275 = vector.broadcast %274 : vector<1x48xf32> to vector<24x48xf32>
    %276 = arith.addf %273, %275 : vector<24x48xf32>
    %c0_132 = arith.constant 0 : index
    %c0_133 = arith.constant 0 : index
    %c0_134 = arith.constant 0 : index
    %277 = vector.load %arg23[%c0_132, %c0_133, %c0_134] : memref<1x24x48xf32, #tpu.memory_space<vmem>>, vector<1x24x48xf32>
    %278 = vector.shape_cast %277 : vector<1x24x48xf32> to vector<24x48xf32>
    %279 = vector.shape_cast %276 : vector<24x48xf32> to vector<1x24x48xf32>
    tpu.vector_store %arg23[%c0_132, %c0_133, %c0_134], %279 {strides = array<i32>} : memref<1x24x48xf32, #tpu.memory_space<vmem>>, vector<1x24x48xf32>,
    return
  }
  func.func @transform_0(%arg0: i32) -> (i32, i32, i32) {
    %c0_i32 = arith.constant 0 : i32
    %c0_i32_0 = arith.constant 0 : i32
    %c0_i32_1 = arith.constant 0 : i32
    return %arg0, %c0_i32, %c0_i32_0 : i32, i32, i32
  }
  func.func @transform_1(%arg0: i32) -> (i32, i32, i32) {
    %c0_i32 = arith.constant 0 : i32
    %c0_i32_0 = arith.constant 0 : i32
    %c0_i32_1 = arith.constant 0 : i32
    %c0_i32_2 = arith.constant 0 : i32
    return %c0_i32, %c0_i32_0, %c0_i32_1 : i32, i32, i32
  }
  func.func @transform_2(%arg0: i32) -> (i32, i32, i32) {
    %c0_i32 = arith.constant 0 : i32
    %c0_i32_0 = arith.constant 0 : i32
    %c0_i32_1 = arith.constant 0 : i32
    %c0_i32_2 = arith.constant 0 : i32
    return %c0_i32, %c0_i32_0, %c0_i32_1 : i32, i32, i32
  }
  func.func @transform_3(%arg0: i32) -> (i32, i32, i32) {
    %c0_i32 = arith.constant 0 : i32
    %c0_i32_0 = arith.constant 0 : i32
    %c0_i32_1 = arith.constant 0 : i32
    %c0_i32_2 = arith.constant 0 : i32
    return %c0_i32, %c0_i32_0, %c0_i32_1 : i32, i32, i32
  }
  func.func @transform_4(%arg0: i32) -> (i32, i32, i32) {
    %c0_i32 = arith.constant 0 : i32
    %c0_i32_0 = arith.constant 0 : i32
    %c0_i32_1 = arith.constant 0 : i32
    %c0_i32_2 = arith.constant 0 : i32
    return %c0_i32, %c0_i32_0, %c0_i32_1 : i32, i32, i32
  }
  func.func @transform_5(%arg0: i32) -> (i32, i32, i32) {
    %c0_i32 = arith.constant 0 : i32
    %c0_i32_0 = arith.constant 0 : i32
    %c0_i32_1 = arith.constant 0 : i32
    %c0_i32_2 = arith.constant 0 : i32
    return %c0_i32, %c0_i32_0, %c0_i32_1 : i32, i32, i32
  }
  func.func @transform_6(%arg0: i32) -> (i32, i32, i32) {
    %c0_i32 = arith.constant 0 : i32
    %c0_i32_0 = arith.constant 0 : i32
    %c0_i32_1 = arith.constant 0 : i32
    %c0_i32_2 = arith.constant 0 : i32
    return %c0_i32, %c0_i32_0, %c0_i32_1 : i32, i32, i32
  }
  func.func @transform_7(%arg0: i32) -> (i32, i32, i32) {
    %c0_i32 = arith.constant 0 : i32
    %c0_i32_0 = arith.constant 0 : i32
    %c0_i32_1 = arith.constant 0 : i32
    %c0_i32_2 = arith.constant 0 : i32
    return %c0_i32, %c0_i32_0, %c0_i32_1 : i32, i32, i32
  }
  func.func @transform_8(%arg0: i32) -> (i32, i32, i32) {
    %c0_i32 = arith.constant 0 : i32
    %c0_i32_0 = arith.constant 0 : i32
    %c0_i32_1 = arith.constant 0 : i32
    %c0_i32_2 = arith.constant 0 : i32
    return %c0_i32, %c0_i32_0, %c0_i32_1 : i32, i32, i32
  }
  func.func @transform_9(%arg0: i32) -> (i32, i32, i32) {
    %c0_i32 = arith.constant 0 : i32
    %c0_i32_0 = arith.constant 0 : i32
    %c0_i32_1 = arith.constant 0 : i32
    %c0_i32_2 = arith.constant 0 : i32
    return %c0_i32, %c0_i32_0, %c0_i32_1 : i32, i32, i32
  }
  func.func @transform_10(%arg0: i32) -> (i32, i32, i32) {
    %c0_i32 = arith.constant 0 : i32
    %c0_i32_0 = arith.constant 0 : i32
    %c0_i32_1 = arith.constant 0 : i32
    %c0_i32_2 = arith.constant 0 : i32
    return %c0_i32, %c0_i32_0, %c0_i32_1 : i32, i32, i32
  }
  func.func @transform_11(%arg0: i32) -> (i32, i32, i32) {
    %c0_i32 = arith.constant 0 : i32
    %c0_i32_0 = arith.constant 0 : i32
    %c0_i32_1 = arith.constant 0 : i32
    %c0_i32_2 = arith.constant 0 : i32
    return %c0_i32, %c0_i32_0, %c0_i32_1 : i32, i32, i32
  }
  func.func @transform_12(%arg0: i32) -> (i32, i32, i32) {
    %c0_i32 = arith.constant 0 : i32
    %c0_i32_0 = arith.constant 0 : i32
    %c0_i32_1 = arith.constant 0 : i32
    %c0_i32_2 = arith.constant 0 : i32
    return %c0_i32, %c0_i32_0, %c0_i32_1 : i32, i32, i32
  }
  func.func @transform_13(%arg0: i32) -> (i32, i32, i32) {
    %c0_i32 = arith.constant 0 : i32
    %c0_i32_0 = arith.constant 0 : i32
    %c0_i32_1 = arith.constant 0 : i32
    %c0_i32_2 = arith.constant 0 : i32
    return %c0_i32, %c0_i32_0, %c0_i32_1 : i32, i32, i32
  }
  func.func @transform_14(%arg0: i32) -> (i32, i32, i32) {
    %c0_i32 = arith.constant 0 : i32
    %c0_i32_0 = arith.constant 0 : i32
    %c0_i32_1 = arith.constant 0 : i32
    %c0_i32_2 = arith.constant 0 : i32
    return %c0_i32, %c0_i32_0, %c0_i32_1 : i32, i32, i32
  }
  func.func @transform_15(%arg0: i32) -> (i32, i32, i32) {
    %c0_i32 = arith.constant 0 : i32
    %c0_i32_0 = arith.constant 0 : i32
    %c0_i32_1 = arith.constant 0 : i32
    %c0_i32_2 = arith.constant 0 : i32
    return %c0_i32, %c0_i32_0, %c0_i32_1 : i32, i32, i32
  }
  func.func @transform_16(%arg0: i32) -> (i32, i32, i32) {
    %c0_i32 = arith.constant 0 : i32
    %c0_i32_0 = arith.constant 0 : i32
    %c0_i32_1 = arith.constant 0 : i32
    %c0_i32_2 = arith.constant 0 : i32
    return %c0_i32, %c0_i32_0, %c0_i32_1 : i32, i32, i32
  }
  func.func @transform_17(%arg0: i32) -> (i32, i32, i32) {
    %c0_i32 = arith.constant 0 : i32
    %c0_i32_0 = arith.constant 0 : i32
    %c0_i32_1 = arith.constant 0 : i32
    %c0_i32_2 = arith.constant 0 : i32
    return %c0_i32, %c0_i32_0, %c0_i32_1 : i32, i32, i32
  }
  func.func @transform_18(%arg0: i32) -> (i32, i32) {
    %c0_i32 = arith.constant 0 : i32
    %c0_i32_0 = arith.constant 0 : i32
    %c0_i32_1 = arith.constant 0 : i32
    return %c0_i32, %c0_i32_0 : i32, i32
  }
  func.func @transform_19(%arg0: i32) -> (i32, i32) {
    %c0_i32 = arith.constant 0 : i32
    %c0_i32_0 = arith.constant 0 : i32
    %c0_i32_1 = arith.constant 0 : i32
    return %c0_i32, %c0_i32_0 : i32, i32
  }
  func.func @transform_20(%arg0: i32) -> (i32, i32) {
    %c0_i32 = arith.constant 0 : i32
    %c0_i32_0 = arith.constant 0 : i32
    %c0_i32_1 = arith.constant 0 : i32
    return %c0_i32, %c0_i32_0 : i32, i32
  }
  func.func @transform_21(%arg0: i32) -> (i32, i32) {
    %c0_i32 = arith.constant 0 : i32
    %c0_i32_0 = arith.constant 0 : i32
    %c0_i32_1 = arith.constant 0 : i32
    return %c0_i32, %c0_i32_0 : i32, i32
  }
  func.func @transform_22(%arg0: i32) -> (i32, i32, i32) {
    %c0_i32 = arith.constant 0 : i32
    %c0_i32_0 = arith.constant 0 : i32
    %c0_i32_1 = arith.constant 0 : i32
    return %arg0, %c0_i32, %c0_i32_0 : i32, i32, i32
  }
}

module attributes {stable_mosaic.version = 11 : i64} {
  func.func @_masked_mse_kernel(%arg0: i32, %arg1: memref<32x48xf32, #tpu.memory_space<vmem>>, %arg2: memref<32x48xf32, #tpu.memory_space<vmem>>, %arg3: memref<32x1xf32, #tpu.memory_space<vmem>>, %arg4: memref<1x1xf32, #tpu.memory_space<vmem>>) attributes {dimension_semantics = [#tpu.dimension_semantics<arbitrary>], iteration_bounds = array<i64: 1>, scalar_prefetch = 0 : i64, scratch_operands = 0 : i64, tpu.core_type = #tpu.core_type<tc>, window_params = [{pipeline_mode = #tpu.pipeline_mode<synchronous>, transform_indices = @transform_0, window_bounds = array<i64: 32, 48>}, {pipeline_mode = #tpu.pipeline_mode<synchronous>, transform_indices = @transform_1, window_bounds = array<i64: 32, 48>}, {pipeline_mode = #tpu.pipeline_mode<synchronous>, transform_indices = @transform_2, window_bounds = array<i64: 32, 1>}, {pipeline_mode = #tpu.pipeline_mode<synchronous>, transform_indices = @transform_3, window_bounds = array<i64: 1, 1>}]} {
    %c0 = arith.constant 0 : index
    %c0_0 = arith.constant 0 : index
    %0 = vector.load %arg1[%c0, %c0_0] : memref<32x48xf32, #tpu.memory_space<vmem>>, vector<32x48xf32>
    %c0_1 = arith.constant 0 : index
    %c0_2 = arith.constant 0 : index
    %1 = vector.load %arg2[%c0_1, %c0_2] : memref<32x48xf32, #tpu.memory_space<vmem>>, vector<32x48xf32>
    %2 = arith.subf %0, %1 : vector<32x48xf32>
    %3 = arith.mulf %2, %2 : vector<32x48xf32>
    %cst = arith.constant dense<0.000000e+00> : vector<32xf32>
    %4 = vector.multi_reduction <add>, %3, %cst [1] : vector<32x48xf32> to vector<32xf32>
    %5 = vector.shape_cast %4 : vector<32xf32> to vector<32x1xf32>
    %cst_3 = arith.constant 4.800000e+01 : f32
    %6 = vector.broadcast %cst_3 : f32 to vector<32x1xf32>
    %7 = arith.divf %5, %6 : vector<32x1xf32>
    %c0_4 = arith.constant 0 : index
    %c0_5 = arith.constant 0 : index
    %8 = vector.load %arg3[%c0_4, %c0_5] : memref<32x1xf32, #tpu.memory_space<vmem>>, vector<32x1xf32>
    %9 = arith.mulf %7, %8 : vector<32x1xf32>
    %10 = vector.shape_cast %9 : vector<32x1xf32> to vector<1x32x1xf32>
    %cst_6 = arith.constant dense<0.000000e+00> : vector<1xf32>
    %11 = vector.multi_reduction <add>, %10, %cst_6 [1, 2] : vector<1x32x1xf32> to vector<1xf32>
    %12 = vector.shape_cast %11 : vector<1xf32> to vector<1x1x1xf32>
    %13 = vector.extract %12[0, 0, 0] : f32 from vector<1x1x1xf32>
    %14 = vector.shape_cast %8 : vector<32x1xf32> to vector<1x32x1xf32>
    %cst_7 = arith.constant dense<0.000000e+00> : vector<1xf32>
    %15 = vector.multi_reduction <add>, %14, %cst_7 [1, 2] : vector<1x32x1xf32> to vector<1xf32>
    %16 = vector.shape_cast %15 : vector<1xf32> to vector<1x1x1xf32>
    %17 = vector.extract %16[0, 0, 0] : f32 from vector<1x1x1xf32>
    %18 = arith.divf %13, %17 : f32
    %19 = vector.broadcast %18 : f32 to vector<1x1xf32>
    %c0_8 = arith.constant 0 : index
    %c0_9 = arith.constant 0 : index
    %20 = vector.load %arg4[%c0_8, %c0_9] : memref<1x1xf32, #tpu.memory_space<vmem>>, vector<1x1xf32>
    tpu.vector_store %arg4[%c0_8, %c0_9], %19 {strides = array<i32>} : memref<1x1xf32, #tpu.memory_space<vmem>>, vector<1x1xf32>,
    return
  }
  func.func @transform_0(%arg0: i32) -> (i32, i32) {
    %c0_i32 = arith.constant 0 : i32
    %c0_i32_0 = arith.constant 0 : i32
    %c0_i32_1 = arith.constant 0 : i32
    return %c0_i32, %c0_i32_0 : i32, i32
  }
  func.func @transform_1(%arg0: i32) -> (i32, i32) {
    %c0_i32 = arith.constant 0 : i32
    %c0_i32_0 = arith.constant 0 : i32
    %c0_i32_1 = arith.constant 0 : i32
    return %c0_i32, %c0_i32_0 : i32, i32
  }
  func.func @transform_2(%arg0: i32) -> (i32, i32) {
    %c0_i32 = arith.constant 0 : i32
    %c0_i32_0 = arith.constant 0 : i32
    %c0_i32_1 = arith.constant 0 : i32
    return %c0_i32, %c0_i32_0 : i32, i32
  }
  func.func @transform_3(%arg0: i32) -> (i32, i32) {
    %c0_i32 = arith.constant 0 : i32
    %c0_i32_0 = arith.constant 0 : i32
    %c0_i32_1 = arith.constant 0 : i32
    return %c0_i32, %c0_i32_0 : i32, i32
  }
}

</mosaic_0001>

<bundles_post_ra>
// kernel: mae_forward.4
= control target key start
LH: loop header
LB: loop body
LE: loop exit
PB: predicated region body
PF: predicated region fallthrough
CT: control target
= control target key end

     0   :  { %vm31_vm0 = vcmask 392192   ;;  %vm81_vm1 = vcmask 261120   ;;  %s195_s1 = inlined_call_operand.vmem [shape: f32[48,32], index: 1, kind: input, shape index: {}]   ;;  %s196_s2 = inlined_call_operand.vmem [shape: f32[1,32], index: 2, kind: input, shape index: {}]   ;;  %s197_s0 = inlined_call_operand.vmem [shape: f32[32,48], index: 0, kind: input, shape index: {}]   ;;  %s198_s3 = inlined_call_operand.vmem [shape: f32[32,32], index: 3, kind: input, shape index: {}]   ;;  %s199_s4 = inlined_call_operand.vmem [shape: f32[32,32], index: 4, kind: output, shape index: {}]  }
   0x1   :  { %v26_v0 = vld [vmem:[%s195_s1 + $0x28] sm:$0xff]  ;;  %v25_v1 = vld [vmem:[%s195_s1 + $0x20] sm:$0xff]  ;;  %v24_v2 = vld [vmem:[%s195_s1 + $0x18] sm:$0xff] }
   0x2   :  { %95 = vmatpush.msra.mxu2 %v26_v0  ;;  %96 = vmatpush.msra.mxu3 %v26_v0  ;;  %v23_v3 = vld [vmem:[%s195_s1 + $0x10] sm:$0xff]  ;;  %v22_v4 = vld [vmem:[%s195_s1 + $0x8] sm:$0xff]  ;;  %v21_v5 = vld [vmem:[%s195_s1] sm:$0xff] }
   0x3   :  { %54 = vmatpush.msra.mxu0 %v26_v0  ;;  %94 = vmatpush.msra.mxu1 %v26_v0  ;;  %v19_v6 = vld [vmem:[%s197_s0 + $0x10] sm:$0xff]  ;;  %v20_v7 = vld [vmem:[%s197_s0 + $0x18] sm:$0xff]  ;;  %v17_v8 = vld [vmem:[%s197_s0] sm:$0xff] }
   0x4   :  { %98 = vmatpush.msra.mxu2 %v25_v1  ;;  %99 = vmatpush.msra.mxu3 %v25_v1  ;;  %v18_v9 = vld [vmem:[%s197_s0 + $0x8] sm:$0xff]  ;;  %v112_v10 = vld [vmem:[%s196_s2] ss:$0 sm:$0xff]  ;;  %v75_v20 = vld [vmem:[%s198_s3 + $0x10] sm:$0xff] }
   0x5   :  { %55 = vmatpush.msra.mxu0 %v25_v1  ;;  %97 = vmatpush.msra.mxu1 %v25_v1  ;;  %v73_v12 = vld [vmem:[%s198_s3] sm:$0xff]  ;;  %v74_v14 = vld [vmem:[%s198_s3 + $0x8] sm:$0xff]  ;;  %v76_v22 = vld [vmem:[%s198_s3 + $0x18] sm:$0xff] }
   0x6   :  { %101 = vmatpush.msra.mxu2 %v24_v2  ;;  %102 = vmatpush.msra.mxu3 %v24_v2 }
   0x7   :  { %56 = vmatpush.msra.mxu0 %v24_v2  ;;  %100 = vmatpush.msra.mxu1 %v24_v2 }
   0x8   :  { %104 = vmatpush.msra.mxu2 %v23_v3  ;;  %105 = vmatpush.msra.mxu3 %v23_v3 }
   0x9   :  { %57 = vmatpush.msra.mxu0 %v23_v3  ;;  %103 = vmatpush.msra.mxu1 %v23_v3 }
   0xa   :  { %107 = vmatpush.msra.mxu2 %v22_v4  ;;  %108 = vmatpush.msra.mxu3 %v22_v4 }
   0xb   :  { %58 = vmatpush.msra.mxu0 %v22_v4  ;;  %106 = vmatpush.msra.mxu1 %v22_v4 }
   0xc   :  { %110 = vmatpush.msra.mxu2 %v21_v5  ;;  %111 = vmatpush.msra.mxu3 %v21_v5 }
   0xd   :  { %92 = vmatmul.msk.f32.vlgmr.msra.gmra.mxu2 %vm31_vm0, %v19_v6  ;;  %93 = vmatmul.msk.f32.vlgmr.msra.gmra.mxu3 %vm31_vm0, %v20_v7 }
   0xe   :  { %59 = vmatpush.msra.mxu0 %v21_v5  ;;  %109 = vmatpush.msra.mxu1 %v21_v5 }
   0xf   :  { %90 = vmatmul.msk.f32.vlgmr.msra.gmra.mxu0 %vm31_vm0, %v17_v8  ;;  %91 = vmatmul.msk.f32.vlgmr.msra.gmra.mxu1 %vm31_vm0, %v18_v9 }
  0x8c   :  { %v61_v11 = vpop.f32.mrf.mxu0  ;;  %v64_v13 = vpop.f32.mrf.mxu1 }
  0x8d   :  { %v62_v15 = vadd.f32 %v112_v10, %v61_v11  ;;  %v65_v16 = vadd.f32 %v112_v10, %v64_v13 }
  0x8f   :  { %v77_v17 = vadd.f32 %v73_v12, %v62_v15  ;;  %v78_v18 = vadd.f32 %v74_v14, %v65_v16 }
  0x90   :  { %v67_v19 = vpop.f32.mrf.mxu2  ;;  %v70_v21 = vpop.f32.mrf.mxu3 }
  0x91   :  { %82 = vst.msk [vmem:[%s199_s4] sm:$0xff] %vm81_vm1, %v77_v17  ;;  %v68_v23 = vadd.f32 %v112_v10, %v67_v19  ;;  %v71_v24 = vadd.f32 %v112_v10, %v70_v21 }
  0x92   :  { %83 = vst.msk [vmem:[%s199_s4 + $0x8] sm:$0xff] %vm81_vm1, %v78_v18 }
  0x93   :  { %v79_v25 = vadd.f32 %v75_v20, %v68_v23  ;;  %v80_v26 = vadd.f32 %v76_v22, %v71_v24 }
  0x95   :  { %84 = vst.msk [vmem:[%s199_s4 + $0x10] sm:$0xff] %vm81_vm1, %v79_v25 }
  0x96   :  { %85 = vst.msk [vmem:[%s199_s4 + $0x18] sm:$0xff] %vm81_vm1, %v80_v26 }

// kernel: mae_forward.5
= control target key start
LH: loop header
LB: loop body
LE: loop exit
PB: predicated region body
PF: predicated region fallthrough
CT: control target
= control target key end

     0   :  { %s2679_s0 = inlined_call_operand.vmem [shape: f32[2,8,32], index: 0, kind: input, shape index: {}]   ;;  %s2680_s1 = inlined_call_operand.vmem [shape: f32[2,1,32], index: 1, kind: input, shape index: {}]   ;;  %s2681_s2 = inlined_call_operand.vmem [shape: f32[2,1,32], index: 2, kind: input, shape index: {}]   ;;  %s2682_s3 = inlined_call_operand.vmem [shape: f32[2,32,32], index: 3, kind: input, shape index: {}]   ;;  %s2683_s4 = inlined_call_operand.vmem [shape: f32[2,1,32], index: 4, kind: input, shape index: {}]   ;;  %s2684_s5 = inlined_call_operand.vmem [shape: f32[2,32,32], index: 5, kind: input, shape index: {}]   ;;  %s2685_s6 = inlined_call_operand.vmem [shape: f32[2,1,32], index: 6, kind: input, shape index: {}]   ;;  %s2686_s7 = inlined_call_operand.vmem [shape: f32[2,32,32], index: 7, kind: input, shape index: {}]   ;;  %s2687_s8 = inlined_call_operand.vmem [shape: f32[2,1,32], index: 8, kind: input, shape index: {}]   ;;  %s2688_s9 = inlined_call_operand.vmem [shape: f32[2,32,32], index: 9, kind: input, shape index: {}]   ;;  %s2689_s10 = inlined_call_operand.vmem [shape: f32[2,1,32], index: 10, kind: input, shape index: {}]   ;;  %s2690_s11 = inlined_call_operand.vmem [shape: f32[2,1,32], index: 11, kind: input, shape index: {}]   ;;  %s2691_s12 = inlined_call_operand.vmem [shape: f32[2,1,32], index: 12, kind: input, shape index: {}]   ;;  %s2692_s13 = inlined_call_operand.vmem [shape: f32[2,32,128], index: 13, kind: input, shape index: {}]   ;;  %s2693_s14 = inlined_call_operand.vmem [shape: f32[2,1,128], index: 14, kind: input, shape index: {}]   ;;  %s2694_s15 = inlined_call_operand.vmem [shape: f32[2,128,32], index: 15, kind: input, shape index: {}]   ;;  %s2695_s16 = inlined_call_operand.vmem [shape: f32[2,1,32], index: 16, kind: input, shape index: {}]   ;;  %s2696_s17 = inlined_call_operand.vmem [shape: f32[1,32], index: 17, kind: input, shape index: {}]   ;;  %s2697_s18 = inlined_call_operand.vmem [shape: f32[1,32], index: 18, kind: input, shape index: {}]   ;;  %s2698_s19 = inlined_call_operand.vmem [shape: f32[32,32], index: 19, kind: input, shape index: {}]   ;;  %s2699_s20 = inlined_call_operand.vmem [shape: f32[1,32], index: 20, kind: input, shape index: {}]   ;;  %s2700_s21 = inlined_call_operand.vmem [shape: f32[2,8,32], index: 21, kind: output, shape index: {}]  }
   0x1   :  { %2708 = sst [smem:[#allocation3_spill]] %s2679_s0 }
   0x2   :  { %2709 = sst [smem:[#allocation4_spill]] %s2680_s1 }
   0x3   :  { %2710 = sst [smem:[#allocation5_spill]] %s2681_s2  ;;  %s2202_s2 = smov 0  }
   0x4   :  { %2711 = sst [smem:[#allocation6_spill]] %s2682_s3 }
   0x5   :  { %2712 = sst [smem:[#allocation7_spill]] %s2683_s4 }
   0x6   :  { %2713 = sst [smem:[#allocation8_spill]] %s2684_s5 }
   0x7   :  { %2714 = sst [smem:[#allocation9_spill]] %s2700_s21 }
   0x8 LB: > { %2715 = sst [smem:[#allocation2_spill]] %s2086_s2  ;;  %s1903_s25 = sadd.s32 4294967295, %s2086_s2   ;;  %s2086_s2 = sphi %s2202_s2, %s31_s2  }
   0x9   : > { %p1907_p0 = scmp.ge.s32.totalorder %s2086_s2, 1  ;;  %p586_p1 = scmp.lt.s32.totalorder %s2086_s2, 3 }
   0xb   : > { %p587_p2 = pnand %p1907_p0, %p586_p1 }
   0xc   : > { %p644_p3 = scmp.lt.s32.totalorder (!%p587_p2), %s1903_s25, 1  ;;  %s2716_s28 = sld [smem:[#allocation3_spill]] (!%p587_p2) }
   0xd   : > { %590 = sbr.rel (%p587_p2) target bundleno = 4509 (0x119d), region = 104  ;;  %s2717_s30 = sld [smem:[#allocation6_spill]] (!%p587_p2) }
   0xe   : > { %s2718_s23 = sld [smem:[#allocation8_spill]] (!%p587_p2) }
   0xf   : > { %s2719_s27 = sld [smem:[#allocation4_spill]] (!%p587_p2) }
  0x10   : > { %s2721_s5 = sld [smem:[#allocation7_spill]] (!%p587_p2) }
  0x11   : > { %s2723_s21 = sld [smem:[#allocation9_spill]] (!%p587_p2) }
  0x12   : > { %s2726_s25 = smov (!%p644_p3, %s1903_s25), 1  ;;  %vm719_vm0 = vcmask 261120   ;;  %v2088_v2 = vmov 32.0   ;;  %v688_v16 = vld [vmem:[%s2686_s7 + $0x18] sm:$0xff]  ;;  %v687_v19 = vld [vmem:[%s2686_s7 + $0x10] sm:$0xff]  ;;  %v686_v22 = vld [vmem:[%s2686_s7 + $0x8] sm:$0xff]  ;;  %v653_v41 = vlaneseq }
  0x13   : > { %s2706_s26 = sshll.u32 %s2726_s25, 3  ;;  %2028 = vrcp.f32 %v2088_v2  ;;  %v678_v14 = vld [vmem:[%s2717_s30 + $0x18] sm:$0xff]  ;;  %v677_v17 = vld [vmem:[%s2717_s30 + $0x10] sm:$0xff]  ;;  %821 = vmatpush.msra.mxu2 %v688_v16  ;;  %v676_v20 = vld [vmem:[%s2717_s30 + $0x8] sm:$0xff]  ;;  %v2089_v52 = vmov 0.0   ;;  %s2722_s0 = sshll.u32 %s2726_s25, 3 }
  0x14   : > { %s647_s29 = scalar_lea.vmem %s2716_s28, %s2706_s26  ;;  %v683_v15 = vld [vmem:[%s2718_s23 + $0x18] sm:$0xff]  ;;  %775 = vmatpush.msra.mxu0 %v678_v14  ;;  %v682_v18 = vld [vmem:[%s2718_s23 + $0x10] sm:$0xff]  ;;  %v681_v21 = vld [vmem:[%s2718_s23 + $0x8] sm:$0xff]  ;;  %v654_v42 = vand.u32 127, %v653_v41 }
  0x15   : > { %v2218_v0 = vld [vmem:[%s647_s29] sm:$0xff]  ;;  %798 = vmatpush.msra.mxu3 %v683_v15  ;;  %822 = vmatpush.msra.mxu2 %v687_v19  ;;  %s2720_s29 = sld [smem:[#allocation5_spill]] }
  0x16   : > { %v720_v1 = vsel %vm719_vm0, %v2218_v0, 0.0  ;;  %776 = vmatpush.msra.mxu0 %v677_v17  ;;  %v675_v23 = vld [vmem:[%s2717_s30] sm:$0xff]  ;;  %vm661_vm5 = vcmp.ge.s32.totalorder %v654_v42, 8  ;;  %vm662_vm6 = vcmp.lt.s32.totalorder %v654_v42, 16  ;;  %vm669_vm7 = vcmp.ge.s32.totalorder %v654_v42, 24 }
  0x17   : > { %721 = vadd.xlane.f32.xlu0 %v720_v1  ;;  %799 = vmatpush.msra.mxu3 %v682_v18  ;;  %v680_v24 = vld [vmem:[%s2718_s23] sm:$0xff]  ;;  %vm670_vm8 = vcmp.lt.s32.totalorder %v654_v42, 32  ;;  %vm665_vm9 = vcmp.ge.s32.totalorder %v654_v42, 16  ;;  %vm666_vm10 = vcmp.lt.s32.totalorder %v654_v42, 24  ;;  %vm663_vm11 = vmand %vm661_vm5, %vm662_vm6  ;;  %vm658_vm13 = vcmp.lt.s32.totalorder %v654_v42, 8  ;;  %s651_s2 = scalar_lea.vmem %s2723_s21, %s2722_s0 }
  0x18   : > { %777 = vmatpush.msra.mxu0 %v676_v20  ;;  %v685_v25 = vld [vmem:[%s2686_s7] sm:$0xff]  ;;  %823 = vmatpush.msra.mxu2 %v686_v22  ;;  %vm671_vm12 = vmand %vm669_vm7, %vm670_vm8  ;;  %v2286_v53 = vsel %vm658_vm13, 1.0, %v2089_v52  ;;  %v2292_v54 = vsel %vm663_vm11, 1.0, %v2089_v52  ;;  %vm655_vm15 = vcmp.lt.s32.totalorder %v654_v42, 5 }
  0x19   : > { %v2029_v3 = vpop.eup %2028  ;;  %800 = vmatpush.msra.mxu3 %v681_v21  ;;  %v2005_v35 = vld [vmem:[%s2719_s27] ss:$0 sm:$0xff]  ;;  %vm667_vm14 = vmand %vm665_vm9, %vm666_vm10  ;;  %v2294_v55 = vsel %vm671_vm12, 1.0, %v2089_v52 }
  0x1a   : > { %v724_v4 = vmul.f32 32.0, %v2029_v3  ;;  %vm728_vm1 = vweird.f32 %v2029_v3  ;;  %778 = vmatpush.msra.mxu0 %v675_v23  ;;  %824 = vmatpush.msra.mxu2 %v685_v25  ;;  %v2007_v43 = vld [vmem:[%s2721_s5] ss:$0 sm:$0xff]  ;;  %v2296_v56 = vsel %vm667_vm14, 1.0, %v2089_v52 }
  0x1b   : > { %801 = vmatpush.msra.mxu3 %v680_v24  ;;  %v2006_v38 = vld [vmem:[%s2720_s29] ss:$0 sm:$0xff] }
  0x1c   : > { %v725_v5 = vsub.f32 1.0, %v724_v4  ;;  %v2008_v44 = vld [vmem:[%s2685_s6] ss:$0 sm:$0xff] }
  0x1d   : > { %v2009_v46 = vld [vmem:[%s2687_s8] ss:$0 sm:$0xff] }
  0x1e   : > { %v726_v6 = vmul.f32 %v2029_v3, %v725_v5 }
  0x20   : > { %v727_v7 = vadd.f32 %v2029_v3, %v726_v6 }
  0x22   : > { %v2222_v8 = vsel %vm728_vm1, %v2029_v3, %v727_v7  ;;  %v2090_v3 = vmov -1e+30   ;;  %vm858_vm1 = vcmask 64512  }
  0x23   : > { %v2313_v4 = vsel %vm655_vm15, 0.0, %v2090_v3 }
  0x8a   : > { %v722_v9 = vpop.xlane.xlu0 %721 }
  0x8b   : > { %v730_v10 = vmul.f32 %v2222_v8, %v722_v9 }
  0x8d   : > { %v731_v11 = vsub.f32 %v2218_v0, %v730_v10 }
  0x8f   : > { %v732_v12 = vmul.f32 %v731_v11, %v731_v11 }
  0x91   : > { %v733_v13 = vsel %vm719_vm0, %v732_v12, 0.0 }
  0x92   : > { %734 = vadd.xlane.f32.xlu0 %v733_v13 }
 0x105   : > { %v735_v26 = vpop.xlane.xlu0 %734 }
 0x106   : > { %v736_v27 = vmul.f32 %v735_v26, %v2222_v8 }
 0x108   : > { %v737_v28 = vadd.f32 1e-05, %v736_v27 }
 0x10a   : > { %2030 = vrsqrt.f32 %v737_v28  ;;  %vm744_vm3 = vweird.f32 %v737_v28 }
 0x110   : > { %v2031_v29 = vpop.eup %2030 }
 0x111   : > { %v739_v30 = vmul.f32 %v2031_v29, %v737_v28  ;;  %vm745_vm2 = vweird.f32 %v2031_v29 }
 0x112   : > { %vm746_vm4 = vmor %vm744_vm3, %vm745_vm2 }
 0x113   : > { %v740_v31 = vmul.f32 %v2031_v29, %v739_v30 }
 0x115   : > { %v741_v32 = vmul.f32 0.5, %v740_v31 }
 0x117   : > { %v742_v33 = vsub.f32 1.5, %v741_v32 }
 0x119   : > { %v743_v34 = vmul.f32 %v2031_v29, %v742_v33 }
 0x11b   : > { %v747_v36 = vsel %vm746_vm4, %v2031_v29, %v743_v34 }
 0x11c   : > { %v748_v37 = vmul.f32 %v747_v36, %v731_v11 }
 0x11e   : > { %v752_v39 = vmul.f32 %v2005_v35, %v748_v37 }
 0x120   : > { %v756_v40 = vadd.f32 %v2006_v38, %v752_v39 }
 0x122   : > { %1910 = vmatmul.msk.f32.vlgmr.msra.gmra.mxu0 %vm719_vm0, %v756_v40  ;;  %1911 = vmatmul.msk.f32.vlgmr.msra.gmra.mxu3 %vm719_vm0, %v756_v40 }
 0x123   : > { %1912 = vmatmul.msk.f32.vlgmr.msra.gmra.mxu2 %vm719_vm0, %v756_v40 }
 0x19f   : > { %v780_v45 = vpop.f32.mrf.mxu0 }
 0x1a0   : > { %v2282_v48 = vadd.f32 %v2007_v43, %v780_v45 }
 0x1a2   : > { %v829_v60 = vmul.f32 %v2282_v48, %v2286_v53  ;;  %v955_v61 = vmul.f32 %v2282_v48, %v2296_v56  ;;  %v871_v63 = vmul.f32 %v2282_v48, %v2292_v54  ;;  %v1017_v39 = vmul.f32 %v2282_v48, %v2294_v55 }
 0x1a5   : > { %v803_v47 = vpop.f32.mrf.mxu3 }
 0x1a6   : > { %v2284_v49 = vadd.f32 %v2008_v44, %v803_v47  ;;  %v826_v50 = vpop.f32.mrf.mxu2 }
 0x1a7   : > { %v827_v51 = vadd.f32 %v2009_v46, %v826_v50 }
 0x1a8   : > { %1913 = vmatpush.xpose.msk.msrb.mxu3 %vm719_vm0, %v2284_v49  ;;  %1919 = vmatpush.xpose.msk.msrb.mxu2 %vm719_vm0, %v2284_v49 }
 0x1a9   : > { %v908_v57 = vmul.f32 %v827_v51, %v2292_v54  ;;  %v1054_v58 = vmul.f32 %v827_v51, %v2294_v55  ;;  %v870_v59 = vmul.f32 %v827_v51, %v2286_v53  ;;  %v992_v62 = vmul.f32 %v827_v51, %v2296_v56 }
 0x1ab   : > { %927 = vmatpush.msrb.mxu0 %v908_v57  ;;  %1073 = vmatpush.msra.mxu1 %v1054_v58  ;;  %v693_v57 = vld [vmem:[%s2688_s9 + $0x18] sm:$0xff]  ;;  %v692_v58 = vld [vmem:[%s2688_s9 + $0x10] sm:$0xff] }
 0x1ac   : > { %1915 = vmatpush.xpose.msk.msra.mxu3 %vm719_vm0, %v2284_v49  ;;  %1920 = vmatmul.msk.f32.vlgmr.msrb.gmra.mxu2 %vm719_vm0, %v955_v61 }
 0x1ad   : > { %1914 = vmatmul.msk.f32.vlgmr.msrb.gmra.mxu3 %vm719_vm0, %v829_v60  ;;  %950 = vmatpush.msra.mxu0 %v870_v59 }
 0x1ae   : > { %1097 = vmatpush.msra.mxu2 %v693_v57  ;;  %v706_v57 = vld [vmem:[%s2694_s15 + $0x20] sm:$0xff] }
 0x1b0   : > { %1011 = vmatpush.msrb.mxu3 %v992_v62  ;;  %1098 = vmatpush.msra.mxu2 %v692_v58  ;;  %v691_v62 = vld [vmem:[%s2688_s9 + $0x8] sm:$0xff] }
 0x1b2   : > { %1099 = vmatpush.msra.mxu2 %v691_v62 }
 0x1b5   : > { %1916 = vmatmul.msk.f32.vlgmr.msra.gmra.mxu3 %vm719_vm0, %v871_v63  ;;  %v690_v63 = vld [vmem:[%s2688_s9] sm:$0xff] }
 0x1b6   : > { %1100 = vmatpush.msra.mxu2 %v690_v63 }
 0x22f   : > { %v976_v2 = vpop.f32.mrf.mxu2 }
 0x230   : > { %v853_v1 = vpop.f32.mrf.mxu3  ;;  %v979_v5 = vmul.f32 0.35355338, %v976_v2 }
 0x231   : > { %v856_v12 = vmul.f32 0.35355338, %v853_v1 }
 0x232   : > { %v980_v6 = vadd.f32 %v979_v5, %v2313_v4 }
 0x233   : > { %v857_v14 = vadd.f32 %v856_v12, %v2313_v4 }
 0x234   : > { %v981_v7 = vsel %vm858_vm1, %v980_v6, -inf }
 0x235   : > { %982 = vmax.xlane.f32.xlu0 %v981_v7  ;;  %v859_v15 = vsel %vm858_vm1, %v857_v14, -inf }
 0x238   : > { %v892_v9 = vpop.f32.mrf.mxu3 }
 0x239   : > { %v895_v10 = vmul.f32 0.35355338, %v892_v9 }
 0x23b   : > { %v896_v11 = vadd.f32 %v895_v10, %v2313_v4 }
 0x23d   : > { %v897_v13 = vsel %vm858_vm1, %v896_v11, -inf }
 0x23e   : > { %898 = vmax.xlane.f32.xlu1 %v897_v13 }
 0x246   : > { %860 = vmax.xlane.f32.xlu1 %v859_v15 }
 0x2a8   : > { %v983_v19 = vpop.xlane.xlu0 %982 }
 0x2a9   : > { %v984_v23 = vsub.f32 %v980_v6, %v983_v19  ;;  %v2010_v6 = vld [vmem:[%s2689_s10] ss:$0 sm:$0xff] }
 0x2aa   : > { %v697_v19 = vld [vmem:[%s2692_s13] sm:$0xff] }
 0x2ab   : > { %v985_v26 = vmul.f32 1.442695, %v984_v23 }
 0x2b1   : > { %v899_v16 = vpop.xlane.xlu1 %898 }
 0x2b2   : > { %v900_v17 = vsub.f32 %v896_v11, %v899_v16 }
 0x2b4   : > { %v901_v18 = vmul.f32 1.442695, %v900_v17  ;;  %v700_v17 = vld [vmem:[%s2692_s13 + $0x18] sm:$0xff] }
 0x2b5   : > { %1154 = vmatpush.msra.mxu3 %v700_v17 }
 0x2b6   : > { %2032 = vpow2.f32 %v901_v18  ;;  %v698_v18 = vld [vmem:[%s2692_s13 + $0x8] sm:$0xff] }
 0x2b9   : > { %v861_v20 = vpop.xlane.xlu1 %860 }
 0x2ba   : > { %v862_v21 = vsub.f32 %v857_v14, %v861_v20 }
 0x2bc   : > { %v2033_v22 = vpop.eup %2032  ;;  %v863_v24 = vmul.f32 1.442695, %v862_v21 }
 0x2bd   : > { %v903_v25 = vsel %vm858_vm1, %v2033_v22, 0.0 }
 0x2be   : > { %2034 = vpow2.f32 %v863_v24  ;;  %904 = vadd.xlane.f32.xlu2 %v903_v25 }
 0x2bf   : > { %2036 = vpow2.f32 %v985_v26 }
 0x2c4   : > { %v2035_v27 = vpop.eup %2034 }
 0x2c5   : > { %v865_v28 = vsel %vm858_vm1, %v2035_v27, 0.0  ;;  %v2037_v29 = vpop.eup %2036 }
 0x2c6   : > { %866 = vadd.xlane.f32.xlu2 %v865_v28  ;;  %v987_v30 = vsel %vm858_vm1, %v2037_v29, 0.0 }
 0x2ce   : > { %988 = vadd.xlane.f32.xlu2 %v987_v30 }
 0x331   : > { %v905_v31 = vpop.xlane.xlu2 %904 }
 0x332   : > { %2038 = vrcp.f32 %v905_v31 }
 0x338   : > { %v2039_v32 = vpop.eup %2038 }
 0x339   : > { %v867_v33 = vpop.xlane.xlu2 %866  ;;  %v907_v34 = vmul.f32 %v2039_v32, %v2033_v22  ;;  %v2012_v32 = vld [vmem:[%s2691_s12] ss:$0 sm:$0xff] }
 0x33a   : > { %2040 = vrcp.f32 %v867_v33 }
 0x33b   : > { %1917 = vmatmul.msk.f32.vlgmr.msrb.gmra.mxu0 %vm858_vm1, %v907_v34 }
 0x33c   : > { %1922 = vmatpush.xpose.msk.msrb.mxu0 %vm719_vm0, %v2284_v49 }
 0x340   : > { %v2041_v35 = vpop.eup %2040 }
 0x341   : > { %v869_v36 = vmul.f32 %v2041_v35, %v2035_v27  ;;  %v989_v37 = vpop.xlane.xlu2 %988  ;;  %v717_v35 = vld [vmem:[%s2694_s15 + $0x78] sm:$0xff] }
 0x342   : > { %2042 = vrcp.f32 %v989_v37  ;;  %v2013_v37 = vld [vmem:[%s2693_s14] ss:$0 sm:$0xff] }
 0x343   : > { %1918 = vmatmul.msk.f32.vlgmr.msra.gmra.mxu0 %vm858_vm1, %v869_v36  ;;  %v716_v36 = vld [vmem:[%s2694_s15 + $0x70] sm:$0xff] }
 0x344   : > { %1205 = vmatpush.msra.mxu0 %v717_v35 }
 0x346   : > { %1206 = vmatpush.msra.mxu0 %v716_v36 }
 0x348   : > { %v2043_v38 = vpop.eup %2042 }
 0x349   : > { %v991_v40 = vmul.f32 %v2043_v38, %v2037_v29  ;;  %v2011_v29 = vld [vmem:[%s2690_s11] ss:$0 sm:$0xff]  ;;  %v715_v38 = vld [vmem:[%s2694_s15 + $0x68] sm:$0xff] }
 0x34a   : > { %1207 = vmatpush.msra.mxu0 %v715_v38 }
 0x34b   : > { %1921 = vmatmul.msk.f32.vlgmr.msrb.gmra.mxu3 %vm858_vm1, %v991_v40  ;;  %1923 = vmatmul.msk.f32.vlgmr.msrb.gmra.mxu0 %vm719_vm0, %v1017_v39  ;;  %v714_v39 = vld [vmem:[%s2694_s15 + $0x60] sm:$0xff] }
 0x34c   : > { %1208 = vmatpush.msra.mxu0 %v714_v39 }
 0x3b8   : > { %v929_v41 = vpop.f32.mrf.mxu0 }
 0x3c0   : > { %v952_v42 = vpop.f32.mrf.mxu0 }
 0x3c1   : > { %v953_v43 = vadd.f32 %v952_v42, %v929_v41  ;;  %v713_v42 = vld [vmem:[%s2694_s15 + $0x58] sm:$0xff] }
 0x3c2   : > { %1209 = vmatpush.msra.mxu0 %v713_v42  ;;  %v1932_v42 = vld [vmem:[%s2717_s30 + $0x38] sm:$0xff] }
 0x3c3   : > { %1336 = vmatpush.msrb.mxu1 %v1932_v42 }
 0x3c8   : > { %v1038_v44 = vpop.f32.mrf.mxu0 }
 0x3c9   : > { %v1041_v45 = vmul.f32 0.35355338, %v1038_v44  ;;  %v712_v44 = vld [vmem:[%s2694_s15 + $0x50] sm:$0xff] }
 0x3ca   : > { %1210 = vmatpush.msra.mxu0 %v712_v44  ;;  %v1931_v44 = vld [vmem:[%s2717_s30 + $0x30] sm:$0xff] }
 0x3cb   : > { %v1042_v46 = vadd.f32 %v1041_v45, %v2313_v4  ;;  %1337 = vmatpush.msrb.mxu1 %v1931_v44 }
 0x3cd   : > { %v1043_v47 = vsel %vm858_vm1, %v1042_v46, -inf }
 0x3ce   : > { %1044 = vmax.xlane.f32.xlu1 %v1043_v47  ;;  %v1013_v1 = vpop.f32.mrf.mxu3 }
 0x3cf   : > { %v1016_v2 = vadd.f32 %v1013_v1, %v953_v43  ;;  %v703_v1 = vld [vmem:[%s2694_s15 + $0x8] sm:$0xff] }
 0x441   : > { %v1045_v49 = vpop.xlane.xlu1 %1044 }
 0x442   : > { %v1046_v50 = vsub.f32 %v1042_v46, %v1045_v49  ;;  %v711_v46 = vld [vmem:[%s2694_s15 + $0x48] sm:$0xff]  ;;  %v710_v49 = vld [vmem:[%s2694_s15 + $0x40] sm:$0xff] }
 0x443   : > { %1211 = vmatpush.msra.mxu0 %v711_v46  ;;  %v1941_v46 = vld [vmem:[%s2686_s7 + $0x30] sm:$0xff] }
 0x444   : > { %v1047_v51 = vmul.f32 1.442695, %v1046_v50 }
 0x445   : > { %1212 = vmatpush.msra.mxu0 %v710_v49  ;;  %v1935_v49 = vld [vmem:[%s2718_s23 + $0x28] sm:$0xff] }
 0x446   : > { %2044 = vpow2.f32 %v1047_v51  ;;  %v709_v51 = vld [vmem:[%s2694_s15 + $0x38] sm:$0xff] }
 0x447   : > { %1213 = vmatpush.msra.mxu0 %v709_v51  ;;  %v1929_v51 = vld [vmem:[%s2717_s30 + $0x20] sm:$0xff] }
 0x44c   : > { %v2045_v48 = vpop.eup %2044 }
 0x44d   : > { %v1049_v52 = vsel %vm858_vm1, %v2045_v48, 0.0 }
 0x44e   : > { %1050 = vadd.xlane.f32.xlu0 %v1049_v52  ;;  %v707_v52 = vld [vmem:[%s2694_s15 + $0x28] sm:$0xff] }
 0x4c1   : > { %v1051_v59 = vpop.xlane.xlu0 %1050 }
 0x4c2   : > { %2046 = vrcp.f32 %v1051_v59  ;;  %v705_v59 = vld [vmem:[%s2694_s15 + $0x18] sm:$0xff] }
 0x4c8   : > { %v2047_v60 = vpop.eup %2046 }
 0x4c9   : > { %v1053_v61 = vmul.f32 %v2047_v60, %v2045_v48  ;;  %v708_v48 = vld [vmem:[%s2694_s15 + $0x30] sm:$0xff] }
 0x4ca   : > { %1214 = vmatpush.msra.mxu0 %v708_v48  ;;  %v1934_v48 = vld [vmem:[%s2718_s23 + $0x20] sm:$0xff] }
 0x4cb   : > { %1924 = vmatmul.msk.f32.vlgmr.msra.gmra.mxu1 %vm858_vm1, %v1053_v61  ;;  %v704_v61 = vld [vmem:[%s2694_s15 + $0x10] sm:$0xff] }
 0x4cc   : > { %1215 = vmatpush.msra.mxu0 %v707_v52  ;;  %v1939_v52 = vld [vmem:[%s2686_s7 + $0x20] sm:$0xff] }
 0x4ce   : > { %1216 = vmatpush.msra.mxu0 %v706_v57 }
 0x4d0   : > { %1217 = vmatpush.msra.mxu0 %v705_v59 }
 0x4d2   : > { %1218 = vmatpush.msra.mxu0 %v704_v61 }
 0x4d4   : > { %1219 = vmatpush.msra.mxu0 %v703_v1 }
 0x548   : > { %v1075_v3 = vpop.f32.mrf.mxu1 }
 0x549   : > { %v1078_v5 = vadd.f32 %v1075_v3, %v1016_v2 }
 0x54b   : > { %1925 = vmatmul.msk.f32.vlgmr.msra.gmra.mxu2 %vm719_vm0, %v1078_v5  ;;  %v702_v5 = vld [vmem:[%s2694_s15] sm:$0xff] }
 0x54c   : > { %1220 = vmatpush.msra.mxu0 %v702_v5 }
 0x5ce   : > { %v1102_v7 = vpop.f32.mrf.mxu2 }
 0x5cf   : > { %v1103_v9 = vadd.f32 %v2010_v6, %v1102_v7 }
 0x5d1   : > { %v2353_v10 = vadd.f32 %v1103_v9, %v2218_v0  ;;  %v699_v0 = vld [vmem:[%s2692_s13 + $0x10] sm:$0xff] }
 0x5d2   : > { %1155 = vmatpush.msra.mxu3 %v699_v0 }
 0x5d3   : > { %v1106_v11 = vsel %vm719_vm0, %v2353_v10, 0.0 }
 0x5d4   : > { %1107 = vadd.xlane.f32.xlu1 %v1106_v11  ;;  %1156 = vmatpush.msra.mxu3 %v698_v18 }
 0x5d6   : > { %1157 = vmatpush.msra.mxu3 %v697_v19 }
 0x647   : > { %v1108_v12 = vpop.xlane.xlu1 %1107 }
 0x648   : > { %v1109_v13 = vmul.f32 %v1108_v12, %v2222_v8 }
 0x64a   : > { %v1110_v14 = vsub.f32 %v2353_v10, %v1109_v13 }
 0x64c   : > { %v1111_v15 = vmul.f32 %v1110_v14, %v1110_v14 }
 0x64e   : > { %v1112_v16 = vsel %vm719_vm0, %v1111_v15, 0.0 }
 0x64f   : > { %1113 = vadd.xlane.f32.xlu2 %v1112_v16 }
 0x6c2   : > { %v1114_v20 = vpop.xlane.xlu2 %1113 }
 0x6c3   : > { %v1115_v21 = vmul.f32 %v1114_v20, %v2222_v8 }
 0x6c5   : > { %v1116_v22 = vadd.f32 1e-05, %v1115_v21 }
 0x6c7   : > { %2048 = vrsqrt.f32 %v1116_v22  ;;  %vm1123_vm3 = vweird.f32 %v1116_v22 }
 0x6cd   : > { %v2049_v23 = vpop.eup %2048 }
 0x6ce   : > { %v1118_v24 = vmul.f32 %v2049_v23, %v1116_v22  ;;  %vm1124_vm2 = vweird.f32 %v2049_v23 }
 0x6cf   : > { %vm1125_vm4 = vmor %vm1123_vm3, %vm1124_vm2 }
 0x6d0   : > { %v1119_v25 = vmul.f32 %v2049_v23, %v1118_v24 }
 0x6d2   : > { %v1120_v26 = vmul.f32 0.5, %v1119_v25 }
 0x6d4   : > { %v1121_v27 = vsub.f32 1.5, %v1120_v26  ;;  %v2091_v26 = vmov -1.0  }
 0x6d6   : > { %v1122_v28 = vmul.f32 %v2049_v23, %v1121_v27 }
 0x6d8   : > { %v1126_v30 = vsel %vm1125_vm4, %v2049_v23, %v1122_v28 }
 0x6d9   : > { %v1127_v31 = vmul.f32 %v1126_v30, %v1110_v14 }
 0x6db   : > { %v1131_v33 = vmul.f32 %v2011_v29, %v1127_v31 }
 0x6dd   : > { %v1135_v34 = vadd.f32 %v2012_v32, %v1131_v33  ;;  %v2014_v32 = vld [vmem:[%s2695_s16] ss:$0 sm:$0xff] }
 0x6df   : > { %1926 = vmatmul.msk.f32.vlgmr.msra.gmra.mxu3 %vm719_vm0, %v1135_v34 }
 0x762   : > { %v1159_v40 = vpop.f32.mrf.mxu3 }
 0x763   : > { %v2395_v41 = vadd.f32 %v2013_v37, %v1159_v40 }
 0x765   : > { %v1163_v43 = vmul.f32 0.70710677, %v2395_v41  ;;  %v1162_v29 = vmul.f32 0.5, %v2395_v41 }
 0x767   : > { %v1166_v45 = vand.u32 2147483647, %v1163_v43  ;;  %vm1164_vm9 = vcmp.ge.f32.partialorder %v1163_v43, 0.0  ;;  %v1942_v43 = vld [vmem:[%s2686_s7 + $0x38] sm:$0xff] }
 0x768   : > { %v1165_v27 = vsel %vm1164_vm9, 1.0, %v2091_v26  ;;  %1382 = vmatpush.msrb.mxu3 %v1942_v43 }
 0x769   : > { %v1167_v47 = vmul.f32 0.3275911, %v1166_v45  ;;  %v1193_v12 = vsub.f32 0.0, %v1166_v45 }
 0x76a   : > { %1383 = vmatpush.msrb.mxu3 %v1941_v46 }
 0x76b   : > { %v1168_v50 = vadd.f32 1.0, %v1167_v47  ;;  %v1194_v15 = vmul.f32 %v1193_v12, %v1166_v45  ;;  %v1936_v45 = vld [vmem:[%s2718_s23 + $0x30] sm:$0xff]  ;;  %v1930_v47 = vld [vmem:[%s2717_s30 + $0x28] sm:$0xff]  ;;  %v2017_v12 = vld [vmem:[%s2721_s5 + $0x1] ss:$0 sm:$0xff] }
 0x76c   : > { %1338 = vmatpush.msrb.mxu1 %v1930_v47 }
 0x76d   : > { %2050 = vrcp.f32 %v1168_v50  ;;  %v1180_v63 = vand.u32 2147483648, %v1168_v50  ;;  %v1178_v3 = vand.u32 2147483647, %v1168_v50  ;;  %vm1174_vm6 = vweird.f32 %v1168_v50 }
 0x76e   : > { %v1195_v0 = vmul.f32 1.442695, %v1194_v15  ;;  %1339 = vmatpush.msrb.mxu1 %v1929_v51  ;;  %v2019_v15 = vld [vmem:[%s2687_s8 + $0x1] ss:$0 sm:$0xff] }
 0x76f   : > { %v1181_v7 = vor.u32 1.1754944e-38, %v1180_v63  ;;  %vm1179_vm8 = vcmp.eq.f32.partialorder %v1178_v3, 8.507059e+37  ;;  %v2015_v3 = vld [vmem:[%s2719_s27 + $0x1] ss:$0 sm:$0xff] }
 0x770   : > { %2052 = vpow2.f32 %v1195_v0 }
 0x773   : > { %v2051_v58 = vpop.eup %2050 }
 0x774   : > { %v1170_v60 = vmul.f32 %v2051_v58, %v1168_v50  ;;  %vm1175_vm5 = vweird.f32 %v2051_v58  ;;  %v1940_v50 = vld [vmem:[%s2686_s7 + $0x28] sm:$0xff] }
 0x775   : > { %vm1176_vm7 = vmor %vm1174_vm6, %vm1175_vm5  ;;  %1384 = vmatpush.msrb.mxu3 %v1940_v50 }
 0x776   : > { %v1171_v62 = vsub.f32 1.0, %v1170_v60  ;;  %v2053_v23 = vpop.eup %2052 }
 0x777   : > { %1385 = vmatpush.msrb.mxu3 %v1939_v52 }
 0x778   : > { %v1172_v2 = vmul.f32 %v2051_v58, %v1171_v62 }
 0x77a   : > { %v1173_v6 = vadd.f32 %v2051_v58, %v1172_v2 }
 0x77c   : > { %v1177_v9 = vsel %vm1176_vm7, %v2051_v58, %v1173_v6 }
 0x77d   : > { %v1182_v11 = vsel %vm1179_vm8, %v1181_v7, %v1177_v9  ;;  %v2016_v7 = vld [vmem:[%s2720_s29 + $0x1] ss:$0 sm:$0xff] }
 0x77e   : > { %v1184_v13 = vmul.f32 1.0614054, %v1182_v11 }
 0x780   : > { %v1185_v14 = vadd.f32 -1.4531521, %v1184_v13  ;;  %v2018_v13 = vld [vmem:[%s2685_s6 + $0x1] ss:$0 sm:$0xff] }
 0x782   : > { %v1186_v16 = vmul.f32 %v1185_v14, %v1182_v11 }
 0x784   : > { %v1187_v17 = vadd.f32 1.4214138, %v1186_v16 }
 0x786   : > { %v1188_v18 = vmul.f32 %v1187_v17, %v1182_v11 }
 0x788   : > { %v1189_v19 = vadd.f32 -0.28449672, %v1188_v18 }
 0x78a   : > { %v1190_v20 = vmul.f32 %v1189_v19, %v1182_v11 }
 0x78c   : > { %v1191_v21 = vadd.f32 0.2548296, %v1190_v20 }
 0x78e   : > { %v1192_v22 = vmul.f32 %v1191_v21, %v1182_v11 }
 0x790   : > { %v1197_v24 = vmul.f32 %v2053_v23, %v1192_v22 }
 0x792   : > { %v1198_v25 = vsub.f32 1.0, %v1197_v24 }
 0x794   : > { %v1199_v28 = vmul.f32 %v1198_v25, %v1165_v27 }
 0x796   : > { %v1200_v30 = vadd.f32 1.0, %v1199_v28 }
 0x798   : > { %v1201_v31 = vmul.f32 %v1200_v30, %v1162_v29 }
 0x79a   : > { %1221 = vmatmul.f32.vlgmr.msra.gmra.mxu0 %v1201_v31 }
 0x817   : > { %v1222_v33 = vpop.f32.mrf.mxu0 }
 0x818   : > { %v1223_v34 = vadd.f32 %v2014_v32, %v1222_v33 }
 0x81a   : > { %v2440_v35 = vadd.f32 %v1223_v34, %v2353_v10  ;;  %v1937_v10 = vld [vmem:[%s2718_s23 + $0x38] sm:$0xff] }
 0x81b   : > { %1359 = vmatpush.msrb.mxu2 %v1937_v10 }
 0x81c   : > { %v1288_v36 = vsel %vm719_vm0, %v2440_v35, 0.0 }
 0x81d   : > { %1289 = vadd.xlane.f32.xlu0 %v1288_v36  ;;  %1360 = vmatpush.msrb.mxu2 %v1936_v45 }
 0x81f   : > { %1361 = vmatpush.msrb.mxu2 %v1935_v49 }
 0x821   : > { %1362 = vmatpush.msrb.mxu2 %v1934_v48 }
 0x890   : > { %v1290_v37 = vpop.xlane.xlu0 %1289 }
 0x891   : > { %v1291_v38 = vmul.f32 %v1290_v37, %v2222_v8 }
 0x893   : > { %v1292_v39 = vsub.f32 %v2440_v35, %v1291_v38 }
 0x895   : > { %v1293_v40 = vmul.f32 %v1292_v39, %v1292_v39 }
 0x897   : > { %v1294_v41 = vsel %vm719_vm0, %v1293_v40, 0.0 }
 0x898   : > { %1295 = vadd.xlane.f32.xlu1 %v1294_v41 }
 0x90b   : > { %v1296_v57 = vpop.xlane.xlu1 %1295 }
 0x90c   : > { %v1297_v58 = vmul.f32 %v1296_v57, %v2222_v8 }
 0x90e   : > { %v1298_v59 = vadd.f32 1e-05, %v1297_v58 }
 0x910   : > { %2054 = vrsqrt.f32 %v1298_v59  ;;  %vm1305_vm11 = vweird.f32 %v1298_v59 }
 0x916   : > { %v2055_v60 = vpop.eup %2054 }
 0x917   : > { %v1300_v61 = vmul.f32 %v2055_v60, %v1298_v59  ;;  %vm1306_vm10 = vweird.f32 %v2055_v60 }
 0x918   : > { %vm1307_vm12 = vmor %vm1305_vm11, %vm1306_vm10 }
 0x919   : > { %v1301_v62 = vmul.f32 %v2055_v60, %v1300_v61 }
 0x91b   : > { %v1302_v63 = vmul.f32 0.5, %v1301_v62 }
 0x91d   : > { %v1303_v1 = vsub.f32 1.5, %v1302_v63 }
 0x91f   : > { %v1304_v2 = vmul.f32 %v2055_v60, %v1303_v1 }
 0x921   : > { %v1308_v5 = vsel %vm1307_vm12, %v2055_v60, %v1304_v2 }
 0x922   : > { %v1309_v6 = vmul.f32 %v1308_v5, %v1292_v39 }
 0x924   : > { %v1313_v9 = vmul.f32 %v2015_v3, %v1309_v6 }
 0x926   : > { %v1317_v11 = vadd.f32 %v2016_v7, %v1313_v9 }
 0x928   : > { %1973 = vmatmul.msk.f32.vlgmr.msrb.gmra.mxu1 %vm719_vm0, %v1317_v11  ;;  %1974 = vmatmul.msk.f32.vlgmr.msrb.gmra.mxu2 %vm719_vm0, %v1317_v11 }
 0x929   : > { %1975 = vmatmul.msk.f32.vlgmr.msrb.gmra.mxu3 %vm719_vm0, %v1317_v11 }
 0x9a5   : > { %v1341_v14 = vpop.f32.mrf.mxu1 }
 0x9a6   : > { %v2502_v17 = vadd.f32 %v2017_v12, %v1341_v14 }
 0x9a8   : > { %v1390_v23 = vmul.f32 %v2502_v17, %v2286_v53  ;;  %v1431_v24 = vmul.f32 %v2502_v17, %v2292_v54  ;;  %v1515_v27 = vmul.f32 %v2502_v17, %v2296_v56  ;;  %v1577_v63 = vmul.f32 %v2502_v17, %v2294_v55 }
 0x9ab   : > { %v1364_v16 = vpop.f32.mrf.mxu2 }
 0x9ac   : > { %v1365_v0 = vadd.f32 %v2018_v13, %v1364_v16  ;;  %v1387_v18 = vpop.f32.mrf.mxu3  ;;  %v1946_v16 = vld [vmem:[%s2688_s9 + $0x30] sm:$0xff] }
 0x9ad   : > { %v1388_v19 = vadd.f32 %v2019_v15, %v1387_v18  ;;  %v1947_v15 = vld [vmem:[%s2688_s9 + $0x38] sm:$0xff]  ;;  %v1945_v18 = vld [vmem:[%s2688_s9 + $0x28] sm:$0xff] }
 0x9ae   : > { %1976 = vmatpush.xpose.msk.msra.mxu1 %vm719_vm0, %v1365_v0  ;;  %1978 = vmatpush.xpose.msk.msra.mxu2 %vm719_vm0, %v1365_v0 }
 0x9af   : > { %v1468_v20 = vmul.f32 %v1388_v19, %v2292_v54  ;;  %v1430_v21 = vmul.f32 %v1388_v19, %v2286_v53  ;;  %v1552_v22 = vmul.f32 %v1388_v19, %v2296_v56  ;;  %v1614_v25 = vmul.f32 %v1388_v19, %v2294_v55  ;;  %v1944_v19 = vld [vmem:[%s2688_s9 + $0x20] sm:$0xff] }
 0x9b1   : > { %1487 = vmatpush.msra.mxu3 %v1468_v20  ;;  %1977 = vmatmul.msk.f32.vlgmr.msra.gmra.mxu1 %vm719_vm0, %v1390_v23 }
 0x9b2   : > { %1982 = vmatpush.xpose.msk.msrb.mxu2 %vm719_vm0, %v1365_v0  ;;  %1510 = vmatpush.msrb.mxu1 %v1430_v21 }
 0x9b3   : > { %1979 = vmatmul.msk.f32.vlgmr.msra.gmra.mxu2 %vm719_vm0, %v1431_v24  ;;  %1571 = vmatpush.msrb.mxu3 %v1552_v22 }
 0x9b4   : > { %1985 = vmatpush.xpose.msk.msra.mxu1 %vm719_vm0, %v1365_v0 }
 0x9b6   : > { %1633 = vmatpush.msra.mxu2 %v1614_v25 }
 0x9bb   : > { %1983 = vmatmul.msk.f32.vlgmr.msrb.gmra.mxu2 %vm719_vm0, %v1515_v27  ;;  %v2020_v27 = vld [vmem:[%s2689_s10 + $0x1] ss:$0 sm:$0xff] }
 0xa2e   : > { %v1414_v53 = vpop.f32.mrf.mxu1 }
 0xa2f   : > { %v1417_v28 = vmul.f32 0.35355338, %v1414_v53 }
 0xa31   : > { %v1418_v54 = vadd.f32 %v1417_v28, %v2313_v4 }
 0xa33   : > { %v1419_v29 = vsel %vm858_vm1, %v1418_v54, -inf }
 0xa34   : > { %1420 = vmax.xlane.f32.xlu2 %v1419_v29 }
 0xa36   : > { %v1452_v30 = vpop.f32.mrf.mxu2 }
 0xa37   : > { %v1455_v31 = vmul.f32 0.35355338, %v1452_v30 }
 0xa39   : > { %v1456_v32 = vadd.f32 %v1455_v31, %v2313_v4 }
 0xa3b   : > { %v1457_v33 = vsel %vm858_vm1, %v1456_v32, -inf }
 0xa3c   : > { %1458 = vmax.xlane.f32.xlu1 %v1457_v33 }
 0xa3e   : > { %v1536_v34 = vpop.f32.mrf.mxu2 }
 0xa3f   : > { %v1539_v36 = vmul.f32 0.35355338, %v1536_v34 }
 0xa41   : > { %v1540_v56 = vadd.f32 %v1539_v36, %v2313_v4  ;;  %v1954_v36 = vld [vmem:[%s2692_s13 + $0x38] sm:$0xff] }
 0xa42   : > { %1714 = vmatpush.msrb.mxu0 %v1954_v36 }
 0xa43   : > { %v1541_v37 = vsel %vm858_vm1, %v1540_v56, -inf }
 0xa44   : > { %1542 = vmax.xlane.f32.xlu2 %v1541_v37  ;;  %v1951_v37 = vld [vmem:[%s2692_s13 + $0x20] sm:$0xff] }
 0xaa7   : > { %v1421_v38 = vpop.xlane.xlu2 %1420 }
 0xaa8   : > { %v1422_v39 = vsub.f32 %v1418_v54, %v1421_v38 }
 0xaaa   : > { %v1423_v40 = vmul.f32 1.442695, %v1422_v39 }
 0xaac   : > { %2056 = vpow2.f32 %v1423_v40 }
 0xaaf   : > { %v1459_v41 = vpop.xlane.xlu1 %1458 }
 0xab0   : > { %v1460_v42 = vsub.f32 %v1456_v32, %v1459_v41 }
 0xab2   : > { %v1461_v10 = vmul.f32 1.442695, %v1460_v42  ;;  %v2057_v43 = vpop.eup %2056 }
 0xab3   : > { %v1425_v44 = vsel %vm858_vm1, %v2057_v43, 0.0 }
 0xab4   : > { %2058 = vpow2.f32 %v1461_v10  ;;  %1426 = vadd.xlane.f32.xlu0 %v1425_v44 }
 0xab7   : > { %v1543_v45 = vpop.xlane.xlu2 %1542 }
 0xab8   : > { %v1544_v46 = vsub.f32 %v1540_v56, %v1543_v45  ;;  %v1952_v56 = vld [vmem:[%s2692_s13 + $0x28] sm:$0xff] }
 0xaba   : > { %v2059_v47 = vpop.eup %2058  ;;  %v1545_v49 = vmul.f32 1.442695, %v1544_v46  ;;  %v2021_v46 = vld [vmem:[%s2690_s11 + $0x1] ss:$0 sm:$0xff] }
 0xabb   : > { %v1463_v50 = vsel %vm858_vm1, %v2059_v47, 0.0 }
 0xabc   : > { %2060 = vpow2.f32 %v1545_v49  ;;  %1464 = vadd.xlane.f32.xlu1 %v1463_v50  ;;  %v2022_v50 = vld [vmem:[%s2691_s12 + $0x1] ss:$0 sm:$0xff] }
 0xac2   : > { %v2061_v51 = vpop.eup %2060 }
 0xac3   : > { %v1547_v48 = vsel %vm858_vm1, %v2061_v51, 0.0 }
 0xac4   : > { %1548 = vadd.xlane.f32.xlu2 %v1547_v48 }
 0xb27   : > { %v1427_v52 = vpop.xlane.xlu0 %1426 }
 0xb28   : > { %2062 = vrcp.f32 %v1427_v52  ;;  %v1971_v52 = vld [vmem:[%s2694_s15 + $0xf8] sm:$0xff] }
 0xb2e   : > { %v2063_v58 = vpop.eup %2062 }
 0xb2f   : > { %v1465_v57 = vpop.xlane.xlu1 %1464  ;;  %v1429_v59 = vmul.f32 %v2063_v58, %v2057_v43  ;;  %v2023_v58 = vld [vmem:[%s2693_s14 + $0x1] ss:$0 sm:$0xff] }
 0xb30   : > { %2064 = vrcp.f32 %v1465_v57  ;;  %v1970_v57 = vld [vmem:[%s2694_s15 + $0xf0] sm:$0xff] }
 0xb31   : > { %1981 = vmatmul.msk.f32.vlgmr.msrb.gmra.mxu1 %vm858_vm1, %v1429_v59  ;;  %v1969_v59 = vld [vmem:[%s2694_s15 + $0xe8] sm:$0xff] }
 0xb32   : > { %1765 = vmatpush.msrb.mxu1 %v1971_v52 }
 0xb34   : > { %1766 = vmatpush.msrb.mxu1 %v1970_v57  ;;  %v1821_v57 = vld [vmem:[%s2698_s19 + $0x18] sm:$0xff] }
 0xb35   : > { %1841 = vmatpush.msrb.mxu2 %v1821_v57 }
 0xb36   : > { %v2065_v60 = vpop.eup %2064  ;;  %1767 = vmatpush.msrb.mxu1 %v1969_v59  ;;  %v1818_v59 = vld [vmem:[%s2698_s19] sm:$0xff] }
 0xb37   : > { %v1467_v61 = vmul.f32 %v2065_v60, %v2059_v47  ;;  %v1549_v62 = vpop.xlane.xlu2 %1548  ;;  %v1968_v60 = vld [vmem:[%s2694_s15 + $0xe0] sm:$0xff] }
 0xb38   : > { %2066 = vrcp.f32 %v1549_v62  ;;  %1768 = vmatpush.msrb.mxu1 %v1968_v60 }
 0xb39   : > { %1980 = vmatmul.msk.f32.vlgmr.msra.gmra.mxu3 %vm858_vm1, %v1467_v61  ;;  %1986 = vmatmul.msk.f32.vlgmr.msra.gmra.mxu1 %vm719_vm0, %v1577_v63  ;;  %v1967_v63 = vld [vmem:[%s2694_s15 + $0xd8] sm:$0xff] }
 0xb3a   : > { %1657 = vmatpush.msra.mxu3 %v1947_v15  ;;  %1769 = vmatpush.msrb.mxu1 %v1967_v63  ;;  %v1959_v15 = vld [vmem:[%s2694_s15 + $0x98] sm:$0xff] }
 0xb3c   : > { %1658 = vmatpush.msra.mxu3 %v1946_v16 }
 0xb3e   : > { %v2067_v1 = vpop.eup %2066  ;;  %1659 = vmatpush.msra.mxu3 %v1945_v18  ;;  %v1957_v18 = vld [vmem:[%s2694_s15 + $0x88] sm:$0xff] }
 0xb3f   : > { %v1551_v2 = vmul.f32 %v2067_v1, %v2061_v51 }
 0xb40   : > { %1660 = vmatpush.msra.mxu3 %v1944_v19 }
 0xb41   : > { %1984 = vmatmul.msk.f32.vlgmr.msrb.gmra.mxu3 %vm858_vm1, %v1551_v2  ;;  %v1966_v2 = vld [vmem:[%s2694_s15 + $0xd0] sm:$0xff] }
 0xb42   : > { %1770 = vmatpush.msrb.mxu1 %v1966_v2 }
 0xbae   : > { %v1512_v3 = vpop.f32.mrf.mxu1 }
 0xbb6   : > { %v1598_v5 = vpop.f32.mrf.mxu1 }
 0xbb7   : > { %v1601_v6 = vmul.f32 0.35355338, %v1598_v5  ;;  %v1965_v5 = vld [vmem:[%s2694_s15 + $0xc8] sm:$0xff] }
 0xbb8   : > { %1771 = vmatpush.msrb.mxu1 %v1965_v5 }
 0xbb9   : > { %v1602_v7 = vadd.f32 %v1601_v6, %v2313_v4 }
 0xbbb   : > { %v1603_v9 = vsel %vm858_vm1, %v1602_v7, -inf }
 0xbbc   : > { %1604 = vmax.xlane.f32.xlu0 %v1603_v9  ;;  %v1489_v20 = vpop.f32.mrf.mxu3 }
 0xbbd   : > { %v1513_v22 = vadd.f32 %v1512_v3, %v1489_v20 }
 0xbc4   : > { %v1573_v21 = vpop.f32.mrf.mxu3 }
 0xbc5   : > { %v1576_v23 = vadd.f32 %v1573_v21, %v1513_v22  ;;  %v1956_v21 = vld [vmem:[%s2694_s15 + $0x80] sm:$0xff] }
 0xc2f   : > { %v1605_v11 = vpop.xlane.xlu0 %1604 }
 0xc30   : > { %v1606_v12 = vsub.f32 %v1602_v7, %v1605_v11  ;;  %v1964_v7 = vld [vmem:[%s2694_s15 + $0xc0] sm:$0xff]  ;;  %v1963_v11 = vld [vmem:[%s2694_s15 + $0xb8] sm:$0xff] }
 0xc31   : > { %1772 = vmatpush.msrb.mxu1 %v1964_v7  ;;  %v2025_v7 = vld [vmem:[%s2696_s17] ss:$0 sm:$0xff] }
 0xc32   : > { %v1607_v13 = vmul.f32 1.442695, %v1606_v12  ;;  %v1962_v12 = vld [vmem:[%s2694_s15 + $0xb0] sm:$0xff] }
 0xc33   : > { %1773 = vmatpush.msrb.mxu1 %v1963_v11 }
 0xc34   : > { %2068 = vpow2.f32 %v1607_v13  ;;  %v1961_v13 = vld [vmem:[%s2694_s15 + $0xa8] sm:$0xff] }
 0xc35   : > { %1774 = vmatpush.msrb.mxu1 %v1962_v12 }
 0xc37   : > { %1775 = vmatpush.msrb.mxu1 %v1961_v13 }
 0xc3a   : > { %v2069_v55 = vpop.eup %2068 }
 0xc3b   : > { %v1609_v14 = vsel %vm858_vm1, %v2069_v55, 0.0 }
 0xc3c   : > { %1610 = vadd.xlane.f32.xlu0 %v1609_v14 }
 0xcaf   : > { %v1611_v4 = vpop.xlane.xlu0 %1610 }
 0xcb0   : > { %2070 = vrcp.f32 %v1611_v4  ;;  %v1958_v4 = vld [vmem:[%s2694_s15 + $0x90] sm:$0xff] }
 0xcb6   : > { %v2071_v17 = vpop.eup %2070 }
 0xcb7   : > { %v1613_v0 = vmul.f32 %v2071_v17, %v2069_v55  ;;  %v1960_v55 = vld [vmem:[%s2694_s15 + $0xa0] sm:$0xff] }
 0xcb8   : > { %1776 = vmatpush.msrb.mxu1 %v1960_v55  ;;  %v2027_v55 = vld [vmem:[%s2699_s20] ss:$0 sm:$0xff] }
 0xcb9   : > { %1987 = vmatmul.msk.f32.vlgmr.msra.gmra.mxu2 %vm858_vm1, %v1613_v0 }
 0xcba   : > { %1777 = vmatpush.msrb.mxu1 %v1959_v15 }
 0xcbc   : > { %1778 = vmatpush.msrb.mxu1 %v1958_v4 }
 0xcbe   : > { %1779 = vmatpush.msrb.mxu1 %v1957_v18 }
 0xcc0   : > { %1780 = vmatpush.msrb.mxu1 %v1956_v21 }
 0xd3c   : > { %v1635_v24 = vpop.f32.mrf.mxu2 }
 0xd3d   : > { %v1638_v25 = vadd.f32 %v1635_v24, %v1576_v23 }
 0xd3f   : > { %1988 = vmatmul.msk.f32.vlgmr.msra.gmra.mxu3 %vm719_vm0, %v1638_v25 }
 0xdc2   : > { %v1662_v53 = vpop.f32.mrf.mxu3 }
 0xdc3   : > { %v1663_v28 = vadd.f32 %v2020_v27, %v1662_v53 }
 0xdc5   : > { %v2557_v54 = vadd.f32 %v1663_v28, %v2440_v35  ;;  %v1953_v35 = vld [vmem:[%s2692_s13 + $0x30] sm:$0xff] }
 0xdc6   : > { %1715 = vmatpush.msrb.mxu0 %v1953_v35 }
 0xdc7   : > { %v1666_v29 = vsel %vm719_vm0, %v2557_v54, 0.0 }
 0xdc8   : > { %1667 = vadd.xlane.f32.xlu1 %v1666_v29  ;;  %1716 = vmatpush.msrb.mxu0 %v1952_v56 }
 0xdca   : > { %1717 = vmatpush.msrb.mxu0 %v1951_v37 }
 0xe3b   : > { %v1668_v30 = vpop.xlane.xlu1 %1667 }
 0xe3c   : > { %v1669_v31 = vmul.f32 %v1668_v30, %v2222_v8 }
 0xe3e   : > { %v1670_v32 = vsub.f32 %v2557_v54, %v1669_v31 }
 0xe40   : > { %v1671_v33 = vmul.f32 %v1670_v32, %v1670_v32 }
 0xe42   : > { %v1672_v34 = vsel %vm719_vm0, %v1671_v33, 0.0 }
 0xe43   : > { %1673 = vadd.xlane.f32.xlu2 %v1672_v34 }
 0xeb6   : > { %v1674_v38 = vpop.xlane.xlu2 %1673 }
 0xeb7   : > { %v1675_v39 = vmul.f32 %v1674_v38, %v2222_v8 }
 0xeb9   : > { %v1676_v40 = vadd.f32 1e-05, %v1675_v39 }
 0xebb   : > { %2072 = vrsqrt.f32 %v1676_v40  ;;  %vm1683_vm14 = vweird.f32 %v1676_v40 }
 0xec1   : > { %v2073_v41 = vpop.eup %2072 }
 0xec2   : > { %v1678_v42 = vmul.f32 %v2073_v41, %v1676_v40  ;;  %vm1684_vm13 = vweird.f32 %v2073_v41 }
 0xec3   : > { %vm1685_vm15 = vmor %vm1683_vm14, %vm1684_vm13 }
 0xec4   : > { %v1679_v10 = vmul.f32 %v2073_v41, %v1678_v42 }
 0xec6   : > { %v1680_v43 = vmul.f32 0.5, %v1679_v10 }
 0xec8   : > { %v1681_v44 = vsub.f32 1.5, %v1680_v43 }
 0xeca   : > { %v1682_v45 = vmul.f32 %v2073_v41, %v1681_v44  ;;  %v2024_v44 = vld [vmem:[%s2695_s16 + $0x1] ss:$0 sm:$0xff] }
 0xecc   : > { %v1686_v47 = vsel %vm1685_vm15, %v2073_v41, %v1682_v45 }
 0xecd   : > { %v1687_v49 = vmul.f32 %v1686_v47, %v1670_v32 }
 0xecf   : > { %v1691_v51 = vmul.f32 %v2021_v46, %v1687_v49 }
 0xed1   : > { %v1695_v48 = vadd.f32 %v2022_v50, %v1691_v51 }
 0xed3   : > { %1989 = vmatmul.msk.f32.vlgmr.msrb.gmra.mxu0 %vm719_vm0, %v1695_v48 }
 0xf50   : > { %v1719_v61 = vpop.f32.mrf.mxu0 }
 0xf51   : > { %v2599_v62 = vadd.f32 %v2023_v58, %v1719_v61  ;;  %v1819_v58 = vld [vmem:[%s2698_s19 + $0x8] sm:$0xff] }
 0xf53   : > { %v1723_v1 = vmul.f32 0.70710677, %v2599_v62  ;;  %v1722_v42 = vmul.f32 0.5, %v2599_v62 }
 0xf55   : > { %v1726_v3 = vand.u32 2147483647, %v1723_v1  ;;  %vm1724_vm5 = vcmp.ge.f32.partialorder %v1723_v1, 0.0 }
 0xf56   : > { %v1725_v40 = vsel %vm1724_vm5, 1.0, %v2091_v26 }
 0xf57   : > { %v1727_v6 = vmul.f32 0.3275911, %v1726_v3  ;;  %v1753_v27 = vsub.f32 0.0, %v1726_v3 }
 0xf59   : > { %v1728_v9 = vadd.f32 1.0, %v1727_v6  ;;  %v1754_v29 = vmul.f32 %v1753_v27, %v1726_v3 }
 0xf5b   : > { %2074 = vrcp.f32 %v1728_v9  ;;  %v1740_v0 = vand.u32 2147483648, %v1728_v9  ;;  %v1738_v20 = vand.u32 2147483647, %v1728_v9  ;;  %vm1734_vm2 = vweird.f32 %v1728_v9 }
 0xf5c   : > { %v1755_v32 = vmul.f32 1.442695, %v1754_v29 }
 0xf5d   : > { %v1741_v23 = vor.u32 1.1754944e-38, %v1740_v0  ;;  %vm1739_vm4 = vcmp.eq.f32.partialorder %v1738_v20, 8.507059e+37 }
 0xf5e   : > { %2076 = vpow2.f32 %v1755_v32 }
 0xf61   : > { %v2075_v14 = vpop.eup %2074 }
 0xf62   : > { %v1730_v16 = vmul.f32 %v2075_v14, %v1728_v9  ;;  %vm1735_vm1 = vweird.f32 %v2075_v14 }
 0xf63   : > { %vm1736_vm3 = vmor %vm1734_vm2, %vm1735_vm1 }
 0xf64   : > { %v1731_v17 = vsub.f32 1.0, %v1730_v16  ;;  %v2077_v37 = vpop.eup %2076 }
 0xf66   : > { %v1732_v19 = vmul.f32 %v2075_v14, %v1731_v17 }
 0xf68   : > { %v1733_v22 = vadd.f32 %v2075_v14, %v1732_v19 }
 0xf6a   : > { %v1737_v24 = vsel %vm1736_vm3, %v2075_v14, %v1733_v22 }
 0xf6b   : > { %v1742_v25 = vsel %vm1739_vm4, %v1741_v23, %v1737_v24 }
 0xf6c   : > { %v1744_v53 = vmul.f32 1.0614054, %v1742_v25 }
 0xf6e   : > { %v1745_v28 = vadd.f32 -1.4531521, %v1744_v53 }
 0xf70   : > { %v1746_v30 = vmul.f32 %v1745_v28, %v1742_v25 }
 0xf72   : > { %v1747_v31 = vadd.f32 1.4214138, %v1746_v30 }
 0xf74   : > { %v1748_v33 = vmul.f32 %v1747_v31, %v1742_v25 }
 0xf76   : > { %v1749_v34 = vadd.f32 -0.28449672, %v1748_v33 }
 0xf78   : > { %v1750_v36 = vmul.f32 %v1749_v34, %v1742_v25 }
 0xf7a   : > { %v1751_v35 = vadd.f32 0.2548296, %v1750_v36 }
 0xf7c   : > { %v1752_v56 = vmul.f32 %v1751_v35, %v1742_v25 }
 0xf7e   : > { %v1757_v38 = vmul.f32 %v2077_v37, %v1752_v56 }
 0xf80   : > { %v1758_v39 = vsub.f32 1.0, %v1757_v38 }
 0xf82   : > { %v1759_v41 = vmul.f32 %v1758_v39, %v1725_v40 }
 0xf84   : > { %v1760_v10 = vadd.f32 1.0, %v1759_v41 }
 0xf86   : > { %v1761_v43 = vmul.f32 %v1760_v10, %v1722_v42 }
 0xf88   : > { %1781 = vmatmul.f32.vlgmr.msrb.gmra.mxu1 %v1761_v43 }
0x1005   : > { %v1782_v45 = vpop.f32.mrf.mxu1 }
0x1006   : > { %v1783_v46 = vadd.f32 %v2024_v44, %v1782_v45 }
0x1008   : > { %v1785_v47 = vadd.f32 %v1783_v46, %v2557_v54  ;;  %v1820_v54 = vld [vmem:[%s2698_s19 + $0x10] sm:$0xff] }
0x1009   : > { %1842 = vmatpush.msrb.mxu2 %v1820_v54 }
0x100a   : > { %v1788_v49 = vsel %vm719_vm0, %v1785_v47, 0.0 }
0x100b   : > { %1789 = vadd.xlane.f32.xlu0 %v1788_v49  ;;  %1843 = vmatpush.msrb.mxu2 %v1819_v58 }
0x100d   : > { %1844 = vmatpush.msrb.mxu2 %v1818_v59 }
0x107e   : > { %v1790_v50 = vpop.xlane.xlu0 %1789 }
0x107f   : > { %v1791_v26 = vmul.f32 %v1790_v50, %v2222_v8 }
0x1081   : > { %v1792_v51 = vsub.f32 %v1785_v47, %v1791_v26 }
0x1083   : > { %v1793_v48 = vmul.f32 %v1792_v51, %v1792_v51 }
0x1085   : > { %v1794_v52 = vsel %vm719_vm0, %v1793_v48, 0.0 }
0x1086   : > { %1795 = vadd.xlane.f32.xlu1 %v1794_v52 }
0x10f9   : > { %v1796_v60 = vpop.xlane.xlu1 %1795 }
0x10fa   : > { %v1797_v61 = vmul.f32 %v1796_v60, %v2222_v8  ;;  %v2026_v8 = vld [vmem:[%s2697_s18] ss:$0 sm:$0xff] }
0x10fc   : > { %v1798_v62 = vadd.f32 1e-05, %v1797_v61 }
0x10fe   : > { %2078 = vrsqrt.f32 %v1798_v62  ;;  %vm1805_vm7 = vweird.f32 %v1798_v62 }
0x1104   : > { %v2079_v63 = vpop.eup %2078 }
0x1105   : > { %v1800_v1 = vmul.f32 %v2079_v63, %v1798_v62  ;;  %vm1806_vm6 = vweird.f32 %v2079_v63 }
0x1106   : > { %vm1807_vm8 = vmor %vm1805_vm7, %vm1806_vm6 }
0x1107   : > { %v1801_v2 = vmul.f32 %v2079_v63, %v1800_v1 }
0x1109   : > { %v1802_v3 = vmul.f32 0.5, %v1801_v2 }
0x110b   : > { %v1803_v5 = vsub.f32 1.5, %v1802_v3 }
0x110d   : > { %v1804_v6 = vmul.f32 %v2079_v63, %v1803_v5 }
0x110f   : > { %v1808_v9 = vsel %vm1807_vm8, %v2079_v63, %v1804_v6 }
0x1110   : > { %v1809_v11 = vmul.f32 %v1808_v9, %v1792_v51 }
0x1112   : > { %v1813_v12 = vmul.f32 %v2025_v7, %v1809_v11 }
0x1114   : > { %v1817_v13 = vadd.f32 %v2026_v8, %v1813_v12 }
0x1116   : > { %1990 = vmatmul.msk.f32.vlgmr.msrb.gmra.mxu2 %vm719_vm0, %v1817_v13 }
0x1199   : > { %v1846_v14 = vpop.f32.mrf.mxu2 }
0x119a   : > { %v1847_v15 = vadd.f32 %v2027_v55, %v1846_v14 }
0x119c   : > { %1849 = vst.msk [vmem:[%s651_s2] sm:$0xff] %vm719_vm0, %v1847_v15 }
0x119d PF: > { %s2724_s1 = sld [smem:[#allocation2_spill]] }
0x11a3   : > { %s31_s2 = sadd.s32 1, %s2724_s1  }
0x11a4   : > { %p28_p4 = scmp.ge.s32.totalorder %s31_s2, 4  }
0x11a6   :  { %30 = sbr.rel (!%p28_p4) target bundleno = 8 (0x8), region = 150 }

// kernel: mae_forward.6
= control target key start
LH: loop header
LB: loop body
LE: loop exit
PB: predicated region body
PF: predicated region fallthrough
CT: control target
= control target key end

     0   :  { %s2683_s0 = inlined_call_operand.vmem [shape: f32[2,24,32], index: 0, kind: input, shape index: {}]   ;;  %s2684_s1 = inlined_call_operand.vmem [shape: f32[1,24,32], index: 1, kind: input, shape index: {}]   ;;  %s2685_s2 = inlined_call_operand.vmem [shape: f32[1,1,32], index: 2, kind: input, shape index: {}]   ;;  %s2686_s3 = inlined_call_operand.vmem [shape: f32[1,1,32], index: 3, kind: input, shape index: {}]   ;;  %s2687_s4 = inlined_call_operand.vmem [shape: f32[1,32,32], index: 4, kind: input, shape index: {}]   ;;  %s2688_s5 = inlined_call_operand.vmem [shape: f32[1,1,32], index: 5, kind: input, shape index: {}]   ;;  %s2689_s6 = inlined_call_operand.vmem [shape: f32[1,32,32], index: 6, kind: input, shape index: {}]   ;;  %s2690_s7 = inlined_call_operand.vmem [shape: f32[1,1,32], index: 7, kind: input, shape index: {}]   ;;  %s2691_s8 = inlined_call_operand.vmem [shape: f32[1,32,32], index: 8, kind: input, shape index: {}]   ;;  %s2692_s9 = inlined_call_operand.vmem [shape: f32[1,1,32], index: 9, kind: input, shape index: {}]   ;;  %s2693_s10 = inlined_call_operand.vmem [shape: f32[1,32,32], index: 10, kind: input, shape index: {}]   ;;  %s2694_s11 = inlined_call_operand.vmem [shape: f32[1,1,32], index: 11, kind: input, shape index: {}]   ;;  %s2695_s12 = inlined_call_operand.vmem [shape: f32[1,1,32], index: 12, kind: input, shape index: {}]   ;;  %s2696_s13 = inlined_call_operand.vmem [shape: f32[1,1,32], index: 13, kind: input, shape index: {}]   ;;  %s2697_s14 = inlined_call_operand.vmem [shape: f32[1,32,128], index: 14, kind: input, shape index: {}]   ;;  %s2698_s15 = inlined_call_operand.vmem [shape: f32[1,1,128], index: 15, kind: input, shape index: {}]   ;;  %s2699_s16 = inlined_call_operand.vmem [shape: f32[1,128,32], index: 16, kind: input, shape index: {}]   ;;  %s2700_s17 = inlined_call_operand.vmem [shape: f32[1,1,32], index: 17, kind: input, shape index: {}]   ;;  %s2701_s18 = inlined_call_operand.vmem [shape: f32[1,32], index: 18, kind: input, shape index: {}]   ;;  %s2702_s19 = inlined_call_operand.vmem [shape: f32[1,32], index: 19, kind: input, shape index: {}]   ;;  %s2703_s20 = inlined_call_operand.vmem [shape: f32[32,48], index: 20, kind: input, shape index: {}]   ;;  %s2704_s21 = inlined_call_operand.vmem [shape: f32[1,48], index: 21, kind: input, shape index: {}]   ;;  %s2705_s22 = inlined_call_operand.vmem [shape: f32[2,24,48], index: 22, kind: output, shape index: {}]  }
   0x1   :  { %2710 = sst [smem:[#allocation2_spill]] %s2683_s0 }
   0x2   :  { %2711 = sst [smem:[#allocation3_spill]] %s2684_s1 }
   0x3   :  { %2712 = sst [smem:[#allocation4_spill]] %s2685_s2 }
   0x4   :  { %2713 = sst [smem:[#allocation5_spill]] %s2686_s3  ;;  %s2208_s3 = smov 0  }
   0x5   :  { %2714 = sst [smem:[#allocation6_spill]] %s2687_s4 }
   0x6   :  { %2715 = sst [smem:[#allocation7_spill]] %s2688_s5 }
   0x7   :  { %2716 = sst [smem:[#allocation8_spill]] %s2689_s6 }
   0x8 LB: > { %s1908_s28 = sadd.s32 4294967295, %s2087_s3   ;;  %p1912_p0 = scmp.ge.s32.totalorder %s2087_s3, 1  ;;  %s2087_s3 = sphi %s2208_s3, %s32_s3  }
   0x9   : > { %p612_p1 = scmp.lt.s32.totalorder %s2087_s3, 3 }
   0xb   : > { %p613_p2 = pnand %p1912_p0, %p612_p1 }
   0xc   : > { %p674_p3 = scmp.lt.s32.totalorder (!%p613_p2), %s1908_s28, 1  ;;  %s2717_s4 = sld [smem:[#allocation3_spill]] (!%p613_p2) }
   0xd   : > { %616 = sbr.rel (%p613_p2) target bundleno = 2509 (0x9cd), region = 108  ;;  %s2718_s6 = sld [smem:[#allocation2_spill]] (!%p613_p2) }
   0xe   : > { %s2719_s30 = sld [smem:[#allocation8_spill]] (!%p613_p2) }
   0xf   : > { %s2720_s27 = sld [smem:[#allocation6_spill]] (!%p613_p2) }
  0x10   : > { %s2722_s2 = sld [smem:[#allocation5_spill]] (!%p613_p2) }
  0x12   : > { %s2726_s28 = smov (!%p674_p3, %s1908_s28), 1  ;;  %v688_v0 = vld [vmem:[%s2717_s4 + $0x8] sm:$0xff]  ;;  %v687_v1 = vld [vmem:[%s2717_s4] sm:$0xff]  ;;  %vm759_vm0 = vcmask 261120   ;;  %v689_v7 = vld [vmem:[%s2717_s4 + $0x10] sm:$0xff]  ;;  %v2089_v12 = vmov 32.0  }
  0x13   : > { %s2709_s0 = smul.u32 24, %s2726_s28  ;;  %2001 = vrcp.f32 %v2089_v12  ;;  %v728_v42 = vld [vmem:[%s2691_s8 + $0x18] sm:$0xff]  ;;  %v727_v44 = vld [vmem:[%s2691_s8 + $0x10] sm:$0xff]  ;;  %v726_v46 = vld [vmem:[%s2691_s8 + $0x8] sm:$0xff] }
  0x14   : > { %v723_v34 = vld [vmem:[%s2719_s30 + $0x18] sm:$0xff]  ;;  %v722_v35 = vld [vmem:[%s2719_s30 + $0x10] sm:$0xff]  ;;  %v721_v36 = vld [vmem:[%s2719_s30 + $0x8] sm:$0xff]  ;;  %927 = vmatpush.msra.mxu2 %v728_v42 }
  0x15   : > { %s678_s25 = scalar_lea.vmem %s2718_s6, %s2709_s0  ;;  %1971 = vmatpush.msra.mxu3 %v723_v34  ;;  %898 = vmatpush.msra.mxu1 %v723_v34  ;;  %v720_v37 = vld [vmem:[%s2719_s30] sm:$0xff]  ;;  %v718_v41 = vld [vmem:[%s2720_s27 + $0x18] sm:$0xff]  ;;  %v717_v43 = vld [vmem:[%s2720_s27 + $0x10] sm:$0xff]  ;;  %s2721_s6 = sld [smem:[#allocation4_spill]]  ;;  %v2090_v34 = vmov 0.0  }
  0x16   : > { %v685_v2 = vld [vmem:[%s678_s25 + $0x8] sm:$0xff]  ;;  %v684_v3 = vld [vmem:[%s678_s25] sm:$0xff]  ;;  %v686_v6 = vld [vmem:[%s678_s25 + $0x10] sm:$0xff]  ;;  %869 = vmatpush.msra.mxu0 %v718_v41  ;;  %928 = vmatpush.msra.mxu2 %v727_v44  ;;  %s2723_s0 = sld [smem:[#allocation7_spill]] }
  0x17   : > { %v2230_v4 = vadd.f32 %v688_v0, %v685_v2  ;;  %v2232_v5 = vadd.f32 %v687_v1, %v684_v3  ;;  %v2241_v10 = vadd.f32 %v689_v7, %v686_v6  ;;  %1972 = vmatpush.msra.mxu3 %v722_v35  ;;  %899 = vmatpush.msra.mxu1 %v722_v35  ;;  %v716_v45 = vld [vmem:[%s2720_s27 + $0x8] sm:$0xff]  ;;  %v715_v49 = vld [vmem:[%s2720_s27] sm:$0xff] }
  0x18   : > { %870 = vmatpush.msra.mxu0 %v717_v43  ;;  %v725_v50 = vld [vmem:[%s2691_s8] sm:$0xff]  ;;  %929 = vmatpush.msra.mxu2 %v726_v46 }
  0x19   : > { %v763_v8 = vsel %vm759_vm0, %v2230_v4, 0.0  ;;  %v760_v9 = vsel %vm759_vm0, %v2232_v5, 0.0  ;;  %v766_v11 = vsel %vm759_vm0, %v2241_v10, 0.0  ;;  %v2002_v13 = vpop.eup %2001  ;;  %1973 = vmatpush.msra.mxu3 %v721_v36  ;;  %900 = vmatpush.msra.mxu1 %v721_v36  ;;  %v1989_v3 = vld [vmem:[%s2722_s2] ss:$0 sm:$0xff]  ;;  %s2724_s2 = smul.u32 24, %s2726_s28 }
  0x1a   : > { %764 = vadd.xlane.f32.xlu0 %v763_v8  ;;  %761 = vadd.xlane.f32.xlu1 %v760_v9  ;;  %v770_v14 = vmul.f32 32.0, %v2002_v13  ;;  %vm774_vm1 = vweird.f32 %v2002_v13 }
  0x1b   : > { %1974 = vmatpush.msra.mxu3 %v720_v37  ;;  %901 = vmatpush.msra.mxu1 %v720_v37  ;;  %v1988_v63 = vld [vmem:[%s2721_s6] ss:$0 sm:$0xff]  ;;  %s683_s1 = scalar_lea.vmem %s2705_s22, %s2724_s2 }
  0x1c   : > { %v771_v15 = vsub.f32 1.0, %v770_v14  ;;  %871 = vmatpush.msra.mxu0 %v716_v45  ;;  %930 = vmatpush.msra.mxu2 %v725_v50 }
  0x1e   : > { %v772_v16 = vmul.f32 %v2002_v13, %v771_v15  ;;  %872 = vmatpush.msra.mxu0 %v715_v49 }
  0x20   : > { %v773_v17 = vadd.f32 %v2002_v13, %v772_v16 }
  0x22   : > { %767 = vadd.xlane.f32.xlu0 %v766_v11  ;;  %v2245_v18 = vsel %vm774_vm1, %v2002_v13, %v773_v17 }
  0x8d   : > { %v765_v19 = vpop.xlane.xlu0 %764  ;;  %v762_v23 = vpop.xlane.xlu1 %761 }
  0x8e   : > { %v777_v20 = vmul.f32 %v2245_v18, %v765_v19  ;;  %v776_v27 = vmul.f32 %v2245_v18, %v762_v23 }
  0x90   : > { %v2249_v21 = vsub.f32 %v2230_v4, %v777_v20  ;;  %v2262_v30 = vsub.f32 %v2232_v5, %v776_v27  ;;  %v693_v27 = vlaneseq }
  0x92   : > { %v783_v22 = vmul.f32 %v2249_v21, %v2249_v21  ;;  %v782_v32 = vmul.f32 %v2262_v30, %v2262_v30 }
  0x94   : > { %v788_v24 = vsel %vm759_vm0, %v783_v22, 0.0  ;;  %v785_v33 = vsel %vm759_vm0, %v782_v32, 0.0 }
  0x95   : > { %v768_v25 = vpop.xlane.xlu0 %767  ;;  %789 = vadd.xlane.f32.xlu1 %v788_v24 }
  0x96   : > { %v778_v26 = vmul.f32 %v2245_v18, %v768_v25 }
  0x98   : > { %v2257_v28 = vsub.f32 %v2241_v10, %v778_v26 }
  0x9a   : > { %v784_v29 = vmul.f32 %v2257_v28, %v2257_v28 }
  0x9c   : > { %v791_v31 = vsel %vm759_vm0, %v784_v29, 0.0  ;;  %v2325_v29 = vand.u32 127, %v693_v27 }
  0x9d   : > { %792 = vadd.xlane.f32.xlu2 %v791_v31  ;;  %v1991_v31 = vld [vmem:[%s2723_s0] ss:$0 sm:$0xff] }
  0x9e   : > { %vm709_vm11 = vcmp.ge.s32.totalorder %v2325_v29, 24  ;;  %vm710_vm12 = vcmp.lt.s32.totalorder %v2325_v29, 32  ;;  %vm701_vm14 = vcmp.ge.s32.totalorder %v2325_v29, 8  ;;  %vm702_vm15 = vcmp.lt.s32.totalorder %v2325_v29, 16 }
  0x9f   : > { %vm711_vm13 = vmand %vm709_vm11, %vm710_vm12  ;;  %vm698_vm1 = vcmp.lt.s32.totalorder %v2325_v29, 8 }
  0xa0   : > { %v2337_v35 = vsel %vm711_vm13, 1.0, %v2090_v34  ;;  %v700_v43 = vsel %vm698_vm1, 1.0, %v2090_v34 }
  0xa5   : > { %786 = vadd.xlane.f32.xlu2 %v785_v33 }
 0x108   : > { %v790_v38 = vpop.xlane.xlu1 %789 }
 0x109   : > { %v795_v39 = vmul.f32 %v790_v38, %v2245_v18 }
 0x10b   : > { %v798_v40 = vadd.f32 1e-05, %v795_v39 }
 0x10d   : > { %2003 = vrsqrt.f32 %v798_v40  ;;  %vm816_vm3 = vweird.f32 %v798_v40 }
 0x110   : > { %v793_v47 = vpop.xlane.xlu2 %792 }
 0x111   : > { %v796_v48 = vmul.f32 %v793_v47, %v2245_v18 }
 0x113   : > { %v2004_v51 = vpop.eup %2003  ;;  %v799_v52 = vadd.f32 1e-05, %v796_v48 }
 0x114   : > { %v811_v53 = vmul.f32 %v2004_v51, %v798_v40  ;;  %vm817_vm2 = vweird.f32 %v2004_v51 }
 0x115   : > { %2005 = vrsqrt.f32 %v799_v52  ;;  %vm818_vm4 = vmor %vm816_vm3, %vm817_vm2  ;;  %vm826_vm6 = vweird.f32 %v799_v52  ;;  %vm705_vm3 = vcmp.ge.s32.totalorder %v2325_v29, 16 }
 0x116   : > { %v812_v54 = vmul.f32 %v2004_v51, %v811_v53  ;;  %vm703_vm2 = vmand %vm701_vm14, %vm702_vm15 }
 0x117   : > { %v704_v44 = vsel %vm703_vm2, 1.0, %v2090_v34 }
 0x118   : > { %v813_v55 = vmul.f32 0.5, %v812_v54  ;;  %v787_v56 = vpop.xlane.xlu2 %786 }
 0x119   : > { %v794_v57 = vmul.f32 %v787_v56, %v2245_v18  ;;  %v1992_v56 = vld [vmem:[%s2692_s9] ss:$0 sm:$0xff] }
 0x11a   : > { %v814_v58 = vsub.f32 1.5, %v813_v55 }
 0x11b   : > { %v2006_v59 = vpop.eup %2005  ;;  %v797_v60 = vadd.f32 1e-05, %v794_v57 }
 0x11c   : > { %v815_v61 = vmul.f32 %v2004_v51, %v814_v58  ;;  %v821_v62 = vmul.f32 %v2006_v59, %v799_v52  ;;  %vm827_vm5 = vweird.f32 %v2006_v59 }
 0x11d   : > { %2007 = vrsqrt.f32 %v797_v60  ;;  %vm828_vm7 = vmor %vm826_vm6, %vm827_vm5  ;;  %vm806_vm8 = vweird.f32 %v797_v60  ;;  %vm695_vm6 = vcmp.lt.s32.totalorder %v2325_v29, 17 }
 0x11e   : > { %v819_v0 = vsel %vm818_vm4, %v2004_v51, %v815_v61  ;;  %v822_v1 = vmul.f32 %v2006_v59, %v821_v62  ;;  %vm706_vm4 = vcmp.lt.s32.totalorder %v2325_v29, 24 }
 0x11f   : > { %v831_v2 = vmul.f32 %v819_v0, %v2249_v21  ;;  %vm707_vm5 = vmand %vm705_vm3, %vm706_vm4 }
 0x120   : > { %v823_v6 = vmul.f32 0.5, %v822_v1 }
 0x121   : > { %v837_v7 = vmul.f32 %v1988_v63, %v831_v2 }
 0x122   : > { %v824_v8 = vsub.f32 1.5, %v823_v6 }
 0x123   : > { %v2008_v9 = vpop.eup %2007  ;;  %v843_v11 = vadd.f32 %v1989_v3, %v837_v7 }
 0x124   : > { %v825_v12 = vmul.f32 %v2006_v59, %v824_v8  ;;  %v801_v13 = vmul.f32 %v2008_v9, %v797_v60  ;;  %vm807_vm9 = vweird.f32 %v2008_v9  ;;  %v708_v60 = vsel %vm707_vm5, 1.0, %v2090_v34 }
 0x125   : > { %1919 = vmatmul.msk.f32.vlgmr.msra.gmra.mxu3 %vm759_vm0, %v843_v11  ;;  %vm808_vm10 = vmor %vm806_vm8, %vm807_vm9 }
 0x126   : > { %v829_v14 = vsel %vm828_vm7, %v2006_v59, %v825_v12  ;;  %v802_v15 = vmul.f32 %v2008_v9, %v801_v13  ;;  %vm994_vm7 = vcmask 195584  }
 0x127   : > { %v832_v16 = vmul.f32 %v829_v14, %v2257_v28 }
 0x128   : > { %v803_v17 = vmul.f32 0.5, %v802_v15 }
 0x129   : > { %v838_v19 = vmul.f32 %v1988_v63, %v832_v16 }
 0x12a   : > { %v804_v20 = vsub.f32 1.5, %v803_v17 }
 0x12b   : > { %v844_v21 = vadd.f32 %v1989_v3, %v838_v19 }
 0x12c   : > { %v805_v22 = vmul.f32 %v2008_v9, %v804_v20  ;;  %v2091_v20 = vmov -1e+30  }
 0x12d   : > { %1920 = vmatmul.msk.f32.gmra.mxu3 %vm759_vm0, %v844_v21 }
 0x12e   : > { %v809_v23 = vsel %vm808_vm10, %v2008_v9, %v805_v22 }
 0x12f   : > { %v830_v24 = vmul.f32 %v809_v23, %v2262_v30  ;;  %v1990_v30 = vld [vmem:[%s2690_s7] ss:$0 sm:$0xff] }
 0x131   : > { %v836_v25 = vmul.f32 %v1988_v63, %v830_v24 }
 0x133   : > { %v842_v26 = vadd.f32 %v1989_v3, %v836_v25 }
 0x135   : > { %1915 = vmatmul.msk.f32.vlgmr.msra.gmra.mxu0 %vm759_vm0, %v842_v26  ;;  %1918 = vmatmul.msk.f32.vlgmr.msra.gmra.mxu1 %vm759_vm0, %v842_v26 }
 0x136   : > { %1921 = vmatmul.msk.f32.vlgmr.msra.gmra.mxu2 %vm759_vm0, %v842_v26 }
 0x13d   : > { %1916 = vmatmul.msk.f32.gmra.mxu0 %vm759_vm0, %v843_v11 }
 0x13e   : > { %1922 = vmatmul.msk.f32.gmra.mxu2 %vm759_vm0, %v843_v11 }
 0x145   : > { %1917 = vmatmul.msk.f32.gmra.mxu0 %vm759_vm0, %v844_v21 }
 0x146   : > { %1923 = vmatmul.msk.f32.gmra.mxu2 %vm759_vm0, %v844_v21  ;;  %v2403_v21 = vsel %vm695_vm6, 0.0, %v2091_v20 }
 0x1a8   : > { %v906_v28 = vpop.f32.mrf.mxu3 }
 0x1a9   : > { %v2347_v38 = vadd.f32 %v1990_v30, %v906_v28 }
 0x1b0   : > { %v909_v32 = vpop.f32.mrf.mxu3 }
 0x1b1   : > { %v2335_v33 = vadd.f32 %v1990_v30, %v909_v32 }
 0x1b2   : > { %v874_v36 = vpop.f32.mrf.mxu0  ;;  %v903_v40 = vpop.f32.mrf.mxu1 }
 0x1b3   : > { %v2339_v37 = vadd.f32 %v1991_v31, %v874_v36  ;;  %1924 = vmatpush.xpose.msk.msrb.mxu3 %vm759_vm0, %v2335_v33  ;;  %1930 = vmatpush.xpose.msk.msrb.mxu0 %vm759_vm0, %v2335_v33  ;;  %v2358_v41 = vadd.f32 %v1990_v30, %v903_v40 }
 0x1b5   : > { %v2351_v39 = vmul.f32 %v2339_v37, %v2337_v35  ;;  %v941_v47 = vmul.f32 %v2339_v37, %v700_v43  ;;  %v1031_v48 = vmul.f32 %v2339_v37, %v704_v44  ;;  %v1181_v14 = vmul.f32 %v2339_v37, %v708_v60 }
 0x1b7   : > { %1925 = vmatpush.xpose.msk.msrb.mxu3 %vm759_vm0, %v2347_v38  ;;  %1931 = vmatpush.xpose.msk.msrb.mxu0 %vm759_vm0, %v2347_v38 }
 0x1b9   : > { %v932_v42 = vpop.f32.mrf.mxu2 }
 0x1ba   : > { %v877_v45 = vpop.f32.mrf.mxu0  ;;  %v933_v61 = vadd.f32 %v1992_v56, %v932_v42 }
 0x1bb   : > { %v878_v46 = vadd.f32 %v1991_v31, %v877_v45  ;;  %1926 = vmatpush.xpose.msk.msrb.mxu3 %vm759_vm0, %v2358_v41  ;;  %1932 = vmatpush.xpose.msk.msrb.mxu0 %vm759_vm0, %v2358_v41 }
 0x1bc   : > { %v1108_v8 = vmul.f32 %v933_v61, %v704_v44  ;;  %v1028_v9 = vmul.f32 %v933_v61, %v700_v43  ;;  %v1258_v11 = vmul.f32 %v933_v61, %v708_v60  ;;  %v1376_v15 = vmul.f32 %v933_v61, %v2337_v35 }
 0x1bd   : > { %v2369_v49 = vmul.f32 %v878_v46, %v2337_v35  ;;  %v942_v53 = vmul.f32 %v878_v46, %v700_v43  ;;  %v1032_v54 = vmul.f32 %v878_v46, %v704_v44  ;;  %v1182_v16 = vmul.f32 %v878_v46, %v708_v60 }
 0x1be   : > { %1927 = vmatmul.msk.f32.vlgmr.msrb.gmra.mxu3 %vm759_vm0, %v941_v47  ;;  %1933 = vmatmul.msk.f32.vlgmr.msrb.gmra.mxu0 %vm759_vm0, %v1031_v48 }
 0x1bf   : > { %1942 = vmatpush.xpose.msk.msra.mxu3 %vm759_vm0, %v2335_v33 }
 0x1c1   : > { %v935_v50 = vpop.f32.mrf.mxu2 }
 0x1c2   : > { %v880_v51 = vpop.f32.mrf.mxu0  ;;  %v936_v58 = vadd.f32 %v1992_v56, %v935_v50 }
 0x1c3   : > { %1943 = vmatpush.xpose.msk.msra.mxu3 %vm759_vm0, %v2347_v38  ;;  %v881_v52 = vadd.f32 %v1991_v31, %v880_v51 }
 0x1c4   : > { %v1109_v3 = vmul.f32 %v936_v58, %v704_v44  ;;  %v1029_v6 = vmul.f32 %v936_v58, %v700_v43  ;;  %v1259_v7 = vmul.f32 %v936_v58, %v708_v60  ;;  %v1377_v13 = vmul.f32 %v936_v58, %v2337_v35 }
 0x1c5   : > { %v2380_v55 = vmul.f32 %v881_v52, %v2337_v35  ;;  %v943_v1 = vmul.f32 %v881_v52, %v700_v43  ;;  %v1033_v2 = vmul.f32 %v881_v52, %v704_v44  ;;  %v1183_v17 = vmul.f32 %v881_v52, %v708_v60 }
 0x1c6   : > { %1928 = vmatmul.msk.f32.gmra.mxu3 %vm759_vm0, %v942_v53  ;;  %1934 = vmatmul.msk.f32.gmra.mxu0 %vm759_vm0, %v1032_v54 }
 0x1c7   : > { %1944 = vmatpush.xpose.msk.msra.mxu3 %vm759_vm0, %v2358_v41 }
 0x1c9   : > { %v938_v57 = vpop.f32.mrf.mxu2 }
 0x1ca   : > { %v939_v59 = vadd.f32 %v1992_v56, %v938_v57 }
 0x1cc   : > { %v1110_v62 = vmul.f32 %v939_v59, %v704_v44  ;;  %v1030_v63 = vmul.f32 %v939_v59, %v700_v43  ;;  %v1260_v0 = vmul.f32 %v939_v59, %v708_v60  ;;  %v1378_v12 = vmul.f32 %v939_v59, %v2337_v35 }
 0x1ce   : > { %1133 = vmatpush.msrb.mxu1 %v1110_v62  ;;  %1168 = vmatpush.msrb.mxu2 %v1030_v63 }
 0x1cf   : > { %1283 = vmatpush.msra.mxu0 %v1260_v0  ;;  %1929 = vmatmul.msk.f32.gmra.mxu3 %vm759_vm0, %v943_v1 }
 0x1d0   : > { %1935 = vmatmul.msk.f32.gmra.mxu0 %vm759_vm0, %v1033_v2  ;;  %1134 = vmatpush.msrb.mxu1 %v1109_v3 }
 0x1d1   : > { %1169 = vmatpush.msrb.mxu2 %v1029_v6  ;;  %1284 = vmatpush.msra.mxu0 %v1259_v7 }
 0x1d2   : > { %1135 = vmatpush.msrb.mxu1 %v1108_v8 }
 0x1d3   : > { %1170 = vmatpush.msrb.mxu2 %v1028_v9  ;;  %1285 = vmatpush.msra.mxu0 %v1258_v11 }
 0x1d4   : > { %1951 = vmatpush.xpose.msk.msra.mxu1 %vm759_vm0, %v2335_v33 }
 0x1d5   : > { %1401 = vmatpush.msra.mxu2 %v1378_v12 }
 0x1d7   : > { %1402 = vmatpush.msra.mxu2 %v1377_v13  ;;  %1945 = vmatmul.msk.f32.vlgmr.msra.gmra.mxu3 %vm759_vm0, %v1181_v14 }
 0x1d8   : > { %1952 = vmatpush.xpose.msk.msra.mxu1 %vm759_vm0, %v2347_v38 }
 0x1d9   : > { %1403 = vmatpush.msra.mxu2 %v1376_v15 }
 0x1dc   : > { %1953 = vmatpush.xpose.msk.msra.mxu1 %vm759_vm0, %v2358_v41 }
 0x1df   : > { %1946 = vmatmul.msk.f32.gmra.mxu3 %vm759_vm0, %v1182_v16 }
 0x1e7   : > { %1947 = vmatmul.msk.f32.gmra.mxu3 %vm759_vm0, %v1183_v17 }
 0x23b   : > { %v1060_v19 = vpop.f32.mrf.mxu0 }
 0x23c   : > { %v1069_v22 = vmul.f32 0.35355338, %v1060_v19 }
 0x23e   : > { %v1072_v23 = vadd.f32 %v1069_v22, %v2403_v21 }
 0x240   : > { %v1075_v24 = vsel %vm994_vm7, %v1072_v23, -inf }
 0x241   : > { %1076 = vmax.xlane.f32.xlu0 %v1075_v24  ;;  %v979_v33 = vpop.f32.mrf.mxu3 }
 0x242   : > { %v988_v43 = vmul.f32 0.35355338, %v979_v33 }
 0x243   : > { %v1063_v25 = vpop.f32.mrf.mxu0 }
 0x244   : > { %v1070_v26 = vmul.f32 0.35355338, %v1063_v25  ;;  %v991_v46 = vadd.f32 %v988_v43, %v2403_v21 }
 0x246   : > { %v1073_v27 = vadd.f32 %v1070_v26, %v2403_v21  ;;  %v995_v52 = vsel %vm994_vm7, %v991_v46, -inf }
 0x248   : > { %v1078_v28 = vsel %vm994_vm7, %v1073_v27, -inf }
 0x249   : > { %1079 = vmax.xlane.f32.xlu1 %v1078_v28  ;;  %v982_v37 = vpop.f32.mrf.mxu3 }
 0x24a   : > { %v989_v51 = vmul.f32 0.35355338, %v982_v37 }
 0x24c   : > { %v992_v56 = vadd.f32 %v989_v51, %v2403_v21 }
 0x24d   : > { %v1066_v30 = vpop.f32.mrf.mxu0 }
 0x24e   : > { %v1071_v29 = vmul.f32 0.35355338, %v1066_v30  ;;  %v998_v59 = vsel %vm994_vm7, %v992_v56, -inf }
 0x250   : > { %v1074_v31 = vadd.f32 %v1071_v29, %v2403_v21 }
 0x252   : > { %v1081_v32 = vsel %vm994_vm7, %v1074_v31, -inf  ;;  %v985_v45 = vpop.f32.mrf.mxu3 }
 0x253   : > { %1082 = vmax.xlane.f32.xlu2 %v1081_v32  ;;  %v990_v61 = vmul.f32 0.35355338, %v985_v45 }
 0x255   : > { %v993_v0 = vadd.f32 %v990_v61, %v2403_v21 }
 0x257   : > { %v1001_v2 = vsel %vm994_vm7, %v993_v0, -inf }
 0x25a   : > { %v1210_v57 = vpop.f32.mrf.mxu3 }
 0x25b   : > { %v1219_v58 = vmul.f32 0.35355338, %v1210_v57 }
 0x25d   : > { %v2419_v63 = vadd.f32 %v1219_v58, %v2403_v21 }
 0x25f   : > { %v1225_v1 = vsel %vm994_vm7, %v2419_v63, -inf }
 0x262   : > { %v1213_v20 = vpop.f32.mrf.mxu3 }
 0x2b4   : > { %v1077_v34 = vpop.xlane.xlu0 %1076 }
 0x2b5   : > { %v1084_v35 = vsub.f32 %v1072_v23, %v1077_v34 }
 0x2b7   : > { %v1087_v36 = vmul.f32 1.442695, %v1084_v35 }
 0x2b9   : > { %2009 = vpow2.f32 %v1087_v36 }
 0x2bc   : > { %v1080_v38 = vpop.xlane.xlu1 %1079 }
 0x2bd   : > { %v1085_v40 = vsub.f32 %v1073_v27, %v1080_v38 }
 0x2bf   : > { %v2010_v41 = vpop.eup %2009  ;;  %v1089_v42 = vmul.f32 1.442695, %v1085_v40 }
 0x2c0   : > { %v1093_v44 = vsel %vm994_vm7, %v2010_v41, 0.0 }
 0x2c1   : > { %2011 = vpow2.f32 %v1089_v42  ;;  %1094 = vadd.xlane.f32.xlu0 %v1093_v44 }
 0x2c6   : > { %v1083_v47 = vpop.xlane.xlu2 %1082 }
 0x2c7   : > { %v2012_v48 = vpop.eup %2011  ;;  %v1086_v50 = vsub.f32 %v1074_v31, %v1083_v47  ;;  %v1216_v31 = vpop.f32.mrf.mxu3 }
 0x2c8   : > { %v1096_v53 = vsel %vm994_vm7, %v2012_v48, 0.0  ;;  %v1221_v37 = vmul.f32 0.35355338, %v1216_v31 }
 0x2c9   : > { %v1091_v54 = vmul.f32 1.442695, %v1086_v50  ;;  %996 = vmax.xlane.f32.xlu0 %v995_v52  ;;  %1097 = vadd.xlane.f32.xlu1 %v1096_v53 }
 0x2ca   : > { %v1224_v45 = vadd.f32 %v1221_v37, %v2403_v21 }
 0x2cb   : > { %2013 = vpow2.f32 %v1091_v54 }
 0x2cc   : > { %v1231_v51 = vsel %vm994_vm7, %v1224_v45, -inf }
 0x2d1   : > { %v2014_v60 = vpop.eup %2013  ;;  %999 = vmax.xlane.f32.xlu1 %v998_v59 }
 0x2d2   : > { %v1099_v62 = vsel %vm994_vm7, %v2014_v60, 0.0 }
 0x2d3   : > { %1100 = vadd.xlane.f32.xlu2 %v1099_v62 }
 0x2d9   : > { %1226 = vmax.xlane.f32.xlu1 %v1225_v1 }
 0x2db   : > { %1002 = vmax.xlane.f32.xlu2 %v1001_v2 }
 0x334   : > { %v1095_v3 = vpop.xlane.xlu0 %1094 }
 0x335   : > { %2015 = vrcp.f32 %v1095_v3 }
 0x33b   : > { %v2016_v6 = vpop.eup %2015 }
 0x33c   : > { %v1098_v7 = vpop.xlane.xlu1 %1097  ;;  %v1105_v8 = vmul.f32 %v2016_v6, %v2010_v41  ;;  %v997_v22 = vpop.xlane.xlu0 %996 }
 0x33d   : > { %2017 = vrcp.f32 %v1098_v7  ;;  %v1004_v25 = vsub.f32 %v991_v46, %v997_v22 }
 0x33e   : > { %1936 = vmatmul.msk.f32.vlgmr.msrb.gmra.mxu1 %vm994_vm7, %v1105_v8 }
 0x33f   : > { %v1007_v27 = vmul.f32 1.442695, %v1004_v25 }
 0x343   : > { %v2018_v9 = vpop.eup %2017 }
 0x344   : > { %v1106_v11 = vmul.f32 %v2018_v9, %v2012_v48 }
 0x346   : > { %v1101_v12 = vpop.xlane.xlu2 %1100  ;;  %1937 = vmatmul.msk.f32.gmra.mxu1 %vm994_vm7, %v1106_v11 }
 0x347   : > { %2019 = vrcp.f32 %v1101_v12 }
 0x348   : > { %2021 = vpow2.f32 %v1007_v27 }
 0x34d   : > { %v2020_v13 = vpop.eup %2019 }
 0x34e   : > { %v1107_v14 = vmul.f32 %v2020_v13, %v2014_v60  ;;  %v1003_v29 = vpop.xlane.xlu2 %1002  ;;  %v2022_v44 = vpop.eup %2021 }
 0x34f   : > { %v1006_v34 = vsub.f32 %v993_v0, %v1003_v29  ;;  %v1013_v50 = vsel %vm994_vm7, %v2022_v44, 0.0 }
 0x350   : > { %1938 = vmatmul.msk.f32.gmra.mxu1 %vm994_vm7, %v1107_v14 }
 0x351   : > { %v1011_v42 = vmul.f32 1.442695, %v1006_v34 }
 0x358   : > { %1954 = vmatmul.msk.f32.vlgmr.msra.gmra.mxu1 %vm759_vm0, %v2351_v39  ;;  %v1220_v39 = vmul.f32 0.35355338, %v1213_v20 }
 0x35a   : > { %v1223_v30 = vadd.f32 %v1220_v39, %v2403_v21 }
 0x35c   : > { %v1228_v35 = vsel %vm994_vm7, %v1223_v30, -inf }
 0x360   : > { %1955 = vmatmul.msk.f32.gmra.mxu1 %vm759_vm0, %v2369_v49  ;;  %v1000_v49 = vpop.xlane.xlu1 %999 }
 0x361   : > { %v1005_v33 = vsub.f32 %v992_v56, %v1000_v49 }
 0x363   : > { %v1009_v38 = vmul.f32 1.442695, %v1005_v33 }
 0x365   : > { %2023 = vpow2.f32 %v1009_v38 }
 0x366   : > { %2025 = vpow2.f32 %v1011_v42 }
 0x368   : > { %1956 = vmatmul.msk.f32.gmra.mxu1 %vm759_vm0, %v2380_v55  ;;  %v1227_v41 = vpop.xlane.xlu1 %1226 }
 0x369   : > { %v1234_v47 = vsub.f32 %v2419_v63, %v1227_v41 }
 0x36b   : > { %v1237_v52 = vmul.f32 1.442695, %v1234_v47  ;;  %v2024_v53 = vpop.eup %2023 }
 0x36c   : > { %v2026_v54 = vpop.eup %2025  ;;  %v1016_v56 = vsel %vm994_vm7, %v2024_v53, 0.0 }
 0x36d   : > { %2027 = vpow2.f32 %v1237_v52 }
 0x373   : > { %v2028_v57 = vpop.eup %2027 }
 0x374   : > { %v1243_v58 = vsel %vm994_vm7, %v2028_v57, 0.0 }
 0x3bb   : > { %v2434_v15 = vpop.f32.mrf.mxu1 }
 0x3c3   : > { %v2436_v16 = vpop.f32.mrf.mxu1 }
 0x3cd   : > { %v2438_v17 = vpop.f32.mrf.mxu1 }
 0x3d5   : > { %v1328_v19 = vpop.f32.mrf.mxu1 }
 0x3d6   : > { %v1337_v23 = vmul.f32 0.35355338, %v1328_v19 }
 0x3d8   : > { %v1340_v24 = vadd.f32 %v1337_v23, %v2403_v21 }
 0x3da   : > { %v1343_v26 = vsel %vm994_vm7, %v1340_v24, -inf }
 0x3db   : > { %1344 = vmax.xlane.f32.xlu0 %v1343_v26 }
 0x3dd   : > { %v1331_v55 = vpop.f32.mrf.mxu1 }
 0x3de   : > { %v1338_v28 = vmul.f32 0.35355338, %v1331_v55 }
 0x3e0   : > { %v1341_v32 = vadd.f32 %v1338_v28, %v2403_v21 }
 0x3e2   : > { %v1346_v36 = vsel %vm994_vm7, %v1341_v32, -inf }
 0x3e3   : > { %1229 = vmax.xlane.f32.xlu0 %v1228_v35  ;;  %1347 = vmax.xlane.f32.xlu2 %v1346_v36 }
 0x3e5   : > { %v1334_v40 = vpop.f32.mrf.mxu1 }
 0x3e6   : > { %v1339_v43 = vmul.f32 0.35355338, %v1334_v40 }
 0x3e8   : > { %v1342_v46 = vadd.f32 %v1339_v43, %v2403_v21  ;;  %v1019_v21 = vsel %vm994_vm7, %v2026_v54, 0.0  ;;  %v733_v43 = vld [vmem:[%s2693_s10 + $0x18] sm:$0xff] }
 0x3e9   : > { %1441 = vmatpush.msrb.mxu3 %v733_v43  ;;  %v737_v43 = vld [vmem:[%s2697_s14] sm:$0xff] }
 0x3ea   : > { %v1349_v48 = vsel %vm994_vm7, %v1342_v46, -inf }
 0x3eb   : > { %1350 = vmax.xlane.f32.xlu1 %v1349_v48  ;;  %1014 = vadd.xlane.f32.xlu0 %v1013_v50 }
 0x3ec   : > { %1232 = vmax.xlane.f32.xlu2 %v1231_v51 }
 0x3f3   : > { %1017 = vadd.xlane.f32.xlu1 %v1016_v56 }
 0x3f4   : > { %1020 = vadd.xlane.f32.xlu2 %v1019_v21  ;;  %v731_v21 = vld [vmem:[%s2693_s10 + $0x8] sm:$0xff] }
 0x3fb   : > { %1244 = vadd.xlane.f32.xlu1 %v1243_v58 }
 0x44e   : > { %v1345_v59 = vpop.xlane.xlu0 %1344 }
 0x44f   : > { %v1352_v60 = vsub.f32 %v1340_v24, %v1345_v59 }
 0x451   : > { %v1355_v61 = vmul.f32 1.442695, %v1352_v60 }
 0x453   : > { %2029 = vpow2.f32 %v1355_v61 }
 0x456   : > { %v1230_v62 = vpop.xlane.xlu0 %1229  ;;  %v1348_v63 = vpop.xlane.xlu2 %1347 }
 0x457   : > { %v1235_v0 = vsub.f32 %v1223_v30, %v1230_v62  ;;  %v1353_v1 = vsub.f32 %v1341_v32, %v1348_v63 }
 0x459   : > { %v2030_v2 = vpop.eup %2029  ;;  %v1239_v3 = vmul.f32 1.442695, %v1235_v0  ;;  %v1357_v6 = vmul.f32 1.442695, %v1353_v1 }
 0x45a   : > { %v1361_v7 = vsel %vm994_vm7, %v2030_v2, 0.0 }
 0x45b   : > { %2031 = vpow2.f32 %v1239_v3  ;;  %1362 = vadd.xlane.f32.xlu0 %v1361_v7 }
 0x45c   : > { %2033 = vpow2.f32 %v1357_v6 }
 0x45e   : > { %v1351_v8 = vpop.xlane.xlu1 %1350  ;;  %v1015_v9 = vpop.xlane.xlu0 %1014 }
 0x45f   : > { %v1354_v11 = vsub.f32 %v1342_v46, %v1351_v8  ;;  %2035 = vrcp.f32 %v1015_v9  ;;  %v1233_v12 = vpop.xlane.xlu2 %1232 }
 0x460   : > { %v1236_v13 = vsub.f32 %v1224_v45, %v1233_v12 }
 0x461   : > { %v2032_v14 = vpop.eup %2031  ;;  %v1359_v19 = vmul.f32 1.442695, %v1354_v11 }
 0x462   : > { %v2034_v20 = vpop.eup %2033  ;;  %v1241_v22 = vmul.f32 1.442695, %v1236_v13  ;;  %v1246_v23 = vsel %vm994_vm7, %v2032_v14, 0.0 }
 0x463   : > { %2037 = vpow2.f32 %v1359_v19  ;;  %1247 = vadd.xlane.f32.xlu0 %v1246_v23  ;;  %v1364_v24 = vsel %vm994_vm7, %v2034_v20, 0.0 }
 0x464   : > { %2039 = vpow2.f32 %v1241_v22  ;;  %1365 = vadd.xlane.f32.xlu2 %v1364_v24 }
 0x465   : > { %v2036_v25 = vpop.eup %2035 }
 0x466   : > { %v1018_v39 = vpop.xlane.xlu1 %1017  ;;  %v1025_v26 = vmul.f32 %v2036_v25, %v2022_v44  ;;  %v732_v44 = vld [vmem:[%s2693_s10 + $0x10] sm:$0xff] }
 0x467   : > { %2041 = vrcp.f32 %v1018_v39  ;;  %v1021_v55 = vpop.xlane.xlu2 %1020  ;;  %1442 = vmatpush.msrb.mxu3 %v732_v44 }
 0x468   : > { %1939 = vmatmul.msk.f32.vlgmr.msrb.gmra.mxu2 %vm994_vm7, %v1025_v26  ;;  %2043 = vrcp.f32 %v1021_v55 }
 0x469   : > { %v2038_v49 = vpop.eup %2037  ;;  %1443 = vmatpush.msrb.mxu3 %v731_v21 }
 0x46a   : > { %v2040_v27 = vpop.eup %2039  ;;  %v1367_v28 = vsel %vm994_vm7, %v2038_v49, 0.0 }
 0x46b   : > { %1368 = vadd.xlane.f32.xlu1 %v1367_v28  ;;  %v1249_v30 = vsel %vm994_vm7, %v2040_v27, 0.0 }
 0x46c   : > { %1250 = vadd.xlane.f32.xlu2 %v1249_v30 }
 0x46d   : > { %v2042_v29 = vpop.eup %2041 }
 0x46e   : > { %v1245_v31 = vpop.xlane.xlu1 %1244  ;;  %v1026_v32 = vmul.f32 %v2042_v29, %v2024_v53  ;;  %v2044_v33 = vpop.eup %2043 }
 0x46f   : > { %2045 = vrcp.f32 %v1245_v31  ;;  %v1027_v36 = vmul.f32 %v2044_v33, %v2026_v54 }
 0x470   : > { %1940 = vmatmul.msk.f32.gmra.mxu2 %vm994_vm7, %v1026_v32 }
 0x475   : > { %v2046_v34 = vpop.eup %2045 }
 0x476   : > { %v1255_v35 = vmul.f32 %v2046_v34, %v2028_v57  ;;  %v730_v57 = vld [vmem:[%s2693_s10] sm:$0xff] }
 0x477   : > { %1444 = vmatpush.msrb.mxu3 %v730_v57 }
 0x478   : > { %1941 = vmatmul.msk.f32.gmra.mxu2 %vm994_vm7, %v1027_v36  ;;  %1948 = vmatmul.msk.f32.vlgmr.msra.gmra.mxu0 %vm994_vm7, %v1255_v35 }
 0x4ce   : > { %v1363_v37 = vpop.xlane.xlu0 %1362 }
 0x4cf   : > { %2047 = vrcp.f32 %v1363_v37 }
 0x4d5   : > { %v2048_v38 = vpop.eup %2047 }
 0x4d6   : > { %v1373_v40 = vmul.f32 %v2048_v38, %v2030_v2  ;;  %v1248_v41 = vpop.xlane.xlu0 %1247 }
 0x4d7   : > { %2049 = vrcp.f32 %v1248_v41  ;;  %v1366_v42 = vpop.xlane.xlu2 %1365  ;;  %v739_v41 = vld [vmem:[%s2697_s14 + $0x10] sm:$0xff] }
 0x4d8   : > { %2051 = vrcp.f32 %v1366_v42  ;;  %1957 = vmatmul.msk.f32.vlgmr.msra.gmra.mxu2 %vm994_vm7, %v1373_v40  ;;  %v740_v40 = vld [vmem:[%s2697_s14 + $0x18] sm:$0xff]  ;;  %v738_v42 = vld [vmem:[%s2697_s14 + $0x8] sm:$0xff] }
 0x4d9   : > { %1560 = vmatpush.msrb.mxu0 %v740_v40 }
 0x4db   : > { %1561 = vmatpush.msrb.mxu0 %v739_v41 }
 0x4dd   : > { %v2050_v45 = vpop.eup %2049  ;;  %1562 = vmatpush.msrb.mxu0 %v738_v42  ;;  %v749_v42 = vld [vmem:[%s2699_s16 + $0x38] sm:$0xff] }
 0x4de   : > { %v2052_v46 = vpop.eup %2051  ;;  %v1369_v47 = vpop.xlane.xlu1 %1368  ;;  %v1256_v48 = vmul.f32 %v2050_v45, %v2032_v14 }
 0x4df   : > { %2053 = vrcp.f32 %v1369_v47  ;;  %v1251_v50 = vpop.xlane.xlu2 %1250  ;;  %v1374_v51 = vmul.f32 %v2052_v46, %v2034_v20  ;;  %1563 = vmatpush.msrb.mxu0 %v737_v43 }
 0x4e0   : > { %2055 = vrcp.f32 %v1251_v50  ;;  %1949 = vmatmul.msk.f32.gmra.mxu0 %vm994_vm7, %v1256_v48 }
 0x4e1   : > { %1958 = vmatmul.msk.f32.gmra.mxu2 %vm994_vm7, %v1374_v51 }
 0x4e5   : > { %v2054_v52 = vpop.eup %2053 }
 0x4e6   : > { %v2056_v53 = vpop.eup %2055  ;;  %v1375_v54 = vmul.f32 %v2054_v52, %v2038_v49 }
 0x4e7   : > { %v1257_v56 = vmul.f32 %v2056_v53, %v2040_v27 }
 0x4e9   : > { %1950 = vmatmul.msk.f32.gmra.mxu0 %vm994_vm7, %v1257_v56  ;;  %1959 = vmatmul.msk.f32.gmra.mxu2 %vm994_vm7, %v1375_v54 }
 0x4eb   : > { %v1172_v58 = vpop.f32.mrf.mxu2 }
 0x4ec   : > { %v1173_v62 = vadd.f32 %v1172_v58, %v2434_v15  ;;  %v1993_v15 = vld [vmem:[%s2694_s11] ss:$0 sm:$0xff] }
 0x4f3   : > { %v1175_v59 = vpop.f32.mrf.mxu2 }
 0x4f4   : > { %v1176_v3 = vadd.f32 %v1175_v59, %v2436_v16 }
 0x4f5   : > { %v1287_v61 = vpop.f32.mrf.mxu0 }
 0x4f6   : > { %v1296_v63 = vadd.f32 %v1287_v61, %v1173_v62  ;;  %v1994_v61 = vld [vmem:[%s2695_s12] ss:$0 sm:$0xff] }
 0x4fb   : > { %v1178_v60 = vpop.f32.mrf.mxu2 }
 0x4fc   : > { %v1179_v11 = vadd.f32 %v1178_v60, %v2438_v17 }
 0x55b   : > { %v1405_v0 = vpop.f32.mrf.mxu2 }
 0x55c   : > { %v1414_v1 = vadd.f32 %v1405_v0, %v1296_v63 }
 0x55d   : > { %v1290_v2 = vpop.f32.mrf.mxu0 }
 0x55e   : > { %1960 = vmatmul.msk.f32.vlgmr.msrb.gmra.mxu3 %vm759_vm0, %v1414_v1  ;;  %v1297_v6 = vadd.f32 %v1290_v2, %v1176_v3  ;;  %v1995_v2 = vld [vmem:[%s2696_s13] ss:$0 sm:$0xff] }
 0x564   : > { %v1408_v7 = vpop.f32.mrf.mxu2 }
 0x565   : > { %v1415_v8 = vadd.f32 %v1408_v7, %v1297_v6 }
 0x566   : > { %v1293_v9 = vpop.f32.mrf.mxu0 }
 0x567   : > { %1961 = vmatmul.msk.f32.gmra.mxu3 %vm759_vm0, %v1415_v8  ;;  %v1298_v12 = vadd.f32 %v1293_v9, %v1179_v11 }
 0x56c   : > { %v1411_v13 = vpop.f32.mrf.mxu2 }
 0x56d   : > { %v1416_v14 = vadd.f32 %v1411_v13, %v1298_v12 }
 0x56f   : > { %1962 = vmatmul.msk.f32.gmra.mxu3 %vm759_vm0, %v1416_v14 }
 0x5e1   : > { %v1446_v19 = vpop.f32.mrf.mxu3 }
 0x5e2   : > { %v1447_v20 = vadd.f32 %v1993_v15, %v1446_v19 }
 0x5e4   : > { %v2491_v16 = vadd.f32 %v1447_v20, %v2232_v5 }
 0x5e6   : > { %v1458_v22 = vsel %vm759_vm0, %v2491_v16, 0.0 }
 0x5e7   : > { %1459 = vadd.xlane.f32.xlu0 %v1458_v22 }
 0x5ea   : > { %v1449_v23 = vpop.f32.mrf.mxu3 }
 0x5eb   : > { %v1450_v17 = vadd.f32 %v1993_v15, %v1449_v23 }
 0x5ed   : > { %v2496_v24 = vadd.f32 %v1450_v17, %v2230_v4 }
 0x5ef   : > { %v1461_v25 = vsel %vm759_vm0, %v2496_v24, 0.0 }
 0x5f0   : > { %1462 = vadd.xlane.f32.xlu1 %v1461_v25 }
 0x5f2   : > { %v1452_v39 = vpop.f32.mrf.mxu3 }
 0x5f3   : > { %v1453_v26 = vadd.f32 %v1993_v15, %v1452_v39 }
 0x5f5   : > { %v2501_v49 = vadd.f32 %v1453_v26, %v2241_v10 }
 0x5f7   : > { %v1464_v5 = vsel %vm759_vm0, %v2501_v49, 0.0 }
 0x5f8   : > { %1465 = vadd.xlane.f32.xlu2 %v1464_v5 }
 0x65a   : > { %v1460_v27 = vpop.xlane.xlu0 %1459 }
 0x65b   : > { %v1467_v55 = vmul.f32 %v1460_v27, %v2245_v18  ;;  %v757_v27 = vld [vmem:[%s2699_s16 + $0x78] sm:$0xff] }
 0x65c   : > { %1697 = vmatpush.msrb.mxu1 %v757_v27 }
 0x65d   : > { %v1470_v28 = vsub.f32 %v2491_v16, %v1467_v55  ;;  %v756_v55 = vld [vmem:[%s2699_s16 + $0x70] sm:$0xff] }
 0x65e   : > { %1698 = vmatpush.msrb.mxu1 %v756_v55 }
 0x65f   : > { %v1473_v4 = vmul.f32 %v1470_v28, %v1470_v28 }
 0x661   : > { %v1476_v30 = vsel %vm759_vm0, %v1473_v4, 0.0  ;;  %v755_v4 = vld [vmem:[%s2699_s16 + $0x68] sm:$0xff] }
 0x662   : > { %1477 = vadd.xlane.f32.xlu0 %v1476_v30  ;;  %1699 = vmatpush.msrb.mxu1 %v755_v4 }
 0x663   : > { %v1463_v29 = vpop.xlane.xlu1 %1462 }
 0x664   : > { %v1468_v31 = vmul.f32 %v1463_v29, %v2245_v18  ;;  %v754_v29 = vld [vmem:[%s2699_s16 + $0x60] sm:$0xff] }
 0x665   : > { %1700 = vmatpush.msrb.mxu1 %v754_v29 }
 0x666   : > { %v1471_v32 = vsub.f32 %v2496_v24, %v1468_v31 }
 0x668   : > { %v1474_v10 = vmul.f32 %v1471_v32, %v1471_v32 }
 0x66a   : > { %v1479_v33 = vsel %vm759_vm0, %v1474_v10, 0.0 }
 0x66b   : > { %1480 = vadd.xlane.f32.xlu1 %v1479_v33  ;;  %v1466_v34 = vpop.xlane.xlu2 %1465  ;;  %v752_v33 = vld [vmem:[%s2699_s16 + $0x50] sm:$0xff] }
 0x66c   : > { %v1469_v35 = vmul.f32 %v1466_v34, %v2245_v18 }
 0x66e   : > { %v2513_v36 = vsub.f32 %v2501_v49, %v1469_v35  ;;  %v751_v35 = vld [vmem:[%s2699_s16 + $0x48] sm:$0xff] }
 0x670   : > { %v1475_v37 = vmul.f32 %v2513_v36, %v2513_v36 }
 0x672   : > { %v1482_v38 = vsel %vm759_vm0, %v1475_v37, 0.0  ;;  %v750_v37 = vld [vmem:[%s2699_s16 + $0x40] sm:$0xff] }
 0x673   : > { %1483 = vadd.xlane.f32.xlu2 %v1482_v38 }
 0x6d5   : > { %v1478_v44 = vpop.xlane.xlu0 %1477 }
 0x6d6   : > { %v1485_v45 = vmul.f32 %v1478_v44, %v2245_v18  ;;  %v748_v44 = vld [vmem:[%s2699_s16 + $0x30] sm:$0xff] }
 0x6d8   : > { %v1488_v46 = vadd.f32 1e-05, %v1485_v45 }
 0x6da   : > { %2057 = vrsqrt.f32 %v1488_v46  ;;  %vm1497_vm9 = vweird.f32 %v1488_v46 }
 0x6de   : > { %v1481_v47 = vpop.xlane.xlu1 %1480 }
 0x6df   : > { %v1486_v48 = vmul.f32 %v1481_v47, %v2245_v18 }
 0x6e0   : > { %v2058_v50 = vpop.eup %2057 }
 0x6e1   : > { %v1492_v51 = vmul.f32 %v2058_v50, %v1488_v46  ;;  %v1489_v52 = vadd.f32 1e-05, %v1486_v48  ;;  %vm1498_vm8 = vweird.f32 %v2058_v50  ;;  %v747_v46 = vld [vmem:[%s2699_s16 + $0x28] sm:$0xff]  ;;  %v746_v48 = vld [vmem:[%s2699_s16 + $0x20] sm:$0xff] }
 0x6e2   : > { %vm1499_vm10 = vmor %vm1497_vm9, %vm1498_vm8 }
 0x6e3   : > { %v1493_v53 = vmul.f32 %v2058_v50, %v1492_v51  ;;  %2059 = vrsqrt.f32 %v1489_v52  ;;  %vm1507_vm12 = vweird.f32 %v1489_v52 }
 0x6e5   : > { %v1494_v54 = vmul.f32 0.5, %v1493_v53 }
 0x6e6   : > { %v1484_v56 = vpop.xlane.xlu2 %1483 }
 0x6e7   : > { %v1495_v21 = vsub.f32 1.5, %v1494_v54  ;;  %v1487_v57 = vmul.f32 %v1484_v56, %v2245_v18  ;;  %v745_v54 = vld [vmem:[%s2699_s16 + $0x18] sm:$0xff] }
 0x6e9   : > { %v2060_v58 = vpop.eup %2059  ;;  %v1496_v59 = vmul.f32 %v2058_v50, %v1495_v21  ;;  %v1490_v60 = vadd.f32 1e-05, %v1487_v57  ;;  %v744_v57 = vld [vmem:[%s2699_s16 + $0x10] sm:$0xff] }
 0x6ea   : > { %v1502_v62 = vmul.f32 %v2060_v58, %v1489_v52  ;;  %vm1508_vm11 = vweird.f32 %v2060_v58 }
 0x6eb   : > { %v1500_v63 = vsel %vm1499_vm10, %v2058_v50, %v1496_v59  ;;  %2061 = vrsqrt.f32 %v1490_v60  ;;  %vm1509_vm13 = vmor %vm1507_vm12, %vm1508_vm11  ;;  %vm1517_vm15 = vweird.f32 %v1490_v60 }
 0x6ec   : > { %v1521_v0 = vmul.f32 %v1500_v63, %v1470_v28  ;;  %v1503_v1 = vmul.f32 %v2060_v58, %v1502_v62  ;;  %v1996_v28 = vld [vmem:[%s2698_s15] ss:$0 sm:$0xff]  ;;  %v743_v62 = vld [vmem:[%s2699_s16 + $0x8] sm:$0xff] }
 0x6ed   : > { %v742_v63 = vld [vmem:[%s2699_s16] sm:$0xff] }
 0x6ee   : > { %v1527_v3 = vmul.f32 %v1994_v61, %v1521_v0  ;;  %v1504_v6 = vmul.f32 0.5, %v1503_v1 }
 0x6f0   : > { %v1505_v7 = vsub.f32 1.5, %v1504_v6  ;;  %v1533_v8 = vadd.f32 %v1995_v2, %v1527_v3 }
 0x6f1   : > { %v2062_v9 = vpop.eup %2061 }
 0x6f2   : > { %v1506_v11 = vmul.f32 %v2060_v58, %v1505_v7  ;;  %v1512_v12 = vmul.f32 %v2062_v9, %v1490_v60  ;;  %1963 = vmatmul.msk.f32.vlgmr.msrb.gmra.mxu0 %vm759_vm0, %v1533_v8  ;;  %vm1518_vm14 = vweird.f32 %v2062_v9 }
 0x6f3   : > { %vm1519_vm1 = vmor %vm1517_vm15, %vm1518_vm14 }
 0x6f4   : > { %v1510_v13 = vsel %vm1509_vm13, %v2060_v58, %v1506_v11  ;;  %v1513_v14 = vmul.f32 %v2062_v9, %v1512_v12 }
 0x6f5   : > { %v1522_v15 = vmul.f32 %v1510_v13, %v1471_v32  ;;  %v753_v32 = vld [vmem:[%s2699_s16 + $0x58] sm:$0xff] }
 0x6f6   : > { %v1514_v19 = vmul.f32 0.5, %v1513_v14  ;;  %1701 = vmatpush.msrb.mxu1 %v753_v32 }
 0x6f7   : > { %v1528_v20 = vmul.f32 %v1994_v61, %v1522_v15 }
 0x6f8   : > { %v1515_v22 = vsub.f32 1.5, %v1514_v19  ;;  %1702 = vmatpush.msrb.mxu1 %v752_v33 }
 0x6f9   : > { %v1534_v23 = vadd.f32 %v1995_v2, %v1528_v20 }
 0x6fa   : > { %v1516_v17 = vmul.f32 %v2062_v9, %v1515_v22  ;;  %1703 = vmatpush.msrb.mxu1 %v751_v35 }
 0x6fb   : > { %1964 = vmatmul.msk.f32.gmra.mxu0 %vm759_vm0, %v1534_v23 }
 0x6fc   : > { %v1520_v25 = vsel %vm1519_vm1, %v2062_v9, %v1516_v17  ;;  %1704 = vmatpush.msrb.mxu1 %v750_v37 }
 0x6fd   : > { %v1523_v39 = vmul.f32 %v1520_v25, %v2513_v36 }
 0x6fe   : > { %1705 = vmatpush.msrb.mxu1 %v749_v42 }
 0x6ff   : > { %v1529_v26 = vmul.f32 %v1994_v61, %v1523_v39 }
 0x700   : > { %1706 = vmatpush.msrb.mxu1 %v748_v44 }
 0x701   : > { %v1535_v5 = vadd.f32 %v1995_v2, %v1529_v26 }
 0x702   : > { %1707 = vmatpush.msrb.mxu1 %v747_v46 }
 0x703   : > { %1965 = vmatmul.msk.f32.gmra.mxu0 %vm759_vm0, %v1535_v5 }
 0x704   : > { %1708 = vmatpush.msrb.mxu1 %v746_v48 }
 0x706   : > { %1709 = vmatpush.msrb.mxu1 %v745_v54 }
 0x708   : > { %1710 = vmatpush.msrb.mxu1 %v744_v57 }
 0x70a   : > { %1711 = vmatpush.msrb.mxu1 %v743_v62 }
 0x70c   : > { %1712 = vmatpush.msrb.mxu1 %v742_v63 }
 0x76f   : > { %v1565_v30 = vpop.f32.mrf.mxu0 }
 0x770   : > { %v2558_v31 = vadd.f32 %v1996_v28, %v1565_v30 }
 0x772   : > { %v2564_v10 = vmul.f32 0.70710677, %v2558_v31 }
 0x774   : > { %v1586_v34 = vand.u32 2147483647, %v2564_v10  ;;  %vm1580_vm14 = vcmp.ge.f32.partialorder %v2564_v10, 0.0 }
 0x776   : > { %v1589_v36 = vmul.f32 0.3275911, %v1586_v34  ;;  %v1667_v9 = vsub.f32 0.0, %v1586_v34 }
 0x778   : > { %v1592_v38 = vadd.f32 1.0, %v1589_v36  ;;  %v1568_v40 = vpop.f32.mrf.mxu0  ;;  %v1670_v20 = vmul.f32 %v1667_v9, %v1586_v34 }
 0x779   : > { %v2576_v41 = vadd.f32 %v1996_v28, %v1568_v40 }
 0x77a   : > { %2063 = vrcp.f32 %v1592_v38  ;;  %v1606_v58 = vand.u32 2147483648, %v1592_v38  ;;  %v1604_v61 = vand.u32 2147483647, %v1592_v38  ;;  %vm1600_vm3 = vweird.f32 %v1592_v38 }
 0x77b   : > { %v2582_v43 = vmul.f32 0.70710677, %v2576_v41  ;;  %v1673_v27 = vmul.f32 1.442695, %v1670_v20 }
 0x77c   : > { %v1607_v2 = vor.u32 1.1754944e-38, %v1606_v58  ;;  %vm1605_vm5 = vcmp.eq.f32.partialorder %v1604_v61, 8.507059e+37 }
 0x77d   : > { %v2588_v45 = vand.u32 2147483647, %v2582_v43  ;;  %vm1581_vm15 = vcmp.ge.f32.partialorder %v2582_v43, 0.0 }
 0x77f   : > { %v1590_v47 = vmul.f32 0.3275911, %v2588_v45  ;;  %v1668_v55 = vsub.f32 0.0, %v2588_v45 }
 0x780   : > { %v2064_v50 = vpop.eup %2063  ;;  %v1571_v51 = vpop.f32.mrf.mxu0 }
 0x781   : > { %v1596_v52 = vmul.f32 %v2064_v50, %v1592_v38  ;;  %v1593_v53 = vadd.f32 1.0, %v1590_v47  ;;  %v2600_v56 = vadd.f32 %v1996_v28, %v1571_v51  ;;  %vm1601_vm2 = vweird.f32 %v2064_v50 }
 0x782   : > { %vm1602_vm4 = vmor %vm1600_vm3, %vm1601_vm2  ;;  %v1671_v35 = vmul.f32 %v1668_v55, %v2588_v45 }
 0x783   : > { %v1597_v21 = vsub.f32 1.0, %v1596_v52  ;;  %2065 = vrcp.f32 %v1593_v53  ;;  %v2606_v59 = vmul.f32 0.70710677, %v2600_v56  ;;  %v1621_v19 = vand.u32 2147483648, %v1593_v53 }
 0x784   : > { %v1619_v23 = vand.u32 2147483647, %v1593_v53  ;;  %vm1615_vm7 = vweird.f32 %v1593_v53  ;;  %v1675_v52 = vmul.f32 1.442695, %v1671_v35 }
 0x785   : > { %v1598_v60 = vmul.f32 %v2064_v50, %v1597_v21  ;;  %v2615_v0 = vand.u32 2147483647, %v2606_v59  ;;  %v1622_v26 = vor.u32 1.1754944e-38, %v1621_v19  ;;  %vm1582_vm1 = vcmp.ge.f32.partialorder %v2606_v59, 0.0 }
 0x786   : > { %vm1620_vm9 = vcmp.eq.f32.partialorder %v1619_v23, 8.507059e+37 }
 0x787   : > { %v1599_v1 = vadd.f32 %v2064_v50, %v1598_v60  ;;  %v1591_v3 = vmul.f32 0.3275911, %v2615_v0  ;;  %v1669_v45 = vsub.f32 0.0, %v2615_v0 }
 0x789   : > { %v2066_v6 = vpop.eup %2065  ;;  %v1603_v7 = vsel %vm1602_vm4, %v2064_v50, %v1599_v1  ;;  %v1594_v12 = vadd.f32 1.0, %v1591_v3  ;;  %v2092_v1 = vmov -1.0   ;;  %v1672_v3 = vmul.f32 %v1669_v45, %v2615_v0 }
 0x78a   : > { %v1608_v8 = vsel %vm1605_vm5, %v1607_v2, %v1603_v7  ;;  %v1611_v11 = vmul.f32 %v2066_v6, %v1593_v53  ;;  %vm1616_vm6 = vweird.f32 %v2066_v6  ;;  %v1583_v2 = vsel %vm1580_vm14, 1.0, %v2092_v1 }
 0x78b   : > { %v1640_v13 = vmul.f32 1.0614054, %v1608_v8  ;;  %2067 = vrcp.f32 %v1594_v12  ;;  %vm1617_vm8 = vmor %vm1615_vm7, %vm1616_vm6  ;;  %v1636_v37 = vand.u32 2147483648, %v1594_v12  ;;  %v1634_v42 = vand.u32 2147483647, %v1594_v12 }
 0x78c   : > { %v1612_v14 = vsub.f32 1.0, %v1611_v11  ;;  %2069 = vpow2.f32 %v1673_v27  ;;  %vm1630_vm11 = vweird.f32 %v1594_v12  ;;  %v1574_v11 = vmul.f32 0.5, %v2558_v31 }
 0x78d   : > { %v1643_v15 = vadd.f32 -1.4531521, %v1640_v13  ;;  %v1637_v50 = vor.u32 1.1754944e-38, %v1636_v37  ;;  %vm1635_vm13 = vcmp.eq.f32.partialorder %v1634_v42, 8.507059e+37  ;;  %2071 = vpow2.f32 %v1675_v52 }
 0x78e   : > { %v1613_v22 = vmul.f32 %v2066_v6, %v1612_v14  ;;  %v1677_v14 = vmul.f32 1.442695, %v1672_v3  ;;  %v1575_v31 = vmul.f32 0.5, %v2576_v41  ;;  %v1997_v41 = vld [vmem:[%s2700_s17] ss:$0 sm:$0xff] }
 0x78f   : > { %v1646_v17 = vmul.f32 %v1643_v15, %v1608_v8  ;;  %v1806_v3 = vld [vmem:[%s2703_s20] sm:$0xff] }
 0x790   : > { %v1614_v25 = vadd.f32 %v2066_v6, %v1613_v22  ;;  %2073 = vpow2.f32 %v1677_v14 }
 0x791   : > { %v1649_v39 = vadd.f32 1.4214138, %v1646_v17  ;;  %v2068_v5 = vpop.eup %2067  ;;  %v1584_v17 = vsel %vm1581_vm15, 1.0, %v2092_v1 }
 0x792   : > { %v1618_v28 = vsel %vm1617_vm8, %v2066_v6, %v1614_v25  ;;  %v1626_v30 = vmul.f32 %v2068_v5, %v1594_v12  ;;  %vm1631_vm10 = vweird.f32 %v2068_v5  ;;  %v2070_v54 = vpop.eup %2069 }
 0x793   : > { %v1652_v4 = vmul.f32 %v1649_v39, %v1608_v8  ;;  %v1623_v29 = vsel %vm1620_vm9, %v1622_v26, %v1618_v28  ;;  %vm1632_vm12 = vmor %vm1630_vm11, %vm1631_vm10  ;;  %v2072_v15 = vpop.eup %2071  ;;  %vm1849_vm11 = vcmask 392192  }
 0x794   : > { %v1641_v32 = vmul.f32 1.0614054, %v1623_v29  ;;  %v1627_v34 = vsub.f32 1.0, %v1626_v30  ;;  %v1585_v30 = vsel %vm1582_vm1, 1.0, %v2092_v1  ;;  %v1808_v1 = vld [vmem:[%s2703_s20 + $0x10] sm:$0xff] }
 0x795   : > { %v1655_v33 = vadd.f32 -0.28449672, %v1652_v4 }
 0x796   : > { %v1644_v36 = vadd.f32 -1.4531521, %v1641_v32  ;;  %v1628_v40 = vmul.f32 %v2068_v5, %v1627_v34  ;;  %v2074_v55 = vpop.eup %2073  ;;  %v1576_v32 = vmul.f32 0.5, %v2600_v56 }
 0x797   : > { %v1658_v38 = vmul.f32 %v1655_v33, %v1608_v8 }
 0x798   : > { %v1647_v44 = vmul.f32 %v1644_v36, %v1623_v29  ;;  %v1629_v47 = vadd.f32 %v2068_v5, %v1628_v40 }
 0x799   : > { %v1661_v46 = vadd.f32 0.2548296, %v1658_v38 }
 0x79a   : > { %v1650_v48 = vadd.f32 1.4214138, %v1647_v44  ;;  %v1633_v53 = vsel %vm1632_vm12, %v2068_v5, %v1629_v47 }
 0x79b   : > { %v1664_v51 = vmul.f32 %v1661_v46, %v1608_v8  ;;  %v1638_v57 = vsel %vm1635_vm13, %v1637_v50, %v1633_v53 }
 0x79c   : > { %v1653_v21 = vmul.f32 %v1650_v48, %v1623_v29  ;;  %v1642_v60 = vmul.f32 1.0614054, %v1638_v57 }
 0x79d   : > { %v1679_v58 = vmul.f32 %v2070_v54, %v1664_v51 }
 0x79e   : > { %v1656_v61 = vadd.f32 -0.28449672, %v1653_v21  ;;  %v1645_v63 = vadd.f32 -1.4531521, %v1642_v60 }
 0x79f   : > { %v1682_v62 = vsub.f32 1.0, %v1679_v58 }
 0x7a0   : > { %v1659_v6 = vmul.f32 %v1656_v61, %v1623_v29  ;;  %v1648_v8 = vmul.f32 %v1645_v63, %v1638_v57  ;;  %v1809_v63 = vld [vmem:[%s2703_s20 + $0x18] sm:$0xff] }
 0x7a1   : > { %v1685_v7 = vmul.f32 %v1682_v62, %v1583_v2  ;;  %1835 = vmatpush.msrb.mxu2 %v1809_v63  ;;  %v1807_v2 = vld [vmem:[%s2703_s20 + $0x8] sm:$0xff] }
 0x7a2   : > { %v1662_v9 = vadd.f32 0.2548296, %v1659_v6  ;;  %v1651_v13 = vadd.f32 1.4214138, %v1648_v8 }
 0x7a3   : > { %v1688_v12 = vadd.f32 1.0, %v1685_v7  ;;  %1836 = vmatpush.msrb.mxu2 %v1808_v1 }
 0x7a4   : > { %v1665_v10 = vmul.f32 %v1662_v9, %v1623_v29  ;;  %v1654_v20 = vmul.f32 %v1651_v13, %v1638_v57 }
 0x7a5   : > { %v1691_v19 = vmul.f32 %v1688_v12, %v1574_v11  ;;  %1837 = vmatpush.msrb.mxu2 %v1807_v2 }
 0x7a6   : > { %v1680_v22 = vmul.f32 %v2072_v15, %v1665_v10  ;;  %v1657_v23 = vadd.f32 -0.28449672, %v1654_v20 }
 0x7a7   : > { %1713 = vmatmul.f32.vlgmr.msrb.gmra.mxu1 %v1691_v19  ;;  %1838 = vmatpush.msrb.mxu2 %v1806_v3 }
 0x7a8   : > { %v1683_v0 = vsub.f32 1.0, %v1680_v22  ;;  %v1660_v25 = vmul.f32 %v1657_v23, %v1638_v57 }
 0x7aa   : > { %v1686_v39 = vmul.f32 %v1683_v0, %v1584_v17  ;;  %v1663_v26 = vadd.f32 0.2548296, %v1660_v25  ;;  %v1998_v17 = vld [vmem:[%s2701_s18] ss:$0 sm:$0xff] }
 0x7ac   : > { %v1689_v5 = vadd.f32 1.0, %v1686_v39  ;;  %v1666_v27 = vmul.f32 %v1663_v26, %v1638_v57 }
 0x7ae   : > { %v1692_v28 = vmul.f32 %v1689_v5, %v1575_v31  ;;  %v1681_v4 = vmul.f32 %v2074_v55, %v1666_v27  ;;  %v1999_v27 = vld [vmem:[%s2702_s19] ss:$0 sm:$0xff] }
 0x7b0   : > { %1716 = vmatmul.f32.gmra.mxu1 %v1692_v28  ;;  %v1684_v43 = vsub.f32 1.0, %v1681_v4 }
 0x7b2   : > { %v1687_v29 = vmul.f32 %v1684_v43, %v1585_v30 }
 0x7b4   : > { %v1690_v33 = vadd.f32 1.0, %v1687_v29 }
 0x7b6   : > { %v1693_v34 = vmul.f32 %v1690_v33, %v1576_v32 }
 0x7b8   : > { %1719 = vmatmul.f32.gmra.mxu1 %v1693_v34 }
 0x824   : > { %v1714_v35 = vpop.f32.mrf.mxu1 }
 0x825   : > { %v1715_v36 = vadd.f32 %v1997_v41, %v1714_v35 }
 0x827   : > { %v1723_v37 = vadd.f32 %v1715_v36, %v2491_v16 }
 0x829   : > { %v1728_v59 = vsel %vm759_vm0, %v1723_v37, 0.0 }
 0x82a   : > { %1729 = vadd.xlane.f32.xlu0 %v1728_v59 }
 0x82d   : > { %v1717_v38 = vpop.f32.mrf.mxu1 }
 0x82e   : > { %v1718_v40 = vadd.f32 %v1997_v41, %v1717_v38 }
 0x830   : > { %v1724_v42 = vadd.f32 %v1718_v40, %v2496_v24 }
 0x832   : > { %v1731_v56 = vsel %vm759_vm0, %v1724_v42, 0.0 }
 0x833   : > { %1732 = vadd.xlane.f32.xlu1 %v1731_v56 }
 0x835   : > { %v1720_v44 = vpop.f32.mrf.mxu1 }
 0x836   : > { %v1721_v46 = vadd.f32 %v1997_v41, %v1720_v44  ;;  %v2000_v44 = vld [vmem:[%s2704_s21] ss:$0 sm:$0xff] }
 0x838   : > { %v1725_v47 = vadd.f32 %v1721_v46, %v2501_v49 }
 0x83a   : > { %v1734_v48 = vsel %vm759_vm0, %v1725_v47, 0.0 }
 0x83b   : > { %1735 = vadd.xlane.f32.xlu2 %v1734_v48 }
 0x89d   : > { %v1730_v50 = vpop.xlane.xlu0 %1729 }
 0x89e   : > { %v1737_v16 = vmul.f32 %v1730_v50, %v2245_v18 }
 0x8a0   : > { %v1740_v51 = vsub.f32 %v1723_v37, %v1737_v16 }
 0x8a2   : > { %v1743_v52 = vmul.f32 %v1740_v51, %v1740_v51 }
 0x8a4   : > { %v1746_v53 = vsel %vm759_vm0, %v1743_v52, 0.0 }
 0x8a5   : > { %1747 = vadd.xlane.f32.xlu0 %v1746_v53 }
 0x8a6   : > { %v1733_v54 = vpop.xlane.xlu1 %1732 }
 0x8a7   : > { %v1738_v24 = vmul.f32 %v1733_v54, %v2245_v18 }
 0x8a9   : > { %v1741_v45 = vsub.f32 %v1724_v42, %v1738_v24 }
 0x8ab   : > { %v1744_v21 = vmul.f32 %v1741_v45, %v1741_v45 }
 0x8ad   : > { %v1749_v57 = vsel %vm759_vm0, %v1744_v21, 0.0 }
 0x8ae   : > { %1750 = vadd.xlane.f32.xlu1 %v1749_v57  ;;  %v1736_v49 = vpop.xlane.xlu2 %1735 }
 0x8af   : > { %v1739_v58 = vmul.f32 %v1736_v49, %v2245_v18 }
 0x8b1   : > { %v2642_v60 = vsub.f32 %v1725_v47, %v1739_v58 }
 0x8b3   : > { %v1745_v61 = vmul.f32 %v2642_v60, %v2642_v60 }
 0x8b5   : > { %v1752_v62 = vsel %vm759_vm0, %v1745_v61, 0.0 }
 0x8b6   : > { %1753 = vadd.xlane.f32.xlu2 %v1752_v62 }
 0x918   : > { %v1748_v6 = vpop.xlane.xlu0 %1747 }
 0x919   : > { %v1755_v7 = vmul.f32 %v1748_v6, %v2245_v18 }
 0x91b   : > { %v1758_v8 = vadd.f32 1e-05, %v1755_v7 }
 0x91d   : > { %2075 = vrsqrt.f32 %v1758_v8  ;;  %vm1767_vm3 = vweird.f32 %v1758_v8 }
 0x921   : > { %v1751_v9 = vpop.xlane.xlu1 %1750 }
 0x922   : > { %v1756_v11 = vmul.f32 %v1751_v9, %v2245_v18 }
 0x923   : > { %v2076_v12 = vpop.eup %2075 }
 0x924   : > { %v1762_v13 = vmul.f32 %v2076_v12, %v1758_v8  ;;  %v1759_v14 = vadd.f32 1e-05, %v1756_v11  ;;  %vm1768_vm2 = vweird.f32 %v2076_v12 }
 0x925   : > { %vm1769_vm4 = vmor %vm1767_vm3, %vm1768_vm2 }
 0x926   : > { %v1763_v10 = vmul.f32 %v2076_v12, %v1762_v13  ;;  %2077 = vrsqrt.f32 %v1759_v14  ;;  %vm1777_vm6 = vweird.f32 %v1759_v14 }
 0x928   : > { %v1764_v15 = vmul.f32 0.5, %v1763_v10 }
 0x929   : > { %v1754_v20 = vpop.xlane.xlu2 %1753 }
 0x92a   : > { %v1765_v19 = vsub.f32 1.5, %v1764_v15  ;;  %v1757_v22 = vmul.f32 %v1754_v20, %v2245_v18 }
 0x92c   : > { %v2078_v23 = vpop.eup %2077  ;;  %v1766_v0 = vmul.f32 %v2076_v12, %v1765_v19  ;;  %v1760_v39 = vadd.f32 1e-05, %v1757_v22 }
 0x92d   : > { %v1772_v25 = vmul.f32 %v2078_v23, %v1759_v14  ;;  %vm1778_vm5 = vweird.f32 %v2078_v23 }
 0x92e   : > { %v1770_v26 = vsel %vm1769_vm4, %v2076_v12, %v1766_v0  ;;  %2079 = vrsqrt.f32 %v1760_v39  ;;  %vm1779_vm7 = vmor %vm1777_vm6, %vm1778_vm5  ;;  %vm1787_vm9 = vweird.f32 %v1760_v39 }
 0x92f   : > { %v1791_v31 = vmul.f32 %v1770_v26, %v1740_v51  ;;  %v1773_v5 = vmul.f32 %v2078_v23, %v1772_v25 }
 0x931   : > { %v1797_v55 = vmul.f32 %v1998_v17, %v1791_v31  ;;  %v1774_v18 = vmul.f32 0.5, %v1773_v5 }
 0x933   : > { %v1775_v28 = vsub.f32 1.5, %v1774_v18  ;;  %v1803_v4 = vadd.f32 %v1999_v27, %v1797_v55 }
 0x934   : > { %v2080_v43 = vpop.eup %2079 }
 0x935   : > { %v1776_v30 = vmul.f32 %v2078_v23, %v1775_v28  ;;  %1966 = vmatmul.msk.f32.vlgmr.msrb.gmra.mxu2 %vm759_vm0, %v1803_v4  ;;  %v1782_v29 = vmul.f32 %v2080_v43, %v1760_v39  ;;  %vm1788_vm8 = vweird.f32 %v2080_v43 }
 0x936   : > { %vm1789_vm10 = vmor %vm1787_vm9, %vm1788_vm8 }
 0x937   : > { %v1780_v32 = vsel %vm1779_vm7, %v2078_v23, %v1776_v30  ;;  %v1783_v33 = vmul.f32 %v2080_v43, %v1782_v29 }
 0x938   : > { %v1792_v34 = vmul.f32 %v1780_v32, %v1741_v45 }
 0x939   : > { %v1784_v41 = vmul.f32 0.5, %v1783_v33 }
 0x93a   : > { %v1798_v35 = vmul.f32 %v1998_v17, %v1792_v34 }
 0x93b   : > { %v1785_v36 = vsub.f32 1.5, %v1784_v41 }
 0x93c   : > { %v1804_v37 = vadd.f32 %v1999_v27, %v1798_v35 }
 0x93d   : > { %v1786_v59 = vmul.f32 %v2080_v43, %v1785_v36 }
 0x93e   : > { %1967 = vmatmul.msk.f32.gmra.mxu2 %vm759_vm0, %v1804_v37 }
 0x93f   : > { %v1790_v38 = vsel %vm1789_vm10, %v2080_v43, %v1786_v59 }
 0x940   : > { %v1793_v40 = vmul.f32 %v1790_v38, %v2642_v60 }
 0x942   : > { %v1799_v42 = vmul.f32 %v1998_v17, %v1793_v40 }
 0x944   : > { %v1805_v56 = vadd.f32 %v1999_v27, %v1799_v42 }
 0x946   : > { %1968 = vmatmul.msk.f32.gmra.mxu2 %vm759_vm0, %v1805_v56 }
 0x9b8   : > { %v1840_v46 = vpop.f32.mrf.mxu2 }
 0x9b9   : > { %v1841_v47 = vadd.f32 %v2000_v44, %v1840_v46 }
 0x9bb   : > { %1850 = vst.msk [vmem:[%s683_s1] sm:$0xff] %vm1849_vm11, %v1841_v47 }
 0x9c1   : > { %v1843_v48 = vpop.f32.mrf.mxu2 }
 0x9c2   : > { %v1844_v50 = vadd.f32 %v2000_v44, %v1843_v48 }
 0x9c4   : > { %1851 = vst.msk [vmem:[%s683_s1 + $0x8] sm:$0xff] %vm1849_vm11, %v1844_v50 }
 0x9c9   : > { %v1846_v16 = vpop.f32.mrf.mxu2 }
 0x9ca   : > { %v1847_v51 = vadd.f32 %v2000_v44, %v1846_v16 }
 0x9cc   : > { %1852 = vst.msk [vmem:[%s683_s1 + $0x10] sm:$0xff] %vm1849_vm11, %v1847_v51 }
 0x9cd PF: > { %s32_s3 = sadd.s32 1, %s2087_s3  }
 0x9ce   : > { %p29_p4 = scmp.ge.s32.totalorder %s32_s3, 4  }
 0x9d0   :  { %31 = sbr.rel (!%p29_p4) target bundleno = 8 (0x8), region = 138 }

// kernel: mae_forward.7
= control target key start
LH: loop header
LB: loop body
LE: loop exit
PB: predicated region body
PF: predicated region fallthrough
CT: control target
= control target key end

     0   :  { %vm31_vm0 = vcmask 392192   ;;  %s243_s0 = inlined_call_operand.vmem [shape: f32[32,48], index: 0, kind: input, shape index: {}]   ;;  %s244_s1 = inlined_call_operand.vmem [shape: f32[32,48], index: 1, kind: input, shape index: {}]   ;;  %s245_s2 = inlined_call_operand.vmem [shape: f32[32,1], index: 2, kind: input, shape index: {}]   ;;  %s246_s3 = inlined_call_operand.hbm [shape: f32[1,1], index: 3, kind: output, shape index: {}]  }
   0x1   :  { %v15_v0 = vld [vmem:[%s243_s0] sm:$0xff]  ;;  %v17_v2 = vld [vmem:[%s243_s0 + $0x10] sm:$0xff]  ;;  %v16_v5 = vld [vmem:[%s243_s0 + $0x8] sm:$0xff] }
   0x2   :  { %v19_v1 = vld [vmem:[%s244_s1] sm:$0xff]  ;;  %v21_v4 = vld [vmem:[%s244_s1 + $0x10] sm:$0xff]  ;;  %v20_v6 = vld [vmem:[%s244_s1 + $0x8] sm:$0xff] }
   0x3   :  { %v23_v3 = vsub.f32 %v15_v0, %v19_v1  ;;  %v25_v7 = vsub.f32 %v17_v2, %v21_v4  ;;  %v18_v8 = vld [vmem:[%s243_s0 + $0x18] sm:$0xff]  ;;  %v24_v11 = vsub.f32 %v16_v5, %v20_v6 }
   0x4   :  { %v22_v9 = vld [vmem:[%s244_s1 + $0x18] sm:$0xff] }
   0x5   :  { %v27_v10 = vmul.f32 %v23_v3, %v23_v3 }
   0x6   :  { %8 = vsyncpa [#allocation3], 0  ;;  %v29_v12 = vmul.f32 %v25_v7, %v25_v7  ;;  %v26_v13 = vsub.f32 %v18_v8, %v22_v9  ;;  %v28_v16 = vmul.f32 %v24_v11, %v24_v11  ;;  %v170_v20 = vmov 48.0   ;;  %v55_v30 = vld [vmem:[%s245_s2] sm:$0xff]  ;;  %v57_v32 = vld [vmem:[%s245_s2 + $0x10] sm:$0xff]  ;;  %s171_s8 = smov [#allocation2]  }
   0x7   :  { %v32_v14 = vsel %vm31_vm0, %v27_v10, 0.0  ;;  %140 = vrcp.f32 %v170_v20  ;;  %v56_v33 = vld [vmem:[%s245_s2 + $0x8] sm:$0xff]  ;;  %v58_v37 = vld [vmem:[%s245_s2 + $0x18] sm:$0xff]  ;;  %vm63_vm2 = vcmask 7168   ;;  %s121_s9 = sshll.u32 %s171_s8, 4  ;;  %s123_s12 = sshll.u32 %s246_s3, 4  ;;  %s122_s9 = int_to_ptr.vmem [resolvable:$true] %s121_s9  ;;  %s124_s12 = int_to_ptr.hbm [resolvable:$true] %s123_s12 }
   0x8   :  { %33 = vadd.xlane.f32.xlu0 %v32_v14  ;;  %v38_v15 = vsel %vm31_vm0, %v29_v12, 0.0  ;;  %v30_v17 = vmul.f32 %v26_v13, %v26_v13  ;;  %v35_v18 = vsel %vm31_vm0, %v28_v16, 0.0  ;;  %v80_v43 = vsel %vm63_vm2, %v55_v30, 0.0 }
   0x9   :  { %39 = vadd.xlane.f32.xlu1 %v38_v15  ;;  %v81_v45 = vsel %vm63_vm2, %v56_v33, 0.0  ;;  %v83_v52 = vsel %vm63_vm2, %v57_v32, 0.0  ;;  %v85_v55 = vsel %vm63_vm2, %v58_v37, 0.0  ;;  %vm114_vm7 = vcmask 0  }
   0xa   :  { %v41_v19 = vsel %vm31_vm0, %v30_v17, 0.0  ;;  %v82_v51 = vadd.f32 %v81_v45, %v80_v43 }
   0xc   :  { %v84_v54 = vadd.f32 %v83_v52, %v82_v51 }
   0xd   :  { %v141_v21 = vpop.eup %140 }
   0xe   :  { %v45_v22 = vmul.f32 48.0, %v141_v21  ;;  %vm49_vm1 = vweird.f32 %v141_v21  ;;  %v86_v56 = vadd.f32 %v85_v55, %v84_v54 }
  0x10   :  { %36 = vadd.xlane.f32.xlu0 %v35_v18  ;;  %v46_v23 = vsub.f32 1.0, %v45_v22 }
  0x11   :  { %42 = vadd.xlane.f32.xlu1 %v41_v19 }
  0x12   :  { %v47_v24 = vmul.f32 %v141_v21, %v46_v23 }
  0x14   :  { %v48_v25 = vadd.f32 %v141_v21, %v47_v24 }
  0x16   :  { %v50_v28 = vsel %vm49_vm1, %v141_v21, %v48_v25 }
  0x7b   :  { %v34_v26 = vpop.xlane.xlu0 %33 }
  0x7c   :  { %v40_v27 = vpop.xlane.xlu1 %39  ;;  %v51_v29 = vmul.f32 %v50_v28, %v34_v26 }
  0x7d   :  { %v53_v31 = vmul.f32 %v50_v28, %v40_v27 }
  0x7e   :  { %v59_v35 = vmul.f32 %v55_v30, %v51_v29 }
  0x7f   :  { %v61_v40 = vmul.f32 %v57_v32, %v53_v31 }
  0x80   :  { %v64_v44 = vsel %vm63_vm2, %v59_v35, 0.0 }
  0x81   :  { %v67_v48 = vsel %vm63_vm2, %v61_v40, 0.0 }
  0x83   :  { %v37_v34 = vpop.xlane.xlu0 %36 }
  0x84   :  { %v52_v36 = vmul.f32 %v50_v28, %v37_v34  ;;  %v43_v38 = vpop.xlane.xlu1 %42 }
  0x85   :  { %v54_v39 = vmul.f32 %v50_v28, %v43_v38 }
  0x86   :  { %v60_v41 = vmul.f32 %v56_v33, %v52_v36 }
  0x87   :  { %v62_v42 = vmul.f32 %v58_v37, %v54_v39 }
  0x88   :  { %v65_v46 = vsel %vm63_vm2, %v60_v41, 0.0 }
  0x89   :  { %v66_v47 = vadd.f32 %v65_v46, %v64_v44  ;;  %v69_v49 = vsel %vm63_vm2, %v62_v42, 0.0 }
  0x8b   :  { %v68_v50 = vadd.f32 %v67_v48, %v66_v47 }
  0x8d   :  { %v70_v53 = vadd.f32 %v69_v49, %v68_v50 }
  0x8f   :  { %71 = vadd.xlane.f32.xlu2 %v70_v53 }
  0x97   :  { %87 = vadd.xlane.f32.xlu2 %v86_v56 }
 0x102   :  { %v72_v57 = vpop.xlane.xlu2 %71 }
 0x103   :  { %v73_v58 = vrot.slane %v72_v57, 4 }
 0x105   :  { %v74_v59 = vadd.f32 %v73_v58, %v72_v57 }
 0x107   :  { %v75_v60 = vrot.slane %v74_v59, 2 }
 0x109   :  { %v76_v61 = vadd.f32 %v75_v60, %v74_v59 }
 0x10a   :  { %v88_v62 = vpop.xlane.xlu2 %87 }
 0x10b   :  { %v89_v63 = vrot.slane %v88_v62, 4  ;;  %v77_v0 = vrot.slane %v76_v61, 1 }
 0x10d   :  { %v90_v1 = vadd.f32 %v89_v63, %v88_v62  ;;  %v78_v2 = vadd.f32 %v77_v0, %v76_v61 }
 0x10f   :  { %v91_v3 = vrot.slane %v90_v1, 2  ;;  %132 = vpush %v78_v2 }
 0x111   :  { %v92_v4 = vadd.f32 %v91_v3, %v90_v1 }
 0x113   :  { %v93_v5 = vrot.slane %v92_v4, 1 }
 0x115   :  { %v94_v6 = vadd.f32 %v93_v5, %v92_v4 }
 0x117   :  { %134 = vpush %v94_v6 }
 0x140   :  { %s133_s2 = spop %132 }
 0x148   :  { %s135_s7 = spop %134 }
 0x149   :  { %v96_v7 = vstv %s135_s7 }
 0x14a   :  { %142 = vrcp.f32 %v96_v7  ;;  %v108_v11 = vand.u32 2147483648, %v96_v7  ;;  %v106_v13 = vand.u32 2147483647, %v96_v7  ;;  %vm102_vm4 = vweird.f32 %v96_v7 }
 0x14c   :  { %v109_v15 = vor.u32 1.1754944e-38, %v108_v11  ;;  %vm107_vm6 = vcmp.eq.f32.partialorder %v106_v13, 8.507059e+37 }
 0x150   :  { %v143_v8 = vpop.eup %142 }
 0x151   :  { %v98_v9 = vmul.f32 %v143_v8, %v96_v7  ;;  %vm103_vm3 = vweird.f32 %v143_v8 }
 0x152   :  { %vm104_vm5 = vmor %vm102_vm4, %vm103_vm3 }
 0x153   :  { %v99_v10 = vsub.f32 1.0, %v98_v9 }
 0x155   :  { %v100_v12 = vmul.f32 %v143_v8, %v99_v10 }
 0x157   :  { %v101_v14 = vadd.f32 %v143_v8, %v100_v12 }
 0x159   :  { %v105_v16 = vsel %vm104_vm5, %v143_v8, %v101_v14 }
 0x15a   :  { %v110_v17 = vsel %vm107_vm6, %v109_v15, %v105_v16 }
 0x15b   :  { %136 = vpush %v110_v17 }
 0x18c   :  { %s137_s13 = spop %136 }
 0x18d   :  { %s112_s14 = smul.f32 %s137_s13, %s133_s2 }
 0x18f   :  { %v113_v18 = vstv %s112_s14 }
 0x190   :  { %115 = vst.msk [vmem:[#allocation2] sm:$0x1] %vm114_vm7, %v113_v18 }
 0x191   :  { %126 = dma.vmem_to_hbm [thread:$0]  %s122_s9, 16, %s124_s12, [#allocation3]  }
 0x192   :  { %168 = dma.done.wait [#allocation3], 16  }
 0x193   :  { %169 = vsyncadd [#allocation3], 4294967280 }
 0x194   :  { %131 = vsyncpa [#allocation3], 1 }

</bundles_post_ra>
